<compile_context>
chip_gen: v5e
topology: v5e:2x2
jax: 0.10.0
libtpu: 0.0.40
codegen_flags: <defaults>
</compile_context>

<pallas_src>
import math

import jax
import jax.numpy as jnp
from jax import lax
from jax.experimental import pallas as pl
from jax.experimental.pallas import tpu as pltpu

# ----------------------------------------------------------------------------
# Small (but structurally faithful) hyper-parameters.
# ----------------------------------------------------------------------------
FEAT_DIM = 64
HIDDEN_DIM = 32
REPARAM_DIM = 32
LATENT_DIM = 16
CLUSTER_EMBED_DIM = 32
NEIGHBOR_MAP_DIM = 101
CLUSTER_NUM = 27
TEMP = 0.5

LANE = 128
NUM_TORCH_LINEARS = 17
NUM_KERNEL_LINEARS = 16     # feat_decode(2) & cluster_decode_1(6) fused


def _linear_shapes():
    """(in, out) shapes of the 17 nn.Linear layers, in a fixed order."""
    h = HIDDEN_DIM
    return [
        (LATENT_DIM, REPARAM_DIM),                                   # 0  latent_decode
        (REPARAM_DIM, h),                                            # 1  reparam_decode
        (h, 2 * h), (2 * h, 3 * h), (3 * h, 4 * h), (4 * h, FEAT_DIM),          # 2-5
        (h, 2 * h), (2 * h, 3 * h), (3 * h, 4 * h), (4 * h, CLUSTER_NUM),       # 6-9
        (CLUSTER_EMBED_DIM, h),                                      # 10 cluster_to_neighbor
        (h, 2 * h), (2 * h, 3 * h), (3 * h, 4 * h),                  # 11-13 neighbor_decode*
        (4 * h, 5 * h), (5 * h, 6 * h), (6 * h, NEIGHBOR_MAP_DIM),   # 14-16 add0, add1, _3
    ]


def _rpad(n):
    return ((n + LANE - 1) // LANE) * LANE


# ----------------------------------------------------------------------------
# Pallas kernel: all three MLP branches fused, lane-dense throughout.
# ----------------------------------------------------------------------------
def decoder_kernel(z_ref, idx_ref, emb_ref, *refs):
    p = refs[: 2 * NUM_KERNEL_LINEARS]                 # w0, b0, w1, b1, ...
    feat_o, neigh_o, clus_o = refs[2 * NUM_KERNEL_LINEARS:]

    def lin(x, i):
        w = p[2 * i][...]                              # bf16 [Kpad, Npad]
        b = p[2 * i + 1][...]                          # f32  [1, Npad] -> broadcasts
        y = jnp.dot(x.astype(jnp.bfloat16), w, preferred_element_type=jnp.float32)
        return y + b

    relu = lambda v: jnp.maximum(v, 0.0)
    sig = jax.nn.sigmoid

    # shared trunk
    zd1 = relu(lin(z_ref[...], 0))                     # latent_decode
    zd = relu(lin(zd1, 1))                             # reparam_decode

    # fused feat/cluster heads: one [tb,128]@[128,256] MXU pass
    fc = relu(lin(zd, 2))
    f = fc[:, :LANE]                                   # feat_decode output
    c = fc[:, LANE:]                                   # cluster_decode_1 output

    # feat branch
    f = relu(lin(f, 3))
    f = relu(lin(f, 4))
    f = sig(lin(f, 5))
    feat_o[...] = f

    # cluster branch (1/temp folded into layer-8 params)
    c = relu(lin(c, 6))
    c = relu(lin(c, 7))
    c = sig(lin(c, 8))
    clus_o[...] = c

    # neighbor branch: in-kernel embedding gather via one-hot matmul
    tb = idx_ref.shape[0]
    iota = lax.broadcasted_iota(jnp.int32, (tb, LANE), 1)
    onehot = (iota == idx_ref[...]).astype(jnp.bfloat16)          # [tb, 128]
    emb = jnp.dot(onehot, emb_ref[...], preferred_element_type=jnp.float32)
    c2n = relu(lin(emb, 9))                            # cluster_to_neighbor
    n = relu(lin(zd + c2n, 10))
    n = relu(lin(n, 11))
    n = relu(lin(n, 12))
    n = relu(lin(n, 13))
    n = relu(lin(n, 14))
    n = sig(lin(n, 15))                                # 1/temp folded into params
    neigh_o[...] = n


# ----------------------------------------------------------------------------
# One-time parameter prep: pad widths to 128-multiples, fuse heads, fold temp,
# cast matmul weights to bf16 (biases stay f32).
# ----------------------------------------------------------------------------
def prepare_params(params):
    lin = params["linears"]

    def pad_wb(w, b, scale=1.0):
        fin, fout = w.shape
        kp, np_ = _rpad(fin), _rpad(fout)
        wp = jnp.zeros((kp, np_), jnp.float32).at[:fin, :fout].set(w * scale)
        bp = jnp.zeros((1, np_), jnp.float32).at[0, :fout].set(b * scale)
        return wp.astype(jnp.bfloat16), bp

    inv_t = 1.0 / TEMP
    prepared = []
    prepared.append(pad_wb(*lin[0]))                   # k0  <- latent_decode
    prepared.append(pad_wb(*lin[1]))                   # k1  <- reparam_decode

    w2, b2 = pad_wb(*lin[2])                           # feat_decode
    w6, b6 = pad_wb(*lin[6])                           # cluster_decode_1
    prepared.append((jnp.concatenate([w2, w6], axis=1),     # k2 fused [128,256]
                     jnp.concatenate([b2, b6], axis=1)))

    prepared.append(pad_wb(*lin[3]))                   # k3
    prepared.append(pad_wb(*lin[4]))                   # k4
    prepared.append(pad_wb(*lin[5]))                   # k5
    prepared.append(pad_wb(*lin[7]))                   # k6
    prepared.append(pad_wb(*lin[8]))                   # k7
    prepared.append(pad_wb(*lin[9], scale=inv_t))      # k8  (temp folded)
    prepared.append(pad_wb(*lin[10]))                  # k9  cluster_to_neighbor
    for i in (11, 12, 13, 14, 15):
        prepared.append(pad_wb(*lin[i]))               # k10..k14
    prepared.append(pad_wb(*lin[16], scale=inv_t))     # k15 (temp folded)

    flat = []
    for w, b in prepared:
        flat.append(w)
        flat.append(b)

    emb = params["embedding"]
    emb_pad = jnp.zeros((LANE, _rpad(CLUSTER_EMBED_DIM)), jnp.float32)
    emb_pad = emb_pad.at[:CLUSTER_NUM, :CLUSTER_EMBED_DIM].set(emb)
    emb_pad = emb_pad.astype(jnp.bfloat16)
    return emb_pad, flat


# ----------------------------------------------------------------------------
# Wrapper
# ----------------------------------------------------------------------------
def node_decoder_forward(z, cluster_ind_of_neighbors, prepped, tb=128):
    """Training-path forward. Returns (feat, neighbor_map, cluster, 1)."""
    emb_pad, flat_params = prepped
    B = z.shape[0]
    Bp = pl.cdiv(B, tb) * tb                 # pad batch to a tile multiple
    zin = _rpad(LATENT_DIM)

    z_pad = jnp.zeros((Bp, zin), jnp.float32).at[:B, : z.shape[1]].set(z)
    idx = jnp.zeros((Bp, 1), jnp.int32).at[:B, 0].set(
        cluster_ind_of_neighbors.astype(jnp.int32))

    def batch_spec(d):
        return pl.BlockSpec((tb, d), lambda i: (i, 0))

    def const_spec(shape):
        return pl.BlockSpec(shape, lambda i: (0, 0))

    in_specs = [batch_spec(zin), batch_spec(1), const_spec(emb_pad.shape)]
    in_specs += [const_spec(a.shape) for a in flat_params]

    out_specs = (batch_spec(LANE), batch_spec(LANE), batch_spec(LANE))
    out_shape = tuple(
        jax.ShapeDtypeStruct((Bp, LANE), jnp.float32) for _ in range(3))

    # For large B the 1-D grid has multiple steps; "parallel" lets v7x shard
    # it across both TensorCores (no-op on v5e/v6e).
    feat_p, neigh_p, clus_p = pl.pallas_call(
        decoder_kernel,
        grid=(Bp // tb,),
        in_specs=in_specs,
        out_specs=out_specs,
        out_shape=out_shape,
        compiler_params=pltpu.CompilerParams(dimension_semantics=("parallel",)),
    )(z_pad, idx, emb_pad, *flat_params)

    return (feat_p[:B, :FEAT_DIM],
            neigh_p[:B, :NEIGHBOR_MAP_DIM],
            clus_p[:B, :CLUSTER_NUM],
            1)


# ----------------------------------------------------------------------------
# Deterministic parameter init (PyTorch-Linear-style uniform bounds).
# ----------------------------------------------------------------------------
def init_params(key):
    linears = []
    for i, (fin, fout) in enumerate(_linear_shapes()):
        kw = jax.random.fold_in(key, 2 * i)
        kb = jax.random.fold_in(key, 2 * i + 1)
        bound = 1.0 / math.sqrt(fin)
        w = jax.random.uniform(kw, (fin, fout), jnp.float32, -bound, bound)
        b = jax.random.uniform(kb, (fout,), jnp.float32, -bound, bound)
        linears.append((w, b))
    kemb = jax.random.fold_in(key, 1000)
    embedding = jax.random.normal(kemb, (CLUSTER_NUM, CLUSTER_EMBED_DIM), jnp.float32)
    return {"linears": linears, "embedding": embedding}


# ----------------------------------------------------------------------------
# Pure-JAX f32 reference (unfused, unpadded) for correctness check.
# ----------------------------------------------------------------------------
def reference_forward(z, cluster_ind_of_neighbors, params):
    lin = params["linears"]

    def L(x, i):
        w, b = lin[i]
        return x @ w + b

    relu, sig = jax.nn.relu, jax.nn.sigmoid
    zd1 = relu(L(z, 0))
    zd = relu(L(zd1, 1))
    f = sig(L(relu(L(relu(L(relu(L(zd, 2)), 3)), 4)), 5))
    c = sig(L(relu(L(relu(L(relu(L(zd, 6)), 7)), 8)), 9) / TEMP)
    emb = params["embedding"][cluster_ind_of_neighbors]
    c2n = relu(L(emb, 10))
    n = relu(L(zd + c2n, 11))
    n = relu(L(n, 12))
    n = relu(L(n, 13))
    n = relu(L(n, 14))
    n = relu(L(n, 15))
    n = sig(L(n, 16) / TEMP)
    return f, n, c


# ----------------------------------------------------------------------------
if __name__ == "__main__":
    key = jax.random.PRNGKey(0)
    params = init_params(jax.random.fold_in(key, 7))
    prepped = prepare_params(params)

    B = 8
    z = jax.random.normal(jax.random.fold_in(key, 1), (B, LATENT_DIM), jnp.float32)
    cluster_ind = jax.random.randint(
        jax.random.fold_in(key, 2), (B,), 0, CLUSTER_NUM, dtype=jnp.int32
    )

    feat, neighbor_map, cluster, flag = node_decoder_forward(z, cluster_ind, prepped)
    jax.block_until_ready((feat, neighbor_map, cluster))

    rf, rn, rc = reference_forward(z, cluster_ind, params)
    assert feat.shape == (B, FEAT_DIM)
    assert neighbor_map.shape == (B, NEIGHBOR_MAP_DIM)
    assert cluster.shape == (B, CLUSTER_NUM)
    assert flag == 1
    # bf16 matmul operands with f32 accumulation -> looser tolerance vs f32 ref.
    assert jnp.allclose(feat, rf, atol=5e-2), "feat mismatch"
    assert jnp.allclose(neighbor_map, rn, atol=5e-2), "neighbor_map mismatch"
    assert jnp.allclose(cluster, rc, atol=5e-2), "cluster mismatch"

    print("KERNEL_OK")
</pallas_src>

<mosaic_0001>
module attributes {stable_mosaic.version = 11 : i64} {
  func.func @decoder_kernel(%arg0: i32, %arg1: memref<128x128xf32, #tpu.memory_space<vmem>>, %arg2: memref<128x1xi32, #tpu.memory_space<vmem>>, %arg3: memref<128x128xbf16, #tpu.memory_space<vmem>>, %arg4: memref<128x128xbf16, #tpu.memory_space<vmem>>, %arg5: memref<1x128xf32, #tpu.memory_space<vmem>>, %arg6: memref<128x128xbf16, #tpu.memory_space<vmem>>, %arg7: memref<1x128xf32, #tpu.memory_space<vmem>>, %arg8: memref<128x256xbf16, #tpu.memory_space<vmem>>, %arg9: memref<1x256xf32, #tpu.memory_space<vmem>>, %arg10: memref<128x128xbf16, #tpu.memory_space<vmem>>, %arg11: memref<1x128xf32, #tpu.memory_space<vmem>>, %arg12: memref<128x128xbf16, #tpu.memory_space<vmem>>, %arg13: memref<1x128xf32, #tpu.memory_space<vmem>>, %arg14: memref<128x128xbf16, #tpu.memory_space<vmem>>, %arg15: memref<1x128xf32, #tpu.memory_space<vmem>>, %arg16: memref<128x128xbf16, #tpu.memory_space<vmem>>, %arg17: memref<1x128xf32, #tpu.memory_space<vmem>>, %arg18: memref<128x128xbf16, #tpu.memory_space<vmem>>, %arg19: memref<1x128xf32, #tpu.memory_space<vmem>>, %arg20: memref<128x128xbf16, #tpu.memory_space<vmem>>, %arg21: memref<1x128xf32, #tpu.memory_space<vmem>>, %arg22: memref<128x128xbf16, #tpu.memory_space<vmem>>, %arg23: memref<1x128xf32, #tpu.memory_space<vmem>>, %arg24: memref<128x128xbf16, #tpu.memory_space<vmem>>, %arg25: memref<1x128xf32, #tpu.memory_space<vmem>>, %arg26: memref<128x128xbf16, #tpu.memory_space<vmem>>, %arg27: memref<1x128xf32, #tpu.memory_space<vmem>>, %arg28: memref<128x128xbf16, #tpu.memory_space<vmem>>, %arg29: memref<1x128xf32, #tpu.memory_space<vmem>>, %arg30: memref<128x256xbf16, #tpu.memory_space<vmem>>, %arg31: memref<1x256xf32, #tpu.memory_space<vmem>>, %arg32: memref<256x256xbf16, #tpu.memory_space<vmem>>, %arg33: memref<1x256xf32, #tpu.memory_space<vmem>>, %arg34: memref<256x128xbf16, #tpu.memory_space<vmem>>, %arg35: memref<1x128xf32, #tpu.memory_space<vmem>>, %arg36: memref<128x128xf32, #tpu.memory_space<vmem>>, %arg37: memref<128x128xf32, #tpu.memory_space<vmem>>, %arg38: memref<128x128xf32, #tpu.memory_space<vmem>>) attributes {dimension_semantics = [#tpu.dimension_semantics<parallel>], iteration_bounds = array<i64: 1>, scalar_prefetch = 0 : i64, scratch_operands = 0 : i64, tpu.core_type = #tpu.core_type<tc>, window_params = [{transform_indices = @transform_0, window_bounds = array<i64: 128, 128>}, {transform_indices = @transform_1, window_bounds = array<i64: 128, 1>}, {pipeline_mode = #tpu.pipeline_mode<synchronous>, transform_indices = @transform_2, window_bounds = array<i64: 128, 128>}, {pipeline_mode = #tpu.pipeline_mode<synchronous>, transform_indices = @transform_3, window_bounds = array<i64: 128, 128>}, {pipeline_mode = #tpu.pipeline_mode<synchronous>, transform_indices = @transform_4, window_bounds = array<i64: 1, 128>}, {pipeline_mode = #tpu.pipeline_mode<synchronous>, transform_indices = @transform_5, window_bounds = array<i64: 128, 128>}, {pipeline_mode = #tpu.pipeline_mode<synchronous>, transform_indices = @transform_6, window_bounds = array<i64: 1, 128>}, {pipeline_mode = #tpu.pipeline_mode<synchronous>, transform_indices = @transform_7, window_bounds = array<i64: 128, 256>}, {pipeline_mode = #tpu.pipeline_mode<synchronous>, transform_indices = @transform_8, window_bounds = array<i64: 1, 256>}, {pipeline_mode = #tpu.pipeline_mode<synchronous>, transform_indices = @transform_9, window_bounds = array<i64: 128, 128>}, {pipeline_mode = #tpu.pipeline_mode<synchronous>, transform_indices = @transform_10, window_bounds = array<i64: 1, 128>}, {pipeline_mode = #tpu.pipeline_mode<synchronous>, transform_indices = @transform_11, window_bounds = array<i64: 128, 128>}, {pipeline_mode = #tpu.pipeline_mode<synchronous>, transform_indices = @transform_12, window_bounds = array<i64: 1, 128>}, {pipeline_mode = #tpu.pipeline_mode<synchronous>, transform_indices = @transform_13, window_bounds = array<i64: 128, 128>}, {pipeline_mode = #tpu.pipeline_mode<synchronous>, transform_indices = @transform_14, window_bounds = array<i64: 1, 128>}, {pipeline_mode = #tpu.pipeline_mode<synchronous>, transform_indices = @transform_15, window_bounds = array<i64: 128, 128>}, {pipeline_mode = #tpu.pipeline_mode<synchronous>, transform_indices = @transform_16, window_bounds = array<i64: 1, 128>}, {pipeline_mode = #tpu.pipeline_mode<synchronous>, transform_indices = @transform_17, window_bounds = array<i64: 128, 128>}, {pipeline_mode = #tpu.pipeline_mode<synchronous>, transform_indices = @transform_18, window_bounds = array<i64: 1, 128>}, {pipeline_mode = #tpu.pipeline_mode<synchronous>, transform_indices = @transform_19, window_bounds = array<i64: 128, 128>}, {pipeline_mode = #tpu.pipeline_mode<synchronous>, transform_indices = @transform_20, window_bounds = array<i64: 1, 128>}, {pipeline_mode = #tpu.pipeline_mode<synchronous>, transform_indices = @transform_21, window_bounds = array<i64: 128, 128>}, {pipeline_mode = #tpu.pipeline_mode<synchronous>, transform_indices = @transform_22, window_bounds = array<i64: 1, 128>}, {pipeline_mode = #tpu.pipeline_mode<synchronous>, transform_indices = @transform_23, window_bounds = array<i64: 128, 128>}, {pipeline_mode = #tpu.pipeline_mode<synchronous>, transform_indices = @transform_24, window_bounds = array<i64: 1, 128>}, {pipeline_mode = #tpu.pipeline_mode<synchronous>, transform_indices = @transform_25, window_bounds = array<i64: 128, 128>}, {pipeline_mode = #tpu.pipeline_mode<synchronous>, transform_indices = @transform_26, window_bounds = array<i64: 1, 128>}, {pipeline_mode = #tpu.pipeline_mode<synchronous>, transform_indices = @transform_27, window_bounds = array<i64: 128, 128>}, {pipeline_mode = #tpu.pipeline_mode<synchronous>, transform_indices = @transform_28, window_bounds = array<i64: 1, 128>}, {pipeline_mode = #tpu.pipeline_mode<synchronous>, transform_indices = @transform_29, window_bounds = array<i64: 128, 256>}, {pipeline_mode = #tpu.pipeline_mode<synchronous>, transform_indices = @transform_30, window_bounds = array<i64: 1, 256>}, {pipeline_mode = #tpu.pipeline_mode<synchronous>, transform_indices = @transform_31, window_bounds = array<i64: 256, 256>}, {pipeline_mode = #tpu.pipeline_mode<synchronous>, transform_indices = @transform_32, window_bounds = array<i64: 1, 256>}, {pipeline_mode = #tpu.pipeline_mode<synchronous>, transform_indices = @transform_33, window_bounds = array<i64: 256, 128>}, {pipeline_mode = #tpu.pipeline_mode<synchronous>, transform_indices = @transform_34, window_bounds = array<i64: 1, 128>}, {transform_indices = @transform_35, window_bounds = array<i64: 128, 128>}, {transform_indices = @transform_36, window_bounds = array<i64: 128, 128>}, {transform_indices = @transform_37, window_bounds = array<i64: 128, 128>}]} {
    %c0 = arith.constant 0 : index
    %c0_0 = arith.constant 0 : index
    %0 = vector.load %arg1[%c0, %c0_0] : memref<128x128xf32, #tpu.memory_space<vmem>>, vector<128x128xf32>
    %c0_1 = arith.constant 0 : index
    %c0_2 = arith.constant 0 : index
    %1 = vector.load %arg4[%c0_1, %c0_2] : memref<128x128xbf16, #tpu.memory_space<vmem>>, vector<128x128xbf16>
    %c0_3 = arith.constant 0 : index
    %c0_4 = arith.constant 0 : index
    %2 = vector.load %arg5[%c0_3, %c0_4] : memref<1x128xf32, #tpu.memory_space<vmem>>, vector<1x128xf32>
    %3 = arith.truncf %0 : vector<128x128xf32> to vector<128x128xbf16>
    %cst = arith.constant dense<0.000000e+00> : vector<128x128xf32>
    %4 = tpu.matmul %3, %1, %cst {dimension_numbers = #tpu.dot_dimension_numbers<[1], [0], [0], [1], [0, 0, 1, 1], [], []>} : vector<128x128xbf16>, vector<128x128xbf16>, vector<128x128xf32> -> vector<128x128xf32>
    %5 = vector.broadcast %2 : vector<1x128xf32> to vector<128x128xf32>
    %6 = arith.addf %4, %5 : vector<128x128xf32>
    %cst_5 = arith.constant 0.000000e+00 : f32
    %7 = vector.broadcast %cst_5 : f32 to vector<128x128xf32>
    %8 = arith.maximumf %6, %7 : vector<128x128xf32>
    %c0_6 = arith.constant 0 : index
    %c0_7 = arith.constant 0 : index
    %9 = vector.load %arg6[%c0_6, %c0_7] : memref<128x128xbf16, #tpu.memory_space<vmem>>, vector<128x128xbf16>
    %c0_8 = arith.constant 0 : index
    %c0_9 = arith.constant 0 : index
    %10 = vector.load %arg7[%c0_8, %c0_9] : memref<1x128xf32, #tpu.memory_space<vmem>>, vector<1x128xf32>
    %11 = arith.truncf %8 : vector<128x128xf32> to vector<128x128xbf16>
    %cst_10 = arith.constant dense<0.000000e+00> : vector<128x128xf32>
    %12 = tpu.matmul %11, %9, %cst_10 {dimension_numbers = #tpu.dot_dimension_numbers<[1], [0], [0], [1], [0, 0, 1, 1], [], []>} : vector<128x128xbf16>, vector<128x128xbf16>, vector<128x128xf32> -> vector<128x128xf32>
    %13 = vector.broadcast %10 : vector<1x128xf32> to vector<128x128xf32>
    %14 = arith.addf %12, %13 : vector<128x128xf32>
    %cst_11 = arith.constant 0.000000e+00 : f32
    %15 = vector.broadcast %cst_11 : f32 to vector<128x128xf32>
    %16 = arith.maximumf %14, %15 : vector<128x128xf32>
    %c0_12 = arith.constant 0 : index
    %c0_13 = arith.constant 0 : index
    %17 = vector.load %arg8[%c0_12, %c0_13] : memref<128x256xbf16, #tpu.memory_space<vmem>>, vector<128x256xbf16>
    %c0_14 = arith.constant 0 : index
    %c0_15 = arith.constant 0 : index
    %18 = vector.load %arg9[%c0_14, %c0_15] : memref<1x256xf32, #tpu.memory_space<vmem>>, vector<1x256xf32>
    %19 = arith.truncf %16 : vector<128x128xf32> to vector<128x128xbf16>
    %cst_16 = arith.constant dense<0.000000e+00> : vector<128x256xf32>
    %20 = tpu.matmul %19, %17, %cst_16 {dimension_numbers = #tpu.dot_dimension_numbers<[1], [0], [0], [1], [0, 0, 1, 1], [], []>} : vector<128x128xbf16>, vector<128x256xbf16>, vector<128x256xf32> -> vector<128x256xf32>
    %21 = vector.broadcast %18 : vector<1x256xf32> to vector<128x256xf32>
    %22 = arith.addf %20, %21 : vector<128x256xf32>
    %cst_17 = arith.constant 0.000000e+00 : f32
    %23 = vector.broadcast %cst_17 : f32 to vector<128x256xf32>
    %24 = arith.maximumf %22, %23 : vector<128x256xf32>
    %25 = vector.extract_strided_slice %24 {offsets = [0, 0], sizes = [128, 128], strides = [1, 1]} : vector<128x256xf32> to vector<128x128xf32>
    %26 = vector.extract_strided_slice %24 {offsets = [0, 128], sizes = [128, 128], strides = [1, 1]} : vector<128x256xf32> to vector<128x128xf32>
    %c0_18 = arith.constant 0 : index
    %c0_19 = arith.constant 0 : index
    %27 = vector.load %arg10[%c0_18, %c0_19] : memref<128x128xbf16, #tpu.memory_space<vmem>>, vector<128x128xbf16>
    %c0_20 = arith.constant 0 : index
    %c0_21 = arith.constant 0 : index
    %28 = vector.load %arg11[%c0_20, %c0_21] : memref<1x128xf32, #tpu.memory_space<vmem>>, vector<1x128xf32>
    %29 = arith.truncf %25 : vector<128x128xf32> to vector<128x128xbf16>
    %cst_22 = arith.constant dense<0.000000e+00> : vector<128x128xf32>
    %30 = tpu.matmul %29, %27, %cst_22 {dimension_numbers = #tpu.dot_dimension_numbers<[1], [0], [0], [1], [0, 0, 1, 1], [], []>} : vector<128x128xbf16>, vector<128x128xbf16>, vector<128x128xf32> -> vector<128x128xf32>
    %31 = vector.broadcast %28 : vector<1x128xf32> to vector<128x128xf32>
    %32 = arith.addf %30, %31 : vector<128x128xf32>
    %cst_23 = arith.constant 0.000000e+00 : f32
    %33 = vector.broadcast %cst_23 : f32 to vector<128x128xf32>
    %34 = arith.maximumf %32, %33 : vector<128x128xf32>
    %c0_24 = arith.constant 0 : index
    %c0_25 = arith.constant 0 : index
    %35 = vector.load %arg12[%c0_24, %c0_25] : memref<128x128xbf16, #tpu.memory_space<vmem>>, vector<128x128xbf16>
    %c0_26 = arith.constant 0 : index
    %c0_27 = arith.constant 0 : index
    %36 = vector.load %arg13[%c0_26, %c0_27] : memref<1x128xf32, #tpu.memory_space<vmem>>, vector<1x128xf32>
    %37 = arith.truncf %34 : vector<128x128xf32> to vector<128x128xbf16>
    %cst_28 = arith.constant dense<0.000000e+00> : vector<128x128xf32>
    %38 = tpu.matmul %37, %35, %cst_28 {dimension_numbers = #tpu.dot_dimension_numbers<[1], [0], [0], [1], [0, 0, 1, 1], [], []>} : vector<128x128xbf16>, vector<128x128xbf16>, vector<128x128xf32> -> vector<128x128xf32>
    %39 = vector.broadcast %36 : vector<1x128xf32> to vector<128x128xf32>
    %40 = arith.addf %38, %39 : vector<128x128xf32>
    %cst_29 = arith.constant 0.000000e+00 : f32
    %41 = vector.broadcast %cst_29 : f32 to vector<128x128xf32>
    %42 = arith.maximumf %40, %41 : vector<128x128xf32>
    %c0_30 = arith.constant 0 : index
    %c0_31 = arith.constant 0 : index
    %43 = vector.load %arg14[%c0_30, %c0_31] : memref<128x128xbf16, #tpu.memory_space<vmem>>, vector<128x128xbf16>
    %c0_32 = arith.constant 0 : index
    %c0_33 = arith.constant 0 : index
    %44 = vector.load %arg15[%c0_32, %c0_33] : memref<1x128xf32, #tpu.memory_space<vmem>>, vector<1x128xf32>
    %45 = arith.truncf %42 : vector<128x128xf32> to vector<128x128xbf16>
    %cst_34 = arith.constant dense<0.000000e+00> : vector<128x128xf32>
    %46 = tpu.matmul %45, %43, %cst_34 {dimension_numbers = #tpu.dot_dimension_numbers<[1], [0], [0], [1], [0, 0, 1, 1], [], []>} : vector<128x128xbf16>, vector<128x128xbf16>, vector<128x128xf32> -> vector<128x128xf32>
    %47 = vector.broadcast %44 : vector<1x128xf32> to vector<128x128xf32>
    %48 = arith.addf %46, %47 : vector<128x128xf32>
    %49 = arith.negf %48 : vector<128x128xf32>
    %50 = math.exp %49 : vector<128x128xf32>
    %cst_35 = arith.constant 1.000000e+00 : f32
    %51 = vector.broadcast %cst_35 : f32 to vector<128x128xf32>
    %52 = arith.addf %51, %50 : vector<128x128xf32>
    %53 = arith.divf %51, %52 : vector<128x128xf32>
    %c0_36 = arith.constant 0 : index
    %c0_37 = arith.constant 0 : index
    %54 = vector.load %arg36[%c0_36, %c0_37] : memref<128x128xf32, #tpu.memory_space<vmem>>, vector<128x128xf32>
    tpu.vector_store %arg36[%c0_36, %c0_37], %53 {strides = array<i32>} : memref<128x128xf32, #tpu.memory_space<vmem>>, vector<128x128xf32>,
    %c0_38 = arith.constant 0 : index
    %c0_39 = arith.constant 0 : index
    %55 = vector.load %arg16[%c0_38, %c0_39] : memref<128x128xbf16, #tpu.memory_space<vmem>>, vector<128x128xbf16>
    %c0_40 = arith.constant 0 : index
    %c0_41 = arith.constant 0 : index
    %56 = vector.load %arg17[%c0_40, %c0_41] : memref<1x128xf32, #tpu.memory_space<vmem>>, vector<1x128xf32>
    %57 = arith.truncf %26 : vector<128x128xf32> to vector<128x128xbf16>
    %cst_42 = arith.constant dense<0.000000e+00> : vector<128x128xf32>
    %58 = tpu.matmul %57, %55, %cst_42 {dimension_numbers = #tpu.dot_dimension_numbers<[1], [0], [0], [1], [0, 0, 1, 1], [], []>} : vector<128x128xbf16>, vector<128x128xbf16>, vector<128x128xf32> -> vector<128x128xf32>
    %59 = vector.broadcast %56 : vector<1x128xf32> to vector<128x128xf32>
    %60 = arith.addf %58, %59 : vector<128x128xf32>
    %cst_43 = arith.constant 0.000000e+00 : f32
    %61 = vector.broadcast %cst_43 : f32 to vector<128x128xf32>
    %62 = arith.maximumf %60, %61 : vector<128x128xf32>
    %c0_44 = arith.constant 0 : index
    %c0_45 = arith.constant 0 : index
    %63 = vector.load %arg18[%c0_44, %c0_45] : memref<128x128xbf16, #tpu.memory_space<vmem>>, vector<128x128xbf16>
    %c0_46 = arith.constant 0 : index
    %c0_47 = arith.constant 0 : index
    %64 = vector.load %arg19[%c0_46, %c0_47] : memref<1x128xf32, #tpu.memory_space<vmem>>, vector<1x128xf32>
    %65 = arith.truncf %62 : vector<128x128xf32> to vector<128x128xbf16>
    %cst_48 = arith.constant dense<0.000000e+00> : vector<128x128xf32>
    %66 = tpu.matmul %65, %63, %cst_48 {dimension_numbers = #tpu.dot_dimension_numbers<[1], [0], [0], [1], [0, 0, 1, 1], [], []>} : vector<128x128xbf16>, vector<128x128xbf16>, vector<128x128xf32> -> vector<128x128xf32>
    %67 = vector.broadcast %64 : vector<1x128xf32> to vector<128x128xf32>
    %68 = arith.addf %66, %67 : vector<128x128xf32>
    %cst_49 = arith.constant 0.000000e+00 : f32
    %69 = vector.broadcast %cst_49 : f32 to vector<128x128xf32>
    %70 = arith.maximumf %68, %69 : vector<128x128xf32>
    %c0_50 = arith.constant 0 : index
    %c0_51 = arith.constant 0 : index
    %71 = vector.load %arg20[%c0_50, %c0_51] : memref<128x128xbf16, #tpu.memory_space<vmem>>, vector<128x128xbf16>
    %c0_52 = arith.constant 0 : index
    %c0_53 = arith.constant 0 : index
    %72 = vector.load %arg21[%c0_52, %c0_53] : memref<1x128xf32, #tpu.memory_space<vmem>>, vector<1x128xf32>
    %73 = arith.truncf %70 : vector<128x128xf32> to vector<128x128xbf16>
    %cst_54 = arith.constant dense<0.000000e+00> : vector<128x128xf32>
    %74 = tpu.matmul %73, %71, %cst_54 {dimension_numbers = #tpu.dot_dimension_numbers<[1], [0], [0], [1], [0, 0, 1, 1], [], []>} : vector<128x128xbf16>, vector<128x128xbf16>, vector<128x128xf32> -> vector<128x128xf32>
    %75 = vector.broadcast %72 : vector<1x128xf32> to vector<128x128xf32>
    %76 = arith.addf %74, %75 : vector<128x128xf32>
    %77 = arith.negf %76 : vector<128x128xf32>
    %78 = math.exp %77 : vector<128x128xf32>
    %cst_55 = arith.constant 1.000000e+00 : f32
    %79 = vector.broadcast %cst_55 : f32 to vector<128x128xf32>
    %80 = arith.addf %79, %78 : vector<128x128xf32>
    %81 = arith.divf %79, %80 : vector<128x128xf32>
    %c0_56 = arith.constant 0 : index
    %c0_57 = arith.constant 0 : index
    %82 = vector.load %arg38[%c0_56, %c0_57] : memref<128x128xf32, #tpu.memory_space<vmem>>, vector<128x128xf32>
    tpu.vector_store %arg38[%c0_56, %c0_57], %81 {strides = array<i32>} : memref<128x128xf32, #tpu.memory_space<vmem>>, vector<128x128xf32>,
    %83 = tpu.iota {dimensions = array<i32: 1>} : vector<128x128xi32>
    %c0_58 = arith.constant 0 : index
    %c0_59 = arith.constant 0 : index
    %84 = vector.load %arg2[%c0_58, %c0_59] : memref<128x1xi32, #tpu.memory_space<vmem>>, vector<128x1xi32>
    %85 = vector.broadcast %84 : vector<128x1xi32> to vector<128x128xi32>
    %86 = arith.cmpi eq, %83, %85 : vector<128x128xi32>
    %87 = arith.extui %86 : vector<128x128xi1> to vector<128x128xi32>
    %88 = arith.sitofp %87 : vector<128x128xi32> to vector<128x128xf32>
    %89 = arith.truncf %88 : vector<128x128xf32> to vector<128x128xbf16>
    %c0_60 = arith.constant 0 : index
    %c0_61 = arith.constant 0 : index
    %90 = vector.load %arg3[%c0_60, %c0_61] : memref<128x128xbf16, #tpu.memory_space<vmem>>, vector<128x128xbf16>
    %cst_62 = arith.constant dense<0.000000e+00> : vector<128x128xf32>
    %91 = tpu.matmul %89, %90, %cst_62 {dimension_numbers = #tpu.dot_dimension_numbers<[1], [0], [0], [1], [0, 0, 1, 1], [], []>} : vector<128x128xbf16>, vector<128x128xbf16>, vector<128x128xf32> -> vector<128x128xf32>
    %c0_63 = arith.constant 0 : index
    %c0_64 = arith.constant 0 : index
    %92 = vector.load %arg22[%c0_63, %c0_64] : memref<128x128xbf16, #tpu.memory_space<vmem>>, vector<128x128xbf16>
    %c0_65 = arith.constant 0 : index
    %c0_66 = arith.constant 0 : index
    %93 = vector.load %arg23[%c0_65, %c0_66] : memref<1x128xf32, #tpu.memory_space<vmem>>, vector<1x128xf32>
    %94 = arith.truncf %91 : vector<128x128xf32> to vector<128x128xbf16>
    %cst_67 = arith.constant dense<0.000000e+00> : vector<128x128xf32>
    %95 = tpu.matmul %94, %92, %cst_67 {dimension_numbers = #tpu.dot_dimension_numbers<[1], [0], [0], [1], [0, 0, 1, 1], [], []>} : vector<128x128xbf16>, vector<128x128xbf16>, vector<128x128xf32> -> vector<128x128xf32>
    %96 = vector.broadcast %93 : vector<1x128xf32> to vector<128x128xf32>
    %97 = arith.addf %95, %96 : vector<128x128xf32>
    %cst_68 = arith.constant 0.000000e+00 : f32
    %98 = vector.broadcast %cst_68 : f32 to vector<128x128xf32>
    %99 = arith.maximumf %97, %98 : vector<128x128xf32>
    %100 = arith.addf %16, %99 : vector<128x128xf32>
    %c0_69 = arith.constant 0 : index
    %c0_70 = arith.constant 0 : index
    %101 = vector.load %arg24[%c0_69, %c0_70] : memref<128x128xbf16, #tpu.memory_space<vmem>>, vector<128x128xbf16>
    %c0_71 = arith.constant 0 : index
    %c0_72 = arith.constant 0 : index
    %102 = vector.load %arg25[%c0_71, %c0_72] : memref<1x128xf32, #tpu.memory_space<vmem>>, vector<1x128xf32>
    %103 = arith.truncf %100 : vector<128x128xf32> to vector<128x128xbf16>
    %cst_73 = arith.constant dense<0.000000e+00> : vector<128x128xf32>
    %104 = tpu.matmul %103, %101, %cst_73 {dimension_numbers = #tpu.dot_dimension_numbers<[1], [0], [0], [1], [0, 0, 1, 1], [], []>} : vector<128x128xbf16>, vector<128x128xbf16>, vector<128x128xf32> -> vector<128x128xf32>
    %105 = vector.broadcast %102 : vector<1x128xf32> to vector<128x128xf32>
    %106 = arith.addf %104, %105 : vector<128x128xf32>
    %cst_74 = arith.constant 0.000000e+00 : f32
    %107 = vector.broadcast %cst_74 : f32 to vector<128x128xf32>
    %108 = arith.maximumf %106, %107 : vector<128x128xf32>
    %c0_75 = arith.constant 0 : index
    %c0_76 = arith.constant 0 : index
    %109 = vector.load %arg26[%c0_75, %c0_76] : memref<128x128xbf16, #tpu.memory_space<vmem>>, vector<128x128xbf16>
    %c0_77 = arith.constant 0 : index
    %c0_78 = arith.constant 0 : index
    %110 = vector.load %arg27[%c0_77, %c0_78] : memref<1x128xf32, #tpu.memory_space<vmem>>, vector<1x128xf32>
    %111 = arith.truncf %108 : vector<128x128xf32> to vector<128x128xbf16>
    %cst_79 = arith.constant dense<0.000000e+00> : vector<128x128xf32>
    %112 = tpu.matmul %111, %109, %cst_79 {dimension_numbers = #tpu.dot_dimension_numbers<[1], [0], [0], [1], [0, 0, 1, 1], [], []>} : vector<128x128xbf16>, vector<128x128xbf16>, vector<128x128xf32> -> vector<128x128xf32>
    %113 = vector.broadcast %110 : vector<1x128xf32> to vector<128x128xf32>
    %114 = arith.addf %112, %113 : vector<128x128xf32>
    %cst_80 = arith.constant 0.000000e+00 : f32
    %115 = vector.broadcast %cst_80 : f32 to vector<128x128xf32>
    %116 = arith.maximumf %114, %115 : vector<128x128xf32>
    %c0_81 = arith.constant 0 : index
    %c0_82 = arith.constant 0 : index
    %117 = vector.load %arg28[%c0_81, %c0_82] : memref<128x128xbf16, #tpu.memory_space<vmem>>, vector<128x128xbf16>
    %c0_83 = arith.constant 0 : index
    %c0_84 = arith.constant 0 : index
    %118 = vector.load %arg29[%c0_83, %c0_84] : memref<1x128xf32, #tpu.memory_space<vmem>>, vector<1x128xf32>
    %119 = arith.truncf %116 : vector<128x128xf32> to vector<128x128xbf16>
    %cst_85 = arith.constant dense<0.000000e+00> : vector<128x128xf32>
    %120 = tpu.matmul %119, %117, %cst_85 {dimension_numbers = #tpu.dot_dimension_numbers<[1], [0], [0], [1], [0, 0, 1, 1], [], []>} : vector<128x128xbf16>, vector<128x128xbf16>, vector<128x128xf32> -> vector<128x128xf32>
    %121 = vector.broadcast %118 : vector<1x128xf32> to vector<128x128xf32>
    %122 = arith.addf %120, %121 : vector<128x128xf32>
    %cst_86 = arith.constant 0.000000e+00 : f32
    %123 = vector.broadcast %cst_86 : f32 to vector<128x128xf32>
    %124 = arith.maximumf %122, %123 : vector<128x128xf32>
    %c0_87 = arith.constant 0 : index
    %c0_88 = arith.constant 0 : index
    %125 = vector.load %arg30[%c0_87, %c0_88] : memref<128x256xbf16, #tpu.memory_space<vmem>>, vector<128x256xbf16>
    %c0_89 = arith.constant 0 : index
    %c0_90 = arith.constant 0 : index
    %126 = vector.load %arg31[%c0_89, %c0_90] : memref<1x256xf32, #tpu.memory_space<vmem>>, vector<1x256xf32>
    %127 = arith.truncf %124 : vector<128x128xf32> to vector<128x128xbf16>
    %cst_91 = arith.constant dense<0.000000e+00> : vector<128x256xf32>
    %128 = tpu.matmul %127, %125, %cst_91 {dimension_numbers = #tpu.dot_dimension_numbers<[1], [0], [0], [1], [0, 0, 1, 1], [], []>} : vector<128x128xbf16>, vector<128x256xbf16>, vector<128x256xf32> -> vector<128x256xf32>
    %129 = vector.broadcast %126 : vector<1x256xf32> to vector<128x256xf32>
    %130 = arith.addf %128, %129 : vector<128x256xf32>
    %cst_92 = arith.constant 0.000000e+00 : f32
    %131 = vector.broadcast %cst_92 : f32 to vector<128x256xf32>
    %132 = arith.maximumf %130, %131 : vector<128x256xf32>
    %c0_93 = arith.constant 0 : index
    %c0_94 = arith.constant 0 : index
    %133 = vector.load %arg32[%c0_93, %c0_94] : memref<256x256xbf16, #tpu.memory_space<vmem>>, vector<256x256xbf16>
    %c0_95 = arith.constant 0 : index
    %c0_96 = arith.constant 0 : index
    %134 = vector.load %arg33[%c0_95, %c0_96] : memref<1x256xf32, #tpu.memory_space<vmem>>, vector<1x256xf32>
    %135 = arith.truncf %132 : vector<128x256xf32> to vector<128x256xbf16>
    %cst_97 = arith.constant dense<0.000000e+00> : vector<128x256xf32>
    %136 = tpu.matmul %135, %133, %cst_97 {dimension_numbers = #tpu.dot_dimension_numbers<[1], [0], [0], [1], [0, 0, 1, 1], [], []>} : vector<128x256xbf16>, vector<256x256xbf16>, vector<128x256xf32> -> vector<128x256xf32>
    %137 = vector.broadcast %134 : vector<1x256xf32> to vector<128x256xf32>
    %138 = arith.addf %136, %137 : vector<128x256xf32>
    %cst_98 = arith.constant 0.000000e+00 : f32
    %139 = vector.broadcast %cst_98 : f32 to vector<128x256xf32>
    %140 = arith.maximumf %138, %139 : vector<128x256xf32>
    %c0_99 = arith.constant 0 : index
    %c0_100 = arith.constant 0 : index
    %141 = vector.load %arg34[%c0_99, %c0_100] : memref<256x128xbf16, #tpu.memory_space<vmem>>, vector<256x128xbf16>
    %c0_101 = arith.constant 0 : index
    %c0_102 = arith.constant 0 : index
    %142 = vector.load %arg35[%c0_101, %c0_102] : memref<1x128xf32, #tpu.memory_space<vmem>>, vector<1x128xf32>
    %143 = arith.truncf %140 : vector<128x256xf32> to vector<128x256xbf16>
    %cst_103 = arith.constant dense<0.000000e+00> : vector<128x128xf32>
    %144 = tpu.matmul %143, %141, %cst_103 {dimension_numbers = #tpu.dot_dimension_numbers<[1], [0], [0], [1], [0, 0, 1, 1], [], []>} : vector<128x256xbf16>, vector<256x128xbf16>, vector<128x128xf32> -> vector<128x128xf32>
    %145 = vector.broadcast %142 : vector<1x128xf32> to vector<128x128xf32>
    %146 = arith.addf %144, %145 : vector<128x128xf32>
    %147 = arith.negf %146 : vector<128x128xf32>
    %148 = math.exp %147 : vector<128x128xf32>
    %cst_104 = arith.constant 1.000000e+00 : f32
    %149 = vector.broadcast %cst_104 : f32 to vector<128x128xf32>
    %150 = arith.addf %149, %148 : vector<128x128xf32>
    %151 = arith.divf %149, %150 : vector<128x128xf32>
    %c0_105 = arith.constant 0 : index
    %c0_106 = arith.constant 0 : index
    %152 = vector.load %arg37[%c0_105, %c0_106] : memref<128x128xf32, #tpu.memory_space<vmem>>, vector<128x128xf32>
    tpu.vector_store %arg37[%c0_105, %c0_106], %151 {strides = array<i32>} : memref<128x128xf32, #tpu.memory_space<vmem>>, vector<128x128xf32>,
    return
  }
  func.func @transform_0(%arg0: i32) -> (i32, i32) {
    %c0_i32 = arith.constant 0 : i32
    %c0_i32_0 = arith.constant 0 : i32
    return %arg0, %c0_i32 : i32, i32
  }
  func.func @transform_1(%arg0: i32) -> (i32, i32) {
    %c0_i32 = arith.constant 0 : i32
    %c0_i32_0 = arith.constant 0 : i32
    return %arg0, %c0_i32 : i32, i32
  }
  func.func @transform_2(%arg0: i32) -> (i32, i32) {
    %c0_i32 = arith.constant 0 : i32
    %c0_i32_0 = arith.constant 0 : i32
    %c0_i32_1 = arith.constant 0 : i32
    return %c0_i32, %c0_i32_0 : i32, i32
  }
  func.func @transform_3(%arg0: i32) -> (i32, i32) {
    %c0_i32 = arith.constant 0 : i32
    %c0_i32_0 = arith.constant 0 : i32
    %c0_i32_1 = arith.constant 0 : i32
    return %c0_i32, %c0_i32_0 : i32, i32
  }
  func.func @transform_4(%arg0: i32) -> (i32, i32) {
    %c0_i32 = arith.constant 0 : i32
    %c0_i32_0 = arith.constant 0 : i32
    %c0_i32_1 = arith.constant 0 : i32
    return %c0_i32, %c0_i32_0 : i32, i32
  }
  func.func @transform_5(%arg0: i32) -> (i32, i32) {
    %c0_i32 = arith.constant 0 : i32
    %c0_i32_0 = arith.constant 0 : i32
    %c0_i32_1 = arith.constant 0 : i32
    return %c0_i32, %c0_i32_0 : i32, i32
  }
  func.func @transform_6(%arg0: i32) -> (i32, i32) {
    %c0_i32 = arith.constant 0 : i32
    %c0_i32_0 = arith.constant 0 : i32
    %c0_i32_1 = arith.constant 0 : i32
    return %c0_i32, %c0_i32_0 : i32, i32
  }
  func.func @transform_7(%arg0: i32) -> (i32, i32) {
    %c0_i32 = arith.constant 0 : i32
    %c0_i32_0 = arith.constant 0 : i32
    %c0_i32_1 = arith.constant 0 : i32
    return %c0_i32, %c0_i32_0 : i32, i32
  }
  func.func @transform_8(%arg0: i32) -> (i32, i32) {
    %c0_i32 = arith.constant 0 : i32
    %c0_i32_0 = arith.constant 0 : i32
    %c0_i32_1 = arith.constant 0 : i32
    return %c0_i32, %c0_i32_0 : i32, i32
  }
  func.func @transform_9(%arg0: i32) -> (i32, i32) {
    %c0_i32 = arith.constant 0 : i32
    %c0_i32_0 = arith.constant 0 : i32
    %c0_i32_1 = arith.constant 0 : i32
    return %c0_i32, %c0_i32_0 : i32, i32
  }
  func.func @transform_10(%arg0: i32) -> (i32, i32) {
    %c0_i32 = arith.constant 0 : i32
    %c0_i32_0 = arith.constant 0 : i32
    %c0_i32_1 = arith.constant 0 : i32
    return %c0_i32, %c0_i32_0 : i32, i32
  }
  func.func @transform_11(%arg0: i32) -> (i32, i32) {
    %c0_i32 = arith.constant 0 : i32
    %c0_i32_0 = arith.constant 0 : i32
    %c0_i32_1 = arith.constant 0 : i32
    return %c0_i32, %c0_i32_0 : i32, i32
  }
  func.func @transform_12(%arg0: i32) -> (i32, i32) {
    %c0_i32 = arith.constant 0 : i32
    %c0_i32_0 = arith.constant 0 : i32
    %c0_i32_1 = arith.constant 0 : i32
    return %c0_i32, %c0_i32_0 : i32, i32
  }
  func.func @transform_13(%arg0: i32) -> (i32, i32) {
    %c0_i32 = arith.constant 0 : i32
    %c0_i32_0 = arith.constant 0 : i32
    %c0_i32_1 = arith.constant 0 : i32
    return %c0_i32, %c0_i32_0 : i32, i32
  }
  func.func @transform_14(%arg0: i32) -> (i32, i32) {
    %c0_i32 = arith.constant 0 : i32
    %c0_i32_0 = arith.constant 0 : i32
    %c0_i32_1 = arith.constant 0 : i32
    return %c0_i32, %c0_i32_0 : i32, i32
  }
  func.func @transform_15(%arg0: i32) -> (i32, i32) {
    %c0_i32 = arith.constant 0 : i32
    %c0_i32_0 = arith.constant 0 : i32
    %c0_i32_1 = arith.constant 0 : i32
    return %c0_i32, %c0_i32_0 : i32, i32
  }
  func.func @transform_16(%arg0: i32) -> (i32, i32) {
    %c0_i32 = arith.constant 0 : i32
    %c0_i32_0 = arith.constant 0 : i32
    %c0_i32_1 = arith.constant 0 : i32
    return %c0_i32, %c0_i32_0 : i32, i32
  }
  func.func @transform_17(%arg0: i32) -> (i32, i32) {
    %c0_i32 = arith.constant 0 : i32
    %c0_i32_0 = arith.constant 0 : i32
    %c0_i32_1 = arith.constant 0 : i32
    return %c0_i32, %c0_i32_0 : i32, i32
  }
  func.func @transform_18(%arg0: i32) -> (i32, i32) {
    %c0_i32 = arith.constant 0 : i32
    %c0_i32_0 = arith.constant 0 : i32
    %c0_i32_1 = arith.constant 0 : i32
    return %c0_i32, %c0_i32_0 : i32, i32
  }
  func.func @transform_19(%arg0: i32) -> (i32, i32) {
    %c0_i32 = arith.constant 0 : i32
    %c0_i32_0 = arith.constant 0 : i32
    %c0_i32_1 = arith.constant 0 : i32
    return %c0_i32, %c0_i32_0 : i32, i32
  }
  func.func @transform_20(%arg0: i32) -> (i32, i32) {
    %c0_i32 = arith.constant 0 : i32
    %c0_i32_0 = arith.constant 0 : i32
    %c0_i32_1 = arith.constant 0 : i32
    return %c0_i32, %c0_i32_0 : i32, i32
  }
  func.func @transform_21(%arg0: i32) -> (i32, i32) {
    %c0_i32 = arith.constant 0 : i32
    %c0_i32_0 = arith.constant 0 : i32
    %c0_i32_1 = arith.constant 0 : i32
    return %c0_i32, %c0_i32_0 : i32, i32
  }
  func.func @transform_22(%arg0: i32) -> (i32, i32) {
    %c0_i32 = arith.constant 0 : i32
    %c0_i32_0 = arith.constant 0 : i32
    %c0_i32_1 = arith.constant 0 : i32
    return %c0_i32, %c0_i32_0 : i32, i32
  }
  func.func @transform_23(%arg0: i32) -> (i32, i32) {
    %c0_i32 = arith.constant 0 : i32
    %c0_i32_0 = arith.constant 0 : i32
    %c0_i32_1 = arith.constant 0 : i32
    return %c0_i32, %c0_i32_0 : i32, i32
  }
  func.func @transform_24(%arg0: i32) -> (i32, i32) {
    %c0_i32 = arith.constant 0 : i32
    %c0_i32_0 = arith.constant 0 : i32
    %c0_i32_1 = arith.constant 0 : i32
    return %c0_i32, %c0_i32_0 : i32, i32
  }
  func.func @transform_25(%arg0: i32) -> (i32, i32) {
    %c0_i32 = arith.constant 0 : i32
    %c0_i32_0 = arith.constant 0 : i32
    %c0_i32_1 = arith.constant 0 : i32
    return %c0_i32, %c0_i32_0 : i32, i32
  }
  func.func @transform_26(%arg0: i32) -> (i32, i32) {
    %c0_i32 = arith.constant 0 : i32
    %c0_i32_0 = arith.constant 0 : i32
    %c0_i32_1 = arith.constant 0 : i32
    return %c0_i32, %c0_i32_0 : i32, i32
  }
  func.func @transform_27(%arg0: i32) -> (i32, i32) {
    %c0_i32 = arith.constant 0 : i32
    %c0_i32_0 = arith.constant 0 : i32
    %c0_i32_1 = arith.constant 0 : i32
    return %c0_i32, %c0_i32_0 : i32, i32
  }
  func.func @transform_28(%arg0: i32) -> (i32, i32) {
    %c0_i32 = arith.constant 0 : i32
    %c0_i32_0 = arith.constant 0 : i32
    %c0_i32_1 = arith.constant 0 : i32
    return %c0_i32, %c0_i32_0 : i32, i32
  }
  func.func @transform_29(%arg0: i32) -> (i32, i32) {
    %c0_i32 = arith.constant 0 : i32
    %c0_i32_0 = arith.constant 0 : i32
    %c0_i32_1 = arith.constant 0 : i32
    return %c0_i32, %c0_i32_0 : i32, i32
  }
  func.func @transform_30(%arg0: i32) -> (i32, i32) {
    %c0_i32 = arith.constant 0 : i32
    %c0_i32_0 = arith.constant 0 : i32
    %c0_i32_1 = arith.constant 0 : i32
    return %c0_i32, %c0_i32_0 : i32, i32
  }
  func.func @transform_31(%arg0: i32) -> (i32, i32) {
    %c0_i32 = arith.constant 0 : i32
    %c0_i32_0 = arith.constant 0 : i32
    %c0_i32_1 = arith.constant 0 : i32
    return %c0_i32, %c0_i32_0 : i32, i32
  }
  func.func @transform_32(%arg0: i32) -> (i32, i32) {
    %c0_i32 = arith.constant 0 : i32
    %c0_i32_0 = arith.constant 0 : i32
    %c0_i32_1 = arith.constant 0 : i32
    return %c0_i32, %c0_i32_0 : i32, i32
  }
  func.func @transform_33(%arg0: i32) -> (i32, i32) {
    %c0_i32 = arith.constant 0 : i32
    %c0_i32_0 = arith.constant 0 : i32
    %c0_i32_1 = arith.constant 0 : i32
    return %c0_i32, %c0_i32_0 : i32, i32
  }
  func.func @transform_34(%arg0: i32) -> (i32, i32) {
    %c0_i32 = arith.constant 0 : i32
    %c0_i32_0 = arith.constant 0 : i32
    %c0_i32_1 = arith.constant 0 : i32
    return %c0_i32, %c0_i32_0 : i32, i32
  }
  func.func @transform_35(%arg0: i32) -> (i32, i32) {
    %c0_i32 = arith.constant 0 : i32
    %c0_i32_0 = arith.constant 0 : i32
    return %arg0, %c0_i32 : i32, i32
  }
  func.func @transform_36(%arg0: i32) -> (i32, i32) {
    %c0_i32 = arith.constant 0 : i32
    %c0_i32_0 = arith.constant 0 : i32
    return %arg0, %c0_i32 : i32, i32
  }
  func.func @transform_37(%arg0: i32) -> (i32, i32) {
    %c0_i32 = arith.constant 0 : i32
    %c0_i32_0 = arith.constant 0 : i32
    return %arg0, %c0_i32 : i32, i32
  }
}

</mosaic_0001>

<bundles_post_ra>
// kernel: tpu_custom_call.1
= control target key start
LH: loop header
LB: loop body
LE: loop exit
PB: predicated region body
PF: predicated region fallthrough
CT: control target
= control target key end

     0   :  { %s6450_s6 = smov 1   ;;  %s6451_s10 = smov 2   ;;  %s7863_s0 = inlined_call_operand.smem [shape: u32[38], index: -1, kind: input, shape index: {}] }
   0x1   :  { %s6523_s5 = sld [smem:[%s7863_s0]]   ;;  %s6452_s14 = smov 3  }
   0x2   :  { %s6528_s9 = sld [smem:[%s7863_s0 + %s6450_s6]]   ;;  %s6453_s18 = smov 4  }
   0x3   :  { %s6533_s13 = sld [smem:[%s7863_s0 + %s6451_s10]]   ;;  %s6454_s22 = smov 5  }
   0x4   :  { %s6538_s17 = sld [smem:[%s7863_s0 + %s6452_s14]]   ;;  %s6455_s26 = smov 6  }
   0x5   :  { %s6543_s21 = sld [smem:[%s7863_s0 + %s6453_s18]]   ;;  %s6456_s30 = smov 7  }
   0x6   :  { %s6548_s25 = sld [smem:[%s7863_s0 + %s6454_s22]]   ;;  %s6457_s4 = smov 8  }
   0x7   :  { %7883 = sst [smem:[#allocation48_spill]] %s6523_s5  ;;  %s6458_s10 = smov 9  }
   0x8   :  { %7884 = sst [smem:[#allocation49_spill]] %s6528_s9  ;;  %s6459_s15 = smov 10  }
   0x9   :  { %s6553_s29 = sld [smem:[%s7863_s0 + %s6455_s26]]   ;;  %s6460_s20 = smov 11  }
   0xa   :  { %s6558_s3 = sld [smem:[%s7863_s0 + %s6456_s30]]   ;;  %s6461_s26 = smov 12  }
   0xb   :  { %s6563_s8 = sld [smem:[%s7863_s0 + %s6457_s4]]   ;;  %s6462_s1 = smov 13  }
   0xc   :  { %s6568_s14 = sld [smem:[%s7863_s0 + %s6458_s10]]   ;;  %s6463_s7 = smov 14  }
   0xd   :  { %s6573_s19 = sld [smem:[%s7863_s0 + %s6459_s15]]   ;;  %s6464_s15 = smov 15  }
   0xe   :  { %s6578_s24 = sld [smem:[%s7863_s0 + %s6460_s20]]   ;;  %s6465_s22 = smov 16  }
   0xf   :  { %s6583_s30 = sld [smem:[%s7863_s0 + %s6461_s26]]   ;;  %s6466_s28 = smov 17  }
  0x10   :  { %s6588_s6 = sld [smem:[%s7863_s0 + %s6462_s1]]  }
  0x11   :  { %7885 = sst [smem:[#allocation50_spill]] %s6563_s8 }
  0x12   :  { %s6593_s12 = sld [smem:[%s7863_s0 + %s6463_s7]]   ;;  %s6467_s7 = smov 18  }
  0x13   :  { %7886 = sst [smem:[#allocation51_spill]] %s6573_s19 }
  0x14   :  { %s6598_s20 = sld [smem:[%s7863_s0 + %s6464_s15]]   ;;  %s6468_s15 = smov 19  }
  0x15   :  { %7887 = sst [smem:[#allocation52_spill]] %s6583_s30 }
  0x16   :  { %s6603_s27 = sld [smem:[%s7863_s0 + %s6465_s22]]   ;;  %s6469_s22 = smov 20  }
  0x17   :  { %s6608_s4 = sld [smem:[%s7863_s0 + %s6466_s28]]   ;;  %s6470_s28 = smov 21  }
  0x18   :  { %7888 = sst [smem:[#allocation53_spill]] %s6593_s12 }
  0x19   :  { %s6613_s12 = sld [smem:[%s7863_s0 + %s6467_s7]]   ;;  %s6471_s7 = smov 22  }
  0x1a   :  { %s6618_s30 = sld [smem:[%s7863_s0 + %s6468_s15]]   ;;  %s6472_s15 = smov 23  }
  0x1b   :  { %s6623_s9 = sld [smem:[%s7863_s0 + %s6469_s22]]   ;;  %s6473_s22 = smov 24  }
  0x1c   :  { %7889 = sst [smem:[#allocation54_spill]] %s6603_s27 }
  0x1d   :  { %7890 = sst [smem:[#allocation55_spill]] %s6608_s4 }
  0x1e   :  { %s6628_s27 = sld [smem:[%s7863_s0 + %s6470_s28]]   ;;  %s6474_s28 = smov 25  }
  0x1f   :  { %7891 = sst [smem:[#allocation56_spill]] %s6613_s12 }
  0x20   :  { %s6633_s12 = sld [smem:[%s7863_s0 + %s6471_s7]]   ;;  %s6475_s7 = smov 26  }
  0x21   :  { %7892 = sst [smem:[#allocation57_spill]] %s6623_s9 }
  0x22   :  { %s6638_s19 = sld [smem:[%s7863_s0 + %s6472_s15]]   ;;  %s6476_s15 = smov 27  }
  0x23   :  { %s6643_s9 = sld [smem:[%s7863_s0 + %s6473_s22]]   ;;  %s6477_s22 = smov 28  }
  0x24   :  { %7893 = sst [smem:[#allocation58_spill]] %s6628_s27 }
  0x25   :  { %s6648_s8 = sld [smem:[%s7863_s0 + %s6474_s28]]   ;;  %s6478_s28 = smov 29  }
  0x26   :  { %7894 = sst [smem:[#allocation59_spill]] %s6633_s12 }
  0x27   :  { %s6653_s12 = sld [smem:[%s7863_s0 + %s6475_s7]]   ;;  %s6479_s7 = smov 30  }
  0x28   :  { %s6658_s5 = sld [smem:[%s7863_s0 + %s6476_s15]]   ;;  %s6480_s15 = smov 31  }
  0x29   :  { %7895 = sst [smem:[#allocation60_spill]] %s6643_s9 }
  0x2a   :  { %s6663_s9 = sld [smem:[%s7863_s0 + %s6477_s22]]   ;;  %s6481_s22 = smov 32  }
  0x2b   :  { %7896 = sst [smem:[#allocation61_spill]] %s6648_s8 }
  0x2c   :  { %s6668_s8 = sld [smem:[%s7863_s0 + %s6478_s28]]   ;;  %s6482_s28 = smov 33  }
  0x2d   :  { %7897 = sst [smem:[#allocation62_spill]] %s6653_s12 }
  0x2e   :  { %s6673_s12 = sld [smem:[%s7863_s0 + %s6479_s7]]   ;;  %s6483_s7 = smov 34  }
  0x2f   :  { %s6678_s27 = sld [smem:[%s7863_s0 + %s6480_s15]]   ;;  %s6484_s15 = smov 35  }
  0x30   :  { %7898 = sst [smem:[#allocation63_spill]] %s6663_s9 }
  0x31   :  { %s6683_s9 = sld [smem:[%s7863_s0 + %s6481_s22]]   ;;  %s6485_s22 = smov 36  }
  0x32   :  { %7899 = sst [smem:[#allocation64_spill]] %s6668_s8 }
  0x33   :  { %s6688_s8 = sld [smem:[%s7863_s0 + %s6482_s28]]   ;;  %s6486_s28 = smov 37  }
  0x34   :  { %7900 = sst [smem:[#allocation65_spill]] %s6673_s12 }
  0x35   :  { %s6693_s12 = sld [smem:[%s7863_s0 + %s6483_s7]]  }
  0x36   :  { %s6698_s4 = sld [smem:[%s7863_s0 + %s6484_s15]]  }
  0x37   :  { %7901 = sst [smem:[#allocation66_spill]] %s6683_s9 }
  0x38   :  { %s6703_s9 = sld [smem:[%s7863_s0 + %s6485_s22]]  }
  0x39   :  { %7902 = sst [smem:[#allocation67_spill]] %s6688_s8 }
  0x3a   :  { %s6708_s8 = sld [smem:[%s7863_s0 + %s6486_s28]]  }
  0x3b   :  { %81 = vsyncpa [#allocation3], 0 }
  0x3c   :  { %82 = vsyncpa [#allocation6], 0 }
  0x3d   :  { %83 = vsyncpa [#allocation9], 0 }
  0x3e   :  { %84 = vsyncpa [#allocation12], 0 }
  0x3f   :  { %85 = vsyncpa [#allocation15], 0 }
  0x40   :  { %86 = vsyncpa [#allocation18], 0 }
  0x41   :  { %87 = vsyncpa [#allocation21], 0 }
  0x42   :  { %88 = vsyncpa [#allocation24], 0 }
  0x43   :  { %89 = vsyncpa [#allocation27], 0 }
  0x44   :  { %90 = vsyncpa [#allocation30], 0 }
  0x45   :  { %91 = vsyncpa [#allocation4], 0 }
  0x46   :  { %92 = vsyncpa [#allocation34], 0  ;;  %s114_s7 = sshll.u32 %s6538_s17, 4  ;;  %s6487_s0 = smov [#allocation5]   ;;  %s115_s7 = int_to_ptr.hbm [resolvable:$true] %s114_s7 }
  0x47   :  { %s116_s10 = sshll.u32 %s6487_s0, 4  ;;  %s138_s11 = sshll.u32 %s6548_s25, 4  ;;  %s117_s10 = int_to_ptr.vmem [resolvable:$true] %s116_s10  ;;  %s139_s11 = int_to_ptr.hbm [resolvable:$true] %s138_s11 }
  0x48   :  { %s5898_s15 = sshra.s32 %s115_s7, 4  ;;  %s5902_s18 = scalar_lea.hbm %s6538_s17, 64  ;;  %s5899_s15 = int_to_ptr.hbm [resolvable:$true] %s5898_s15 }
  0x49   :  { %s5900_s16 = scalar_lea.hbm %s5899_s15, 64  ;;  %p5903_p1 = scmp.lt.s32.totalorder %s5899_s15, %s6538_s17 }
  0x4a   :  { %p5901_p0 = scmp.ne.s32.totalorder %s5899_s15, %s5900_s16  ;;  %p5904_p2 = scmp.lt.s32.totalorder %s5902_s18, %s5900_s16 }
  0x4c   :  { %p5905_p3 = por %p5904_p2, %p5903_p1 }
  0x4e   :  { %p5906_p4 = pnand %p5905_p3, %p5901_p0 }
  0x50   :  { %5909 = shalt.err (!%p5906_p4)
}
  0x51   :  { %s6488_s22 = smov 64   ;;  %s6489_s23 = smov 4  }
  0x52   :  { %122 = dma.hbm_to_vmem [thread:$0]  %s115_s7, 1024, %s117_s10, [#allocation6], %s6488_s22, %s6488_s22, %s6489_s23  }
  0x53   :  { %s6490_s26 = smov [#allocation8]   ;;  %s162_s1 = sshll.u32 %s6558_s3, 4  ;;  %s6718_s1 = int_to_ptr.hbm [resolvable:$true] %s162_s1 }
  0x54   :  { %s140_s28 = sshll.u32 %s6490_s26, 4  ;;  %s5922_s17 = sshra.s32 %s139_s11, 4  ;;  %s141_s28 = int_to_ptr.vmem [resolvable:$true] %s140_s28  ;;  %s5923_s17 = int_to_ptr.hbm [resolvable:$true] %s5922_s17 }
  0x55   :  { %s5924_s2 = scalar_lea.hbm %s5923_s17, 64  ;;  %s5926_s0 = scalar_lea.hbm %s6548_s25, 64 }
  0x56   :  { %p5925_p5 = scmp.ne.s32.totalorder %s5923_s17, %s5924_s2  ;;  %p5927_p6 = scmp.lt.s32.totalorder %s5923_s17, %s6548_s25 }
  0x57   :  { %p5928_p7 = scmp.lt.s32.totalorder %s5926_s0, %s5924_s2 }
  0x59   :  { %p5929_p8 = por %p5928_p7, %p5927_p6 }
  0x5b   :  { %p5930_p9 = pnand %p5929_p8, %p5925_p5 }
  0x5d   :  { %5933 = shalt.err (!%p5930_p9)
}
  0x5e   :  { %146 = dma.hbm_to_vmem [thread:$0]  %s139_s11, 1024, %s141_s28, [#allocation9], %s6488_s22, %s6488_s22, %s6489_s23  }
  0x5f   :  { %s6491_s7 = smov [#allocation11]   ;;  %s192_s15 = sshll.u32 %s6578_s24, 4  ;;  %s193_s15 = int_to_ptr.hbm [resolvable:$true] %s192_s15 }
  0x60   :  { %s164_s10 = sshll.u32 %s6491_s7, 4  ;;  %s5946_s16 = sshra.s32 %s6718_s1, 4  ;;  %s165_s10 = int_to_ptr.vmem [resolvable:$true] %s164_s10  ;;  %s5947_s16 = int_to_ptr.hbm [resolvable:$true] %s5946_s16 }
  0x61   :  { %s5948_s18 = scalar_lea.hbm %s5947_s16, 128  ;;  %s5950_s25 = scalar_lea.hbm %s6558_s3, 128 }
  0x62   :  { %p5949_p10 = scmp.ne.s32.totalorder %s5947_s16, %s5948_s18  ;;  %p5951_p11 = scmp.lt.s32.totalorder %s5947_s16, %s6558_s3 }
  0x63   :  { %p5952_p12 = scmp.lt.s32.totalorder %s5950_s25, %s5948_s18 }
  0x65   :  { %p5953_p13 = por %p5952_p12, %p5951_p11 }
  0x67   :  { %p5954_p0 = pnand %p5953_p13, %p5949_p10 }
  0x69   :  { %5957 = shalt.err (!%p5954_p0)
}
  0x6a   :  { %s6492_s26 = smov 128   ;;  %s6493_s11 = smov 8  }
  0x6b   :  { %170 = dma.hbm_to_vmem [thread:$0]  %s6718_s1, 2048, %s165_s10, [#allocation12], %s6492_s26, %s6492_s26, %s6493_s11  }
  0x6c   :  { %s6494_s28 = smov [#allocation14]   ;;  %s222_s2 = sshll.u32 %s6598_s20, 4  ;;  %s6734_s2 = int_to_ptr.hbm [resolvable:$true] %s222_s2 }
  0x6d   :  { %s194_s17 = sshll.u32 %s6494_s28, 4  ;;  %s5970_s3 = sshra.s32 %s193_s15, 4  ;;  %s195_s17 = int_to_ptr.vmem [resolvable:$true] %s194_s17  ;;  %s5971_s3 = int_to_ptr.hbm [resolvable:$true] %s5970_s3 }
  0x6e   :  { %s5972_s0 = scalar_lea.hbm %s5971_s3, 64  ;;  %s5974_s7 = scalar_lea.hbm %s6578_s24, 64 }
  0x6f   :  { %p5973_p1 = scmp.ne.s32.totalorder %s5971_s3, %s5972_s0  ;;  %p5975_p2 = scmp.lt.s32.totalorder %s5971_s3, %s6578_s24 }
  0x70   :  { %p5976_p3 = scmp.lt.s32.totalorder %s5974_s7, %s5972_s0 }
  0x72   :  { %p5977_p4 = por %p5976_p3, %p5975_p2 }
  0x74   :  { %p5978_p5 = pnand %p5977_p4, %p5973_p1 }
  0x76   :  { %5981 = shalt.err (!%p5978_p5)
}
  0x77   :  { %200 = dma.hbm_to_vmem [thread:$0]  %s193_s15, 1024, %s195_s17, [#allocation15], %s6488_s22, %s6488_s22, %s6489_s23  }
  0x78   :  { %s252_s1 = sshll.u32 %s6618_s30, 4  ;;  %s6495_s10 = smov [#allocation17]   ;;  %s6742_s1 = int_to_ptr.hbm [resolvable:$true] %s252_s1 }
  0x79   :  { %s224_s16 = sshll.u32 %s6495_s10, 4  ;;  %s5994_s18 = sshra.s32 %s6734_s2, 4  ;;  %s225_s16 = int_to_ptr.vmem [resolvable:$true] %s224_s16  ;;  %s5995_s18 = int_to_ptr.hbm [resolvable:$true] %s5994_s18 }
  0x7a   :  { %s5996_s24 = scalar_lea.hbm %s5995_s18, 64  ;;  %s5998_s25 = scalar_lea.hbm %s6598_s20, 64 }
  0x7b   :  { %p5997_p6 = scmp.ne.s32.totalorder %s5995_s18, %s5996_s24  ;;  %p5999_p7 = scmp.lt.s32.totalorder %s5995_s18, %s6598_s20 }
  0x7c   :  { %p6000_p8 = scmp.lt.s32.totalorder %s5998_s25, %s5996_s24 }
  0x7e   :  { %p6001_p9 = por %p6000_p8, %p5999_p7 }
  0x80   :  { %p6002_p10 = pnand %p6001_p9, %p5997_p6 }
  0x82   :  { %6005 = shalt.err (!%p6002_p10)
}
  0x83   :  { %230 = dma.hbm_to_vmem [thread:$0]  %s6734_s2, 1024, %s225_s16, [#allocation18], %s6488_s22, %s6488_s22, %s6489_s23  }
  0x84   :  { %s6496_s15 = smov [#allocation20]   ;;  %s282_s17 = sshll.u32 %s6638_s19, 4  ;;  %s6752_s17 = int_to_ptr.hbm [resolvable:$true] %s282_s17 }
  0x85   :  { %s254_s28 = sshll.u32 %s6496_s15, 4  ;;  %s6018_s20 = sshra.s32 %s6742_s1, 4  ;;  %s255_s28 = int_to_ptr.vmem [resolvable:$true] %s254_s28  ;;  %s6019_s20 = int_to_ptr.hbm [resolvable:$true] %s6018_s20 }
  0x86   :  { %s6020_s3 = scalar_lea.hbm %s6019_s20, 64  ;;  %s6022_s0 = scalar_lea.hbm %s6618_s30, 64 }
  0x87   :  { %p6021_p11 = scmp.ne.s32.totalorder %s6019_s20, %s6020_s3  ;;  %p6023_p12 = scmp.lt.s32.totalorder %s6019_s20, %s6618_s30 }
  0x88   :  { %p6024_p13 = scmp.lt.s32.totalorder %s6022_s0, %s6020_s3 }
  0x8a   :  { %p6025_p0 = por %p6024_p13, %p6023_p12 }
  0x8c   :  { %p6026_p1 = pnand %p6025_p0, %p6021_p11 }
  0x8e   :  { %6029 = shalt.err (!%p6026_p1)
}
  0x8f   :  { %260 = dma.hbm_to_vmem [thread:$0]  %s6742_s1, 1024, %s255_s28, [#allocation21], %s6488_s22, %s6488_s22, %s6489_s23  }
  0x90   :  { %s312_s2 = sshll.u32 %s6658_s5, 4  ;;  %s6497_s7 = smov [#allocation23]   ;;  %s6762_s2 = int_to_ptr.hbm [resolvable:$true] %s312_s2 }
  0x91   :  { %s284_s10 = sshll.u32 %s6497_s7, 4  ;;  %s6042_s30 = sshra.s32 %s6752_s17, 4  ;;  %s285_s10 = int_to_ptr.vmem [resolvable:$true] %s284_s10  ;;  %s6043_s30 = int_to_ptr.hbm [resolvable:$true] %s6042_s30 }
  0x92   :  { %s6044_s16 = scalar_lea.hbm %s6043_s30, 64  ;;  %s6046_s18 = scalar_lea.hbm %s6638_s19, 64 }
  0x93   :  { %p6045_p2 = scmp.ne.s32.totalorder %s6043_s30, %s6044_s16  ;;  %p6047_p3 = scmp.lt.s32.totalorder %s6043_s30, %s6638_s19 }
  0x94   :  { %p6048_p4 = scmp.lt.s32.totalorder %s6046_s18, %s6044_s16 }
  0x96   :  { %p6049_p5 = por %p6048_p4, %p6047_p3 }
  0x98   :  { %p6050_p6 = pnand %p6049_p5, %p6045_p2 }
  0x9a   :  { %6053 = shalt.err (!%p6050_p6)
}
  0x9b   :  { %290 = dma.hbm_to_vmem [thread:$0]  %s6752_s17, 1024, %s285_s10, [#allocation24], %s6488_s22, %s6488_s22, %s6489_s23  }
  0x9c   :  { %s6498_s1 = smov [#allocation26]   ;;  %s342_s25 = sshll.u32 %s6678_s27, 4  ;;  %s6772_s25 = int_to_ptr.hbm [resolvable:$true] %s342_s25 }
  0x9d   :  { %s314_s24 = sshll.u32 %s6498_s1, 4  ;;  %s6066_s19 = sshra.s32 %s6762_s2, 4  ;;  %s315_s24 = int_to_ptr.vmem [resolvable:$true] %s314_s24  ;;  %s6067_s19 = int_to_ptr.hbm [resolvable:$true] %s6066_s19 }
  0x9e   :  { %s6068_s15 = scalar_lea.hbm %s6067_s19, 64  ;;  %s6070_s28 = scalar_lea.hbm %s6658_s5, 64 }
  0x9f   :  { %p6069_p7 = scmp.ne.s32.totalorder %s6067_s19, %s6068_s15  ;;  %p6071_p8 = scmp.lt.s32.totalorder %s6067_s19, %s6658_s5 }
  0xa0   :  { %p6072_p9 = scmp.lt.s32.totalorder %s6070_s28, %s6068_s15 }
  0xa2   :  { %p6073_p10 = por %p6072_p9, %p6071_p8 }
  0xa4   :  { %p6074_p11 = pnand %p6073_p10, %p6069_p7 }
  0xa6   :  { %6077 = shalt.err (!%p6074_p11)
}
  0xa7   :  { %320 = dma.hbm_to_vmem [thread:$0]  %s6762_s2, 1024, %s315_s24, [#allocation27], %s6488_s22, %s6488_s22, %s6489_s23  }
  0xa8   :  { %s101_s17 = sshll.u32 %s6533_s13, 4  ;;  %s6499_s20 = smov [#allocation29]   ;;  %s6782_s17 = int_to_ptr.hbm [resolvable:$true] %s101_s17 }
  0xa9   :  { %s344_s3 = sshll.u32 %s6499_s20, 4  ;;  %s6090_s5 = sshra.s32 %s6772_s25, 4  ;;  %s345_s3 = int_to_ptr.vmem [resolvable:$true] %s344_s3  ;;  %s6091_s5 = int_to_ptr.hbm [resolvable:$true] %s6090_s5 }
  0xaa   :  { %s6092_s0 = scalar_lea.hbm %s6091_s5, 256  ;;  %s6094_s7 = scalar_lea.hbm %s6678_s27, 256 }
  0xab   :  { %p6093_p12 = scmp.ne.s32.totalorder %s6091_s5, %s6092_s0  ;;  %p6095_p13 = scmp.lt.s32.totalorder %s6091_s5, %s6678_s27 }
  0xac   :  { %p6096_p0 = scmp.lt.s32.totalorder %s6094_s7, %s6092_s0 }
  0xae   :  { %p6097_p1 = por %p6096_p0, %p6095_p13 }
  0xb0   :  { %p6098_p2 = pnand %p6097_p1, %p6093_p12 }
  0xb2   :  { %6101 = shalt.err (!%p6098_p2)
}
  0xb3   :  { %350 = dma.hbm_to_vmem [thread:$0]  %s6772_s25, 4096, %s345_s3, [#allocation30], %s6492_s26, %s6492_s26, %s6493_s11  }
  0xb4   :  { %s6500_s2 = smov [#allocation2]   ;;  %s128_s30 = sshll.u32 %s6543_s21, 4  ;;  %s129_s30 = int_to_ptr.hbm [resolvable:$true] %s128_s30 }
  0xb5   :  { %s103_s10 = sshll.u32 %s6500_s2, 4  ;;  %s6114_s16 = sshra.s32 %s6782_s17, 4  ;;  %s104_s10 = int_to_ptr.vmem [resolvable:$true] %s103_s10  ;;  %s6115_s16 = int_to_ptr.hbm [resolvable:$true] %s6114_s16 }
  0xb6   :  { %s6116_s27 = scalar_lea.hbm %s6115_s16, 64  ;;  %s6118_s18 = scalar_lea.hbm %s6533_s13, 64 }
  0xb7   :  { %p6117_p3 = scmp.ne.s32.totalorder %s6115_s16, %s6116_s27  ;;  %p6119_p4 = scmp.lt.s32.totalorder %s6115_s16, %s6533_s13 }
  0xb8   :  { %p6120_p5 = scmp.lt.s32.totalorder %s6118_s18, %s6116_s27 }
  0xba   :  { %p6121_p6 = por %p6120_p5, %p6119_p4 }
  0xbc   :  { %p6122_p7 = pnand %p6121_p6, %p6117_p3 }
  0xbe   :  { %6125 = shalt.err (!%p6122_p7)
}
  0xbf   :  { %109 = dma.hbm_to_vmem [thread:$0]  %s6782_s17, 1024, %s104_s10, [#allocation3], %s6488_s22, %s6488_s22, %s6489_s23  }
  0xc0   :  { %s152_s1 = sshll.u32 %s6553_s29, 4  ;;  %s6501_s24 = smov [#allocation7]   ;;  %s153_s1 = int_to_ptr.hbm [resolvable:$true] %s152_s1 }
  0xc1   :  { %s130_s25 = sshll.u32 %s6501_s24, 4  ;;  %s6138_s19 = sshra.s32 %s129_s30, 4  ;;  %s131_s25 = int_to_ptr.vmem [resolvable:$true] %s130_s25  ;;  %s6139_s19 = int_to_ptr.hbm [resolvable:$true] %s6138_s19 }
  0xc2   :  { %s6140_s13 = scalar_lea.hbm %s6139_s19, 1  ;;  %s6142_s15 = scalar_lea.hbm %s6543_s21, 1 }
  0xc3   :  { %p6141_p8 = scmp.ne.s32.totalorder %s6139_s19, %s6140_s13  ;;  %p6143_p9 = scmp.lt.s32.totalorder %s6139_s19, %s6543_s21 }
  0xc4   :  { %p6144_p10 = scmp.lt.s32.totalorder %s6142_s15, %s6140_s13 }
  0xc6   :  { %p6145_p11 = por %p6144_p10, %p6143_p9 }
  0xc8   :  { %p6146_p12 = pnand %p6145_p11, %p6141_p8 }
  0xca   :  { %6149 = shalt.err (!%p6146_p12)
}
  0xcb   :  { %133 = dma.hbm_to_vmem [thread:$0]  %s129_s30, 16, %s131_s25, [#allocation6]  }
  0xcc   :  { %s6502_s28 = smov [#allocation10]   ;;  %s177_s20 = sshll.u32 %s6568_s14, 4  ;;  %s6803_s20 = int_to_ptr.hbm [resolvable:$true] %s177_s20 }
  0xcd   :  { %s154_s17 = sshll.u32 %s6502_s28, 4  ;;  %s6162_s3 = sshra.s32 %s153_s1, 4  ;;  %s155_s17 = int_to_ptr.vmem [resolvable:$true] %s154_s17  ;;  %s6163_s3 = int_to_ptr.hbm [resolvable:$true] %s6162_s3 }
  0xce   :  { %s6164_s5 = scalar_lea.hbm %s6163_s3, 1  ;;  %s6166_s0 = scalar_lea.hbm %s6553_s29, 1 }
  0xcf   :  { %p6165_p13 = scmp.ne.s32.totalorder %s6163_s3, %s6164_s5  ;;  %p6167_p0 = scmp.lt.s32.totalorder %s6163_s3, %s6553_s29 }
  0xd0   :  { %p6168_p1 = scmp.lt.s32.totalorder %s6166_s0, %s6164_s5 }
  0xd2   :  { %p6169_p2 = por %p6168_p1, %p6167_p0 }
  0xd4   :  { %p6170_p3 = pnand %p6169_p2, %p6165_p13 }
  0xd6   :  { %6173 = shalt.err (!%p6170_p3)
}
  0xd7   :  { %157 = dma.hbm_to_vmem [thread:$0]  %s153_s1, 16, %s155_s17, [#allocation9]  }
  0xd8   :  { %s207_s21 = sshll.u32 %s6588_s6, 4  ;;  %s6503_s7 = smov [#allocation13]   ;;  %s6808_s21 = int_to_ptr.hbm [resolvable:$true] %s207_s21 }
  0xd9   :  { %s179_s2 = sshll.u32 %s6503_s7, 4  ;;  %s6186_s10 = sshra.s32 %s6803_s20, 4  ;;  %s180_s2 = int_to_ptr.vmem [resolvable:$true] %s179_s2  ;;  %s6187_s10 = int_to_ptr.hbm [resolvable:$true] %s6186_s10 }
  0xda   :  { %s6188_s30 = scalar_lea.hbm %s6187_s10, 64  ;;  %s6190_s29 = scalar_lea.hbm %s6568_s14, 64 }
  0xdb   :  { %p6189_p4 = scmp.ne.s32.totalorder %s6187_s10, %s6188_s30  ;;  %p6191_p5 = scmp.lt.s32.totalorder %s6187_s10, %s6568_s14 }
  0xdc   :  { %p6192_p6 = scmp.lt.s32.totalorder %s6190_s29, %s6188_s30 }
  0xde   :  { %p6193_p7 = por %p6192_p6, %p6191_p5 }
  0xe0   :  { %p6194_p8 = pnand %p6193_p7, %p6189_p4 }
  0xe2   :  { %6197 = shalt.err (!%p6194_p8)
}
  0xe3   :  { %s7903_s16 = sld [smem:[#allocation55_spill]]  ;;  %s6504_s27 = smov [#allocation16]  }
  0xe4   :  { %185 = dma.hbm_to_vmem [thread:$0]  %s6803_s20, 1024, %s180_s2, [#allocation12], %s6488_s22, %s6488_s22, %s6489_s23  }
  0xe5   :  { %s209_s18 = sshll.u32 %s6504_s27, 4  ;;  %s6210_s14 = sshra.s32 %s6808_s21, 4  ;;  %s210_s18 = int_to_ptr.vmem [resolvable:$true] %s209_s18  ;;  %s6211_s14 = int_to_ptr.hbm [resolvable:$true] %s6210_s14 }
  0xe6   :  { %s6212_s24 = scalar_lea.hbm %s6211_s14, 64  ;;  %s6214_s25 = scalar_lea.hbm %s6588_s6, 64 }
  0xe7   :  { %p6213_p9 = scmp.ne.s32.totalorder %s6211_s14, %s6212_s24  ;;  %p6215_p10 = scmp.lt.s32.totalorder %s6211_s14, %s6588_s6 }
  0xe8   :  { %p6216_p11 = scmp.lt.s32.totalorder %s6214_s25, %s6212_s24 }
  0xe9   :  { %s237_s1 = sshll.u32 %s7903_s16, 4  ;;  %s6818_s1 = int_to_ptr.hbm [resolvable:$true] %s237_s1 }
  0xea   :  { %p6217_p12 = por %p6216_p11, %p6215_p10 }
  0xec   :  { %p6218_p13 = pnand %p6217_p12, %p6213_p9 }
  0xee   :  { %6221 = shalt.err (!%p6218_p13)
}
  0xef   :  { %s7904_s19 = sld [smem:[#allocation58_spill]]  ;;  %s6505_s15 = smov [#allocation19]  }
  0xf0   :  { %215 = dma.hbm_to_vmem [thread:$0]  %s6808_s21, 1024, %s210_s18, [#allocation15], %s6488_s22, %s6488_s22, %s6489_s23  }
  0xf1   :  { %s239_s28 = sshll.u32 %s6505_s15, 4  ;;  %s6234_s6 = sshra.s32 %s6818_s1, 4  ;;  %s240_s28 = int_to_ptr.vmem [resolvable:$true] %s239_s28  ;;  %s6235_s6 = int_to_ptr.hbm [resolvable:$true] %s6234_s6 }
  0xf2   :  { %s6236_s17 = scalar_lea.hbm %s6235_s6, 64  ;;  %s6238_s20 = scalar_lea.hbm %s7903_s16, 64 }
  0xf3   :  { %p6237_p0 = scmp.ne.s32.totalorder %s6235_s6, %s6236_s17  ;;  %p6239_p1 = scmp.lt.s32.totalorder %s6235_s6, %s7903_s16 }
  0xf4   :  { %p6240_p2 = scmp.lt.s32.totalorder %s6238_s20, %s6236_s17 }
  0xf5   :  { %s267_s13 = sshll.u32 %s7904_s19, 4  ;;  %s6828_s13 = int_to_ptr.hbm [resolvable:$true] %s267_s13 }
  0xf6   :  { %p6241_p3 = por %p6240_p2, %p6239_p1 }
  0xf8   :  { %p6242_p4 = pnand %p6241_p3, %p6237_p0 }
  0xfa   :  { %6245 = shalt.err (!%p6242_p4)
}
  0xfb   :  { %s7905_s3 = sld [smem:[#allocation61_spill]]  ;;  %s6506_s5 = smov [#allocation22]  }
  0xfc   :  { %245 = dma.hbm_to_vmem [thread:$0]  %s6818_s1, 1024, %s240_s28, [#allocation18], %s6488_s22, %s6488_s22, %s6489_s23  }
  0xfd   :  { %s269_s0 = sshll.u32 %s6506_s5, 4  ;;  %s6258_s7 = sshra.s32 %s6828_s13, 4  ;;  %s270_s0 = int_to_ptr.vmem [resolvable:$true] %s269_s0  ;;  %s6259_s7 = int_to_ptr.hbm [resolvable:$true] %s6258_s7 }
  0xfe   :  { %s6260_s2 = scalar_lea.hbm %s6259_s7, 64  ;;  %s6262_s10 = scalar_lea.hbm %s7904_s19, 64 }
  0xff   :  { %p6261_p5 = scmp.ne.s32.totalorder %s6259_s7, %s6260_s2  ;;  %p6263_p6 = scmp.lt.s32.totalorder %s6259_s7, %s7904_s19 }
 0x100   :  { %p6264_p7 = scmp.lt.s32.totalorder %s6262_s10, %s6260_s2 }
 0x101   :  { %s297_s21 = sshll.u32 %s7905_s3, 4  ;;  %s6838_s21 = int_to_ptr.hbm [resolvable:$true] %s297_s21 }
 0x102   :  { %p6265_p8 = por %p6264_p7, %p6263_p6 }
 0x104   :  { %p6266_p9 = pnand %p6265_p8, %p6261_p5 }
 0x106   :  { %6269 = shalt.err (!%p6266_p9)
}
 0x107   :  { %s7906_s30 = sld [smem:[#allocation64_spill]]  ;;  %s6507_s16 = smov [#allocation25]  }
 0x108   :  { %275 = dma.hbm_to_vmem [thread:$0]  %s6828_s13, 1024, %s270_s0, [#allocation21], %s6488_s22, %s6488_s22, %s6489_s23  }
 0x109   :  { %s299_s27 = sshll.u32 %s6507_s16, 4  ;;  %s6282_s18 = sshra.s32 %s6838_s21, 4  ;;  %s300_s27 = int_to_ptr.vmem [resolvable:$true] %s299_s27  ;;  %s6283_s18 = int_to_ptr.hbm [resolvable:$true] %s6282_s18 }
 0x10a   :  { %s6284_s1 = scalar_lea.hbm %s6283_s18, 64  ;;  %s6286_s14 = scalar_lea.hbm %s7905_s3, 64 }
 0x10b   :  { %p6285_p10 = scmp.ne.s32.totalorder %s6283_s18, %s6284_s1  ;;  %p6287_p11 = scmp.lt.s32.totalorder %s6283_s18, %s7905_s3 }
 0x10c   :  { %p6288_p12 = scmp.lt.s32.totalorder %s6286_s14, %s6284_s1 }
 0x10d   :  { %s327_s29 = sshll.u32 %s7906_s30, 4  ;;  %s6848_s29 = int_to_ptr.hbm [resolvable:$true] %s327_s29 }
 0x10e   :  { %p6289_p13 = por %p6288_p12, %p6287_p11 }
 0x110   :  { %p6290_p0 = pnand %p6289_p13, %p6285_p10 }
 0x112   :  { %6293 = shalt.err (!%p6290_p0)
}
 0x113   :  { %s7907_s24 = sld [smem:[#allocation67_spill]]  ;;  %s6508_s25 = smov [#allocation28]  }
 0x114   :  { %305 = dma.hbm_to_vmem [thread:$0]  %s6838_s21, 1024, %s300_s27, [#allocation24], %s6488_s22, %s6488_s22, %s6489_s23  }
 0x115   :  { %s329_s19 = sshll.u32 %s6508_s25, 4  ;;  %s6306_s15 = sshra.s32 %s6848_s29, 4  ;;  %s330_s19 = int_to_ptr.vmem [resolvable:$true] %s329_s19  ;;  %s6307_s15 = int_to_ptr.hbm [resolvable:$true] %s6306_s15 }
 0x116   :  { %s6308_s28 = scalar_lea.hbm %s6307_s15, 128  ;;  %s6310_s6 = scalar_lea.hbm %s7906_s30, 128 }
 0x117   :  { %p6309_p1 = scmp.ne.s32.totalorder %s6307_s15, %s6308_s28  ;;  %p6311_p2 = scmp.lt.s32.totalorder %s6307_s15, %s7906_s30 }
 0x118   :  { %p6312_p3 = scmp.lt.s32.totalorder %s6310_s6, %s6308_s28 }
 0x119   :  { %s357_s13 = sshll.u32 %s7907_s24, 4  ;;  %s358_s13 = int_to_ptr.hbm [resolvable:$true] %s357_s13 }
 0x11a   :  { %p6313_p4 = por %p6312_p3, %p6311_p2 }
 0x11c   :  { %p6314_p5 = pnand %p6313_p4, %p6309_p1 }
 0x11e   :  { %6317 = shalt.err (!%p6314_p5)
}
 0x11f   :  { %335 = dma.hbm_to_vmem [thread:$0]  %s6848_s29, 2048, %s330_s19, [#allocation27], %s6492_s26, %s6492_s26, %s6493_s11  }
 0x120   :  { %s6509_s17 = smov [#allocation31]   ;;  %s6330_s3 = sshra.s32 %s358_s13, 4  ;;  %s6331_s3 = int_to_ptr.hbm [resolvable:$true] %s6330_s3 }
 0x121   :  { %s359_s20 = sshll.u32 %s6509_s17, 4  ;;  %s6332_s5 = scalar_lea.hbm %s6331_s3, 128  ;;  %s360_s20 = int_to_ptr.vmem [resolvable:$true] %s359_s20 }
 0x122   :  { %p6333_p6 = scmp.ne.s32.totalorder %s6331_s3, %s6332_s5  ;;  %s6334_s0 = scalar_lea.hbm %s7907_s24, 128 }
 0x123   :  { %p6335_p7 = scmp.lt.s32.totalorder %s6331_s3, %s7907_s24  ;;  %p6336_p8 = scmp.lt.s32.totalorder %s6334_s0, %s6332_s5 }
 0x125   :  { %p6337_p9 = por %p6336_p8, %p6335_p7 }
 0x127   :  { %p6338_p10 = pnand %p6337_p9, %p6333_p6 }
 0x129   :  { %6341 = shalt.err (!%p6338_p10)
}
 0x12a   :  { %365 = dma.hbm_to_vmem [thread:$0]  %s358_s13, 2048, %s360_s20, [#allocation30], %s6488_s22, %s6488_s22, %s6489_s23  }
 0x12b   :  { %6426 = dma.done.wait [#allocation3], 1024  }
 0x12c   :  { %6427 = vsyncadd [#allocation3], 4294966272 }
 0x12d   :  { %6428 = dma.done.wait [#allocation6], 1040  }
 0x12e   :  { %6429 = vsyncadd [#allocation6], 4294966256 }
 0x12f   :  { %6430 = dma.done.wait [#allocation9], 1040  }
 0x130   :  { %6431 = vsyncadd [#allocation9], 4294966256 }
 0x131   :  { %6432 = dma.done.wait [#allocation12], 3072  }
 0x132   :  { %6433 = vsyncadd [#allocation12], 4294964224 }
 0x133   :  { %6434 = dma.done.wait [#allocation15], 2048  }
 0x134   :  { %6435 = vsyncadd [#allocation15], 4294965248 }
 0x135   :  { %6436 = dma.done.wait [#allocation18], 2048  }
 0x136   :  { %6437 = vsyncadd [#allocation18], 4294965248 }
 0x137   :  { %6438 = dma.done.wait [#allocation21], 2048  }
 0x138   :  { %6439 = vsyncadd [#allocation21], 4294965248 }
 0x139   :  { %6440 = dma.done.wait [#allocation24], 2048  }
 0x13a   :  { %6441 = vsyncadd [#allocation24], 4294965248 }
 0x13b   :  { %6442 = dma.done.wait [#allocation27], 3072  }
 0x13c   :  { %6443 = vsyncadd [#allocation27], 4294964224 }
 0x13d   :  { %6444 = dma.done.wait [#allocation30], 6144  }
 0x13e   :  { %6445 = vsyncadd [#allocation30], 4294961152  ;;  %v5422_v0 = vld [vmem:[#allocation5 + $0x38] sm:$0xff]  ;;  %v5421_v1 = vld [vmem:[#allocation5 + $0x30] sm:$0xff]  ;;  %s7908_s22 = sld [smem:[#allocation48_spill]]  ;;  %s4505_s13 = sshll.u32 %s6698_s4, 4  ;;  %s4506_s13 = int_to_ptr.hbm [resolvable:$true] %s4505_s13 }
 0x13f   :  { %536 = vmatpush.bf16.msra.mxu0 %v5422_v0  ;;  %5599 = vmatpush.bf16.msra.mxu3 %v5422_v0  ;;  %v5420_v2 = vld [vmem:[#allocation5 + $0x28] sm:$0xff]  ;;  %v5419_v3 = vld [vmem:[#allocation5 + $0x20] sm:$0xff]  ;;  %v5418_v4 = vld [vmem:[#allocation5 + $0x18] sm:$0xff]  ;;  %s7909_s23 = sld [smem:[#allocation50_spill]]  ;;  %s6366_s15 = sshra.s32 %s4506_s13, 4  ;;  %s6367_s15 = int_to_ptr.hbm [resolvable:$true] %s6366_s15 }
 0x140   :  { %v5417_v5 = vld [vmem:[#allocation5 + $0x10] sm:$0xff]  ;;  %v5416_v6 = vld [vmem:[#allocation5 + $0x8] sm:$0xff]  ;;  %v5415_v7 = vld [vmem:[#allocation5] sm:$0xff]  ;;  %s7910_s21 = sld [smem:[#allocation51_spill]]  ;;  %s6368_s28 = scalar_lea.hbm %s6367_s15, 128 }
 0x141   :  { %v5430_v26 = vld [vmem:[#allocation8 + $0x38] sm:$0xff]  ;;  %v5429_v27 = vld [vmem:[#allocation8 + $0x30] sm:$0xff]  ;;  %v5428_v28 = vld [vmem:[#allocation8 + $0x28] sm:$0xff]  ;;  %s7911_s7 = sld [smem:[#allocation54_spill]]  ;;  %p6369_p11 = scmp.ne.s32.totalorder %s6367_s15, %s6368_s28 }
 0x142   :  { %5607 = vmatpush.bf16.msra.mxu1 %v5430_v26  ;;  %v5427_v31 = vld [vmem:[#allocation8 + $0x20] sm:$0xff]  ;;  %v5426_v33 = vld [vmem:[#allocation8 + $0x18] sm:$0xff]  ;;  %v5425_v37 = vld [vmem:[#allocation8 + $0x10] sm:$0xff]  ;;  %s7912_s2 = sld [smem:[#allocation49_spill]]  ;;  %s6370_s6 = scalar_lea.hbm %s6698_s4, 128 }
 0x143   :  { %537 = vmatpush.bf16.msra.mxu0 %v5421_v1  ;;  %5600 = vmatpush.bf16.msra.mxu3 %v5421_v1  ;;  %v5424_v38 = vld [vmem:[#allocation8 + $0x8] sm:$0xff]  ;;  %v5423_v39 = vld [vmem:[#allocation8] sm:$0xff]  ;;  %v6886_v41 = vld [vmem:[#allocation7] ss:$0 sm:$0xff]  ;;  %s7913_s10 = sld [smem:[#allocation52_spill]]  ;;  %p6371_p12 = scmp.lt.s32.totalorder %s6367_s15, %s6698_s4 }
 0x144   :  { %v444_v8 = vld [vmem:[%s7908_s22] sm:$0xff]  ;;  %v445_v9 = vld [vmem:[%s7908_s22 + $0x8] sm:$0xff]  ;;  %v446_v14 = vld [vmem:[%s7908_s22 + $0x10] sm:$0xff]  ;;  %s7914_s30 = sld [smem:[#allocation56_spill]]  ;;  %p6372_p13 = scmp.lt.s32.totalorder %s6370_s6, %s6368_s28 }
 0x145   :  { %v448_v10 = vld [vmem:[%s7908_s22 + $0x20] sm:$0xff]  ;;  %v449_v11 = vld [vmem:[%s7908_s22 + $0x28] sm:$0xff]  ;;  %v477_v12 = vpack.c.bf16 %v445_v9, %v444_v8  ;;  %v447_v15 = vld [vmem:[%s7908_s22 + $0x18] sm:$0xff]  ;;  %s7915_s29 = sld [smem:[#allocation53_spill]] }
 0x146   :  { %v479_v13 = vpack.c.bf16 %v449_v11, %v448_v10  ;;  %v450_v16 = vld [vmem:[%s7908_s22 + $0x30] sm:$0xff]  ;;  %v451_v17 = vld [vmem:[%s7908_s22 + $0x38] sm:$0xff]  ;;  %v478_v18 = vpack.c.bf16 %v447_v15, %v446_v14  ;;  %v452_v20 = vld [vmem:[%s7908_s22 + $0x40] sm:$0xff]  ;;  %5608 = vmatpush.bf16.msra.mxu1 %v5429_v27  ;;  %s7916_s16 = sld [smem:[#allocation57_spill]]  ;;  %p6373_p0 = por %p6372_p13, %p6371_p12 }
 0x147   :  { %538 = vmatpush.bf16.msra.mxu0 %v5420_v2  ;;  %5601 = vmatpush.bf16.msra.mxu3 %v5420_v2  ;;  %v480_v19 = vpack.c.bf16 %v451_v17, %v450_v16  ;;  %v453_v21 = vld [vmem:[%s7908_s22 + $0x48] sm:$0xff]  ;;  %v454_v23 = vld [vmem:[%s7908_s22 + $0x50] sm:$0xff]  ;;  %v455_v24 = vld [vmem:[%s7908_s22 + $0x58] sm:$0xff]  ;;  %s7955_s27 = sld [smem:[#allocation59_spill]] }
 0x148   :  { %v481_v22 = vpack.c.bf16 %v453_v21, %v452_v20  ;;  %v482_v25 = vpack.c.bf16 %v455_v24, %v454_v23  ;;  %v456_v29 = vld [vmem:[%s7908_s22 + $0x60] sm:$0xff]  ;;  %v457_v30 = vld [vmem:[%s7908_s22 + $0x68] sm:$0xff]  ;;  %v458_v34 = vld [vmem:[%s7908_s22 + $0x70] sm:$0xff]  ;;  %s7964_s18 = sld [smem:[#allocation60_spill]]  ;;  %p6374_p1 = pnand %p6373_p0, %p6369_p11 }
 0x149   :  { %v483_v32 = vpack.c.bf16 %v457_v30, %v456_v29  ;;  %v459_v35 = vld [vmem:[%s7908_s22 + $0x78] sm:$0xff]  ;;  %v4723_v24 = vld [vmem:[#allocation11 + $0x78] sm:$0xf0]  ;;  %v4715_v29 = vld [vmem:[#allocation11 + $0x68] sm:$0xf0]  ;;  %s7967_s1 = sld [smem:[#allocation62_spill]] }
 0x14a   :  { %5609 = vmatpush.bf16.msra.mxu1 %v5428_v28  ;;  %v484_v36 = vpack.c.bf16 %v459_v35, %v458_v34  ;;  %v5446_v20 = vld [vmem:[#allocation11 + $0x74] sm:$0xf0]  ;;  %v5445_v21 = vld [vmem:[#allocation11 + $0x74] sm:$0xf]  ;;  %v4707_v35 = vld [vmem:[#allocation11 + $0x58] sm:$0xf0] }
 0x14b   :  { %539 = vmatpush.bf16.msra.mxu0 %v5419_v3  ;;  %5602 = vmatpush.bf16.msra.mxu3 %v5419_v3  ;;  %v5441_v34 = vld [vmem:[#allocation11 + $0x54] sm:$0xf]  ;;  %s7968_s14 = sld [smem:[#allocation63_spill]] }
 0x14c   :  { %s7969_s24 = sld [smem:[#allocation65_spill]] }
 0x14d   :  { %s7970_s25 = sld [smem:[#allocation66_spill]] }
 0x14e   :  { %5610 = vmatpush.bf16.msra.mxu1 %v5427_v31 }
 0x14f   :  { %540 = vmatpush.bf16.msra.mxu0 %v5418_v4  ;;  %5603 = vmatpush.bf16.msra.mxu3 %v5418_v4 }
 0x152   :  { %5611 = vmatpush.bf16.msra.mxu1 %v5426_v33 }
 0x153   :  { %541 = vmatpush.bf16.msra.mxu0 %v5417_v5  ;;  %5604 = vmatpush.bf16.msra.mxu3 %v5417_v5 }
 0x156   :  { %5612 = vmatpush.bf16.msra.mxu1 %v5425_v37 }
 0x157   :  { %542 = vmatpush.bf16.msra.mxu0 %v5416_v6  ;;  %5605 = vmatpush.bf16.msra.mxu3 %v5416_v6 }
 0x15a   :  { %5613 = vmatpush.bf16.msra.mxu1 %v5424_v38 }
 0x15b   :  { %543 = vmatpush.bf16.msra.mxu0 %v5415_v7  ;;  %5606 = vmatpush.bf16.msra.mxu3 %v5415_v7 }
 0x15e   :  { %544 = vmatmul.bf16.vlgmr.msra.gmra.mxu0 %v477_v12  ;;  %554 = vmatmul.bf16.vlgmr.msra.gmra.mxu3 %v479_v13 }
 0x15f   :  { %677 = vmatpush.bf16.msrb.mxu0 %v5430_v26  ;;  %5614 = vmatpush.bf16.msra.mxu1 %v5423_v39  ;;  %v5444_v26 = vld [vmem:[#allocation11 + $0x64] sm:$0xf0] }
 0x163   :  { %678 = vmatpush.bf16.msrb.mxu0 %v5429_v27  ;;  %v4726_v27 = vor.u32 %v5445_v21, %v4723_v24 }
 0x165   :  { %901 = vmatpush.bf16.msrb.mxu3 %v4726_v27 }
 0x167   :  { %679 = vmatpush.bf16.msrb.mxu0 %v5428_v28  ;;  %v5443_v28 = vld [vmem:[#allocation11 + $0x64] sm:$0xf] }
 0x16b   :  { %680 = vmatpush.bf16.msrb.mxu0 %v5427_v31  ;;  %v4718_v31 = vor.u32 %v5443_v28, %v4715_v29 }
 0x16d   :  { %902 = vmatpush.bf16.msrb.mxu3 %v4718_v31 }
 0x16e   :  { %549 = vmatmul.bf16.gmra.mxu0 %v478_v18  ;;  %559 = vmatmul.bf16.gmra.mxu3 %v480_v19  ;;  %v4721_v19 = vld [vmem:[#allocation11 + $0x70] sm:$0xf] }
 0x16f   :  { %681 = vmatpush.bf16.msrb.mxu0 %v5426_v33  ;;  %v4722_v23 = vor.u32 %v5446_v20, %v4721_v19  ;;  %v5442_v33 = vld [vmem:[#allocation11 + $0x54] sm:$0xf0] }
 0x171   :  { %5615 = vmatpush.bf16.msra.mxu2 %v4722_v23 }
 0x173   :  { %682 = vmatpush.bf16.msrb.mxu0 %v5425_v37 }
 0x177   :  { %683 = vmatpush.bf16.msrb.mxu0 %v5424_v38  ;;  %v4710_v38 = vor.u32 %v5441_v34, %v4707_v35 }
 0x179   :  { %903 = vmatpush.bf16.msrb.mxu3 %v4710_v38 }
 0x17b   :  { %684 = vmatpush.bf16.msrb.mxu0 %v5423_v39  ;;  %v4697_v39 = vld [vmem:[#allocation11 + $0x40] sm:$0xf] }
 0x17e   :  { %564 = vmatmul.bf16.gmra.mxu3 %v481_v22 }
 0x17f   :  { %852 = vmatpush.bf16.msra.mxu0 %v4722_v23 }
 0x18e   :  { %569 = vmatmul.bf16.gmra.mxu3 %v482_v25  ;;  %v4713_v25 = vld [vmem:[#allocation11 + $0x60] sm:$0xf] }
 0x18f   :  { %v4714_v30 = vor.u32 %v5444_v26, %v4713_v25 }
 0x191   :  { %853 = vmatpush.bf16.msra.mxu0 %v4714_v30  ;;  %5616 = vmatpush.bf16.msra.mxu2 %v4714_v30 }
 0x19e   :  { %574 = vmatmul.bf16.gmra.mxu3 %v483_v32  ;;  %v4705_v32 = vld [vmem:[#allocation11 + $0x50] sm:$0xf] }
 0x19f   :  { %v4706_v37 = vor.u32 %v5442_v33, %v4705_v32 }
 0x1a1   :  { %854 = vmatpush.bf16.msra.mxu0 %v4706_v37  ;;  %5617 = vmatpush.bf16.msra.mxu2 %v4706_v37 }
 0x1ae   :  { %579 = vmatmul.bf16.gmra.mxu3 %v484_v36 }
 0x1db   :  { %v545_v40 = vpop.f32.mrf.mxu0 }
 0x1dc   :  { %v546_v43 = vadd.f32 %v6886_v41, %v545_v40  ;;  %v5440_v40 = vld [vmem:[#allocation11 + $0x44] sm:$0xf0] }
 0x1de   :  { %v585_v46 = vmax.f32 %v546_v43, 0.0  ;;  %v5439_v43 = vld [vmem:[#allocation11 + $0x44] sm:$0xf] }
 0x1e1   :  { %v555_v42 = vpop.f32.mrf.mxu3 }
 0x1e2   :  { %v556_v47 = vadd.f32 %v6886_v41, %v555_v42 }
 0x1e3   :  { %v547_v44 = vpop.f32.mrf.mxu0 }
 0x1e4   :  { %v548_v45 = vadd.f32 %v6886_v41, %v547_v44  ;;  %v589_v51 = vmax.f32 %v556_v47, 0.0  ;;  %v4699_v44 = vld [vmem:[#allocation11 + $0x48] sm:$0xf0]  ;;  %v4698_v47 = vor.u32 %v5440_v40, %v4697_v39 }
 0x1e6   :  { %v586_v48 = vmax.f32 %v548_v45, 0.0  ;;  %855 = vmatpush.bf16.msra.mxu0 %v4698_v47  ;;  %5618 = vmatpush.bf16.msra.mxu2 %v4698_v47 }
 0x1e8   :  { %v618_v49 = vpack.c.bf16 %v586_v48, %v585_v46 }
 0x1e9   :  { %v557_v50 = vpop.f32.mrf.mxu3 }
 0x1ea   :  { %v558_v52 = vadd.f32 %v6886_v41, %v557_v50  ;;  %685 = vmatmul.bf16.vlgmr.msrb.gmra.mxu0 %v618_v49  ;;  %v4702_v49 = vor.u32 %v5439_v43, %v4699_v44  ;;  %v4689_v50 = vld [vmem:[#allocation11 + $0x30] sm:$0xf] }
 0x1eb   :  { %v550_v53 = vpop.f32.mrf.mxu0 }
 0x1ec   :  { %v590_v54 = vmax.f32 %v558_v52, 0.0  ;;  %v551_v57 = vadd.f32 %v6886_v41, %v550_v53  ;;  %904 = vmatpush.bf16.msrb.mxu3 %v4702_v49 }
 0x1ee   :  { %v620_v55 = vpack.c.bf16 %v590_v54, %v589_v51  ;;  %v587_v60 = vmax.f32 %v551_v57, 0.0  ;;  %v5438_v51 = vld [vmem:[#allocation11 + $0x34] sm:$0xf0] }
 0x1ef   :  { %v4690_v53 = vor.u32 %v5438_v51, %v4689_v50 }
 0x1f0   :  { %695 = vmatmul.bf16.vlgmr.msra.gmra.mxu1 %v620_v55 }
 0x1f1   :  { %v560_v56 = vpop.f32.mrf.mxu3  ;;  %856 = vmatpush.bf16.msra.mxu0 %v4690_v53  ;;  %5619 = vmatpush.bf16.msra.mxu2 %v4690_v53 }
 0x1f2   :  { %v561_v61 = vadd.f32 %v6886_v41, %v560_v56 }
 0x1f3   :  { %v552_v58 = vpop.f32.mrf.mxu0 }
 0x1f4   :  { %v553_v59 = vadd.f32 %v6886_v41, %v552_v58  ;;  %v591_v1 = vmax.f32 %v561_v61, 0.0  ;;  %v5437_v61 = vld [vmem:[#allocation11 + $0x34] sm:$0xf] }
 0x1f6   :  { %v588_v62 = vmax.f32 %v553_v59, 0.0 }
 0x1f8   :  { %v619_v63 = vpack.c.bf16 %v588_v62, %v587_v60  ;;  %v4691_v62 = vld [vmem:[#allocation11 + $0x38] sm:$0xf0] }
 0x1f9   :  { %v562_v0 = vpop.f32.mrf.mxu3 }
 0x1fa   :  { %v563_v2 = vadd.f32 %v6886_v41, %v562_v0  ;;  %690 = vmatmul.bf16.gmra.mxu0 %v619_v63  ;;  %v4694_v63 = vor.u32 %v5437_v61, %v4691_v62  ;;  %v4681_v0 = vld [vmem:[#allocation11 + $0x20] sm:$0xf] }
 0x1fc   :  { %v592_v3 = vmax.f32 %v563_v2, 0.0  ;;  %905 = vmatpush.bf16.msrb.mxu3 %v4694_v63  ;;  %v5435_v2 = vld [vmem:[#allocation11 + $0x24] sm:$0xf] }
 0x1fe   :  { %v621_v4 = vpack.c.bf16 %v592_v3, %v591_v1  ;;  %v5436_v1 = vld [vmem:[#allocation11 + $0x24] sm:$0xf0] }
 0x1ff   :  { %v4682_v3 = vor.u32 %v5436_v1, %v4681_v0 }
 0x200   :  { %700 = vmatmul.bf16.gmra.mxu1 %v621_v4  ;;  %v4683_v4 = vld [vmem:[#allocation11 + $0x28] sm:$0xf0] }
 0x201   :  { %v565_v5 = vpop.f32.mrf.mxu3  ;;  %857 = vmatpush.bf16.msra.mxu0 %v4682_v3  ;;  %5620 = vmatpush.bf16.msra.mxu2 %v4682_v3 }
 0x202   :  { %v566_v6 = vadd.f32 %v6886_v41, %v565_v5  ;;  %v4686_v5 = vor.u32 %v5435_v2, %v4683_v4  ;;  %v5454_v2 = vld [vmem:[#allocation13 + $0x38] sm:$0xff] }
 0x204   :  { %v593_v8 = vmax.f32 %v566_v6, 0.0  ;;  %906 = vmatpush.bf16.msrb.mxu3 %v4686_v5  ;;  %v4673_v6 = vld [vmem:[#allocation11 + $0x10] sm:$0xf] }
 0x209   :  { %v567_v7 = vpop.f32.mrf.mxu3 }
 0x20a   :  { %v568_v9 = vadd.f32 %v6886_v41, %v567_v7  ;;  %v5434_v7 = vld [vmem:[#allocation11 + $0x14] sm:$0xf0] }
 0x20c   :  { %v594_v10 = vmax.f32 %v568_v9, 0.0  ;;  %v4675_v9 = vld [vmem:[#allocation11 + $0x18] sm:$0xf0] }
 0x20e   :  { %v622_v11 = vpack.c.bf16 %v594_v10, %v593_v8  ;;  %v5433_v8 = vld [vmem:[#allocation11 + $0x14] sm:$0xf] }
 0x20f   :  { %v4678_v10 = vor.u32 %v5433_v8, %v4675_v9  ;;  %v5453_v8 = vld [vmem:[#allocation13 + $0x30] sm:$0xff] }
 0x210   :  { %705 = vmatmul.bf16.gmra.mxu1 %v622_v11  ;;  %v4665_v11 = vld [vmem:[#allocation11] sm:$0xf] }
 0x211   :  { %v570_v12 = vpop.f32.mrf.mxu3  ;;  %907 = vmatpush.bf16.msrb.mxu3 %v4678_v10  ;;  %v5478_v10 = vld [vmem:[#allocation17 + $0x38] sm:$0xff] }
 0x212   :  { %v571_v13 = vadd.f32 %v6886_v41, %v570_v12  ;;  %v5432_v12 = vld [vmem:[#allocation11 + $0x4] sm:$0xf0] }
 0x214   :  { %v595_v15 = vmax.f32 %v571_v13, 0.0  ;;  %v5431_v13 = vld [vmem:[#allocation11 + $0x4] sm:$0xf] }
 0x219   :  { %v572_v14 = vpop.f32.mrf.mxu3 }
 0x21a   :  { %v573_v16 = vadd.f32 %v6886_v41, %v572_v14  ;;  %v4666_v14 = vor.u32 %v5432_v12, %v4665_v11  ;;  %v5452_v11 = vld [vmem:[#allocation13 + $0x28] sm:$0xff] }
 0x21c   :  { %v596_v17 = vmax.f32 %v573_v16, 0.0 }
 0x21e   :  { %v623_v18 = vpack.c.bf16 %v596_v17, %v595_v15  ;;  %v4667_v15 = vld [vmem:[#allocation11 + $0x8] sm:$0xf0] }
 0x21f   :  { %v4670_v16 = vor.u32 %v5431_v13, %v4667_v15  ;;  %v5477_v13 = vld [vmem:[#allocation17 + $0x30] sm:$0xff]  ;;  %v5451_v15 = vld [vmem:[#allocation13 + $0x20] sm:$0xff] }
 0x220   :  { %710 = vmatmul.bf16.gmra.mxu1 %v623_v18  ;;  %v6904_v18 = vld [vmem:[#allocation10] ss:$0 sm:$0xff] }
 0x221   :  { %v575_v22 = vpop.f32.mrf.mxu3  ;;  %908 = vmatpush.bf16.msrb.mxu3 %v4670_v16  ;;  %v5476_v16 = vld [vmem:[#allocation17 + $0x28] sm:$0xff] }
 0x222   :  { %v576_v36 = vadd.f32 %v6886_v41, %v575_v22 }
 0x224   :  { %v597_v45 = vmax.f32 %v576_v36, 0.0 }
 0x225   :  { %1785 = vmatpush.bf16.msra.mxu3 %v5478_v10 }
 0x229   :  { %v577_v42 = vpop.f32.mrf.mxu3  ;;  %1786 = vmatpush.bf16.msra.mxu3 %v5477_v13 }
 0x22a   :  { %v578_v46 = vadd.f32 %v6886_v41, %v577_v42 }
 0x22c   :  { %v598_v48 = vmax.f32 %v578_v46, 0.0 }
 0x22d   :  { %1787 = vmatpush.bf16.msra.mxu3 %v5476_v16 }
 0x22e   :  { %v624_v52 = vpack.c.bf16 %v598_v48, %v597_v45 }
 0x230   :  { %715 = vmatmul.bf16.gmra.mxu1 %v624_v52 }
 0x231   :  { %v580_v54 = vpop.f32.mrf.mxu3 }
 0x232   :  { %v581_v55 = vadd.f32 %v6886_v41, %v580_v54 }
 0x234   :  { %v599_v57 = vmax.f32 %v581_v55, 0.0 }
 0x239   :  { %v582_v56 = vpop.f32.mrf.mxu3 }
 0x23a   :  { %v583_v58 = vadd.f32 %v6886_v41, %v582_v56  ;;  %v4674_v41 = vor.u32 %v5434_v7, %v4673_v6 }
 0x23c   :  { %v600_v59 = vmax.f32 %v583_v58, 0.0  ;;  %858 = vmatpush.bf16.msra.mxu0 %v4674_v41  ;;  %5621 = vmatpush.bf16.msra.mxu2 %v4674_v41 }
 0x23e   :  { %v625_v60 = vpack.c.bf16 %v600_v59, %v599_v57 }
 0x240   :  { %720 = vmatmul.bf16.gmra.mxu1 %v625_v60  ;;  %859 = vmatpush.bf16.msra.mxu0 %v4666_v14 }
 0x241   :  { %5622 = vmatpush.bf16.msra.mxu2 %v4666_v14 }
 0x244   :  { %1058 = vmatpush.bf16.msrb.mxu0 %v5454_v2 }
 0x248   :  { %1059 = vmatpush.bf16.msrb.mxu0 %v5453_v8 }
 0x24c   :  { %1060 = vmatpush.bf16.msrb.mxu0 %v5452_v11 }
 0x250   :  { %1061 = vmatpush.bf16.msrb.mxu0 %v5451_v15 }
 0x267   :  { %v686_v17 = vpop.f32.mrf.mxu0 }
 0x268   :  { %v6907_v20 = vadd.f32 %v6904_v18, %v686_v17  ;;  %v5450_v17 = vld [vmem:[#allocation13 + $0x18] sm:$0xff] }
 0x269   :  { %1062 = vmatpush.bf16.msrb.mxu0 %v5450_v17 }
 0x26a   :  { %v726_v23 = vmax.f32 %v6907_v20, 0.0 }
 0x26d   :  { %v696_v19 = vpop.f32.mrf.mxu1 }
 0x26e   :  { %v6914_v24 = vadd.f32 %v6904_v18, %v696_v19  ;;  %v5449_v19 = vld [vmem:[#allocation13 + $0x10] sm:$0xff] }
 0x26f   :  { %v688_v21 = vpop.f32.mrf.mxu0  ;;  %1063 = vmatpush.bf16.msrb.mxu0 %v5449_v19 }
 0x270   :  { %v6910_v22 = vadd.f32 %v6904_v18, %v688_v21  ;;  %v730_v28 = vmax.f32 %v6914_v24, 0.0  ;;  %v5474_v21 = vld [vmem:[#allocation17 + $0x18] sm:$0xff] }
 0x272   :  { %v727_v25 = vmax.f32 %v6910_v22, 0.0  ;;  %v5524_v22 = vld [vmem:[#allocation25 + $0x28] sm:$0xff] }
 0x274   :  { %v759_v26 = vpack.c.bf16 %v727_v25, %v726_v23 }
 0x275   :  { %v698_v27 = vpop.f32.mrf.mxu1 }
 0x276   :  { %v6923_v29 = vadd.f32 %v6904_v18, %v698_v27  ;;  %860 = vmatmul.bf16.vlgmr.msra.gmra.mxu0 %v759_v26  ;;  %909 = vmatmul.bf16.vlgmr.msrb.gmra.mxu3 %v759_v26  ;;  %v5448_v26 = vld [vmem:[#allocation13 + $0x8] sm:$0xff]  ;;  %v5473_v27 = vld [vmem:[#allocation17 + $0x10] sm:$0xff] }
 0x277   :  { %v691_v30 = vpop.f32.mrf.mxu0  ;;  %1064 = vmatpush.bf16.msrb.mxu0 %v5448_v26 }
 0x278   :  { %v731_v31 = vmax.f32 %v6923_v29, 0.0  ;;  %v6931_v34 = vadd.f32 %v6904_v18, %v691_v30  ;;  %v5447_v30 = vld [vmem:[#allocation13] sm:$0xff]  ;;  %v5522_v29 = vld [vmem:[#allocation25 + $0x18] sm:$0xff] }
 0x27a   :  { %v761_v32 = vpack.c.bf16 %v731_v31, %v730_v28  ;;  %v728_v37 = vmax.f32 %v6931_v34, 0.0 }
 0x27b   :  { %1065 = vmatpush.bf16.msrb.mxu0 %v5447_v30 }
 0x27c   :  { %870 = vmatmul.bf16.vlgmr.msra.gmra.mxu2 %v761_v32 }
 0x27d   :  { %v701_v33 = vpop.f32.mrf.mxu1 }
 0x27e   :  { %v6938_v38 = vadd.f32 %v6904_v18, %v701_v33  ;;  %v5471_v33 = vld [vmem:[#allocation17] sm:$0xff] }
 0x27f   :  { %v693_v35 = vpop.f32.mrf.mxu0 }
 0x280   :  { %v6934_v36 = vadd.f32 %v6904_v18, %v693_v35  ;;  %v7882_v43 = vmax.f32 %v6938_v38, 0.0  ;;  %v758_v35 = vld [vmem:[%s7909_s23] sm:$0x3] }
 0x282   :  { %v729_v39 = vmax.f32 %v6934_v36, 0.0  ;;  %v5523_v36 = vld [vmem:[#allocation25 + $0x20] sm:$0xff] }
 0x284   :  { %v760_v40 = vpack.c.bf16 %v729_v39, %v728_v37 }
 0x285   :  { %v703_v42 = vpop.f32.mrf.mxu1 }
 0x286   :  { %v6947_v44 = vadd.f32 %v6904_v18, %v703_v42  ;;  %865 = vmatmul.bf16.gmra.mxu0 %v760_v40  ;;  %914 = vmatmul.bf16.gmra.mxu3 %v760_v40  ;;  %v7003_v42 = vperm.slane %v758_v35, 0 }
 0x288   :  { %v7881_v45 = vmax.f32 %v6947_v44, 0.0  ;;  %v7957_v24 = vmax.f32 %v6947_v44, 0.0  ;;  %v5521_v44 = vld [vmem:[#allocation25 + $0x10] sm:$0xff] }
 0x28a   :  { %v762_v46 = vpack.c.bf16 %v7881_v45, %v7882_v43 }
 0x28c   :  { %875 = vmatmul.bf16.gmra.mxu2 %v762_v46 }
 0x28d   :  { %v706_v47 = vpop.f32.mrf.mxu1 }
 0x28e   :  { %v6955_v48 = vadd.f32 %v6904_v18, %v706_v47 }
 0x290   :  { %v7880_v50 = vmax.f32 %v6955_v48, 0.0 }
 0x295   :  { %v708_v49 = vpop.f32.mrf.mxu1 }
 0x296   :  { %v6959_v51 = vadd.f32 %v6904_v18, %v708_v49  ;;  %919 = vmatmul.bf16.gmra.mxu3 %v761_v32  ;;  %v5472_v32 = vld [vmem:[#allocation17 + $0x8] sm:$0xff] }
 0x298   :  { %v7879_v52 = vmax.f32 %v6959_v51, 0.0 }
 0x29a   :  { %v763_v53 = vpack.c.bf16 %v7879_v52, %v7880_v50 }
 0x29c   :  { %880 = vmatmul.bf16.gmra.mxu2 %v763_v53 }
 0x29d   :  { %v711_v54 = vpop.f32.mrf.mxu1 }
 0x29e   :  { %v6967_v55 = vadd.f32 %v6904_v18, %v711_v54 }
 0x2a0   :  { %v7878_v57 = vmax.f32 %v6967_v55, 0.0 }
 0x2a5   :  { %v713_v56 = vpop.f32.mrf.mxu1 }
 0x2a6   :  { %v6971_v58 = vadd.f32 %v6904_v18, %v713_v56  ;;  %924 = vmatmul.bf16.gmra.mxu3 %v762_v46 }
 0x2a8   :  { %v7877_v59 = vmax.f32 %v6971_v58, 0.0 }
 0x2aa   :  { %v764_v60 = vpack.c.bf16 %v7877_v59, %v7878_v57 }
 0x2ac   :  { %885 = vmatmul.bf16.gmra.mxu2 %v764_v60 }
 0x2ad   :  { %v716_v61 = vpop.f32.mrf.mxu1 }
 0x2ae   :  { %v6979_v62 = vadd.f32 %v6904_v18, %v716_v61 }
 0x2b0   :  { %v7876_v0 = vmax.f32 %v6979_v62, 0.0 }
 0x2b5   :  { %v718_v63 = vpop.f32.mrf.mxu1 }
 0x2b6   :  { %v6983_v1 = vadd.f32 %v6904_v18, %v718_v63  ;;  %929 = vmatmul.bf16.gmra.mxu3 %v763_v53  ;;  %v7006_v53 = vperm.slane %v758_v35, 1 }
 0x2b8   :  { %v7875_v3 = vmax.f32 %v6983_v1, 0.0 }
 0x2ba   :  { %v765_v4 = vpack.c.bf16 %v7875_v3, %v7876_v0 }
 0x2bc   :  { %890 = vmatmul.bf16.gmra.mxu2 %v765_v4 }
 0x2bd   :  { %v721_v5 = vpop.f32.mrf.mxu1 }
 0x2be   :  { %v6991_v6 = vadd.f32 %v6904_v18, %v721_v5 }
 0x2c0   :  { %v7874_v41 = vmax.f32 %v6991_v6, 0.0 }
 0x2c5   :  { %v723_v7 = vpop.f32.mrf.mxu1 }
 0x2c6   :  { %v6995_v9 = vadd.f32 %v6904_v18, %v723_v7  ;;  %934 = vmatmul.bf16.gmra.mxu3 %v764_v60  ;;  %v5475_v18 = vld [vmem:[#allocation17 + $0x20] sm:$0xff] }
 0x2c7   :  { %1788 = vmatpush.bf16.msra.mxu3 %v5475_v18  ;;  %v5462_v18 = vld [vmem:[#allocation14 + $0x38] sm:$0xff] }
 0x2c8   :  { %v7873_v12 = vmax.f32 %v6995_v9, 0.0  ;;  %1199 = vmatpush.bf16.msrb.mxu1 %v5462_v18 }
 0x2ca   :  { %v766_v14 = vpack.c.bf16 %v7873_v12, %v7874_v41 }
 0x2cb   :  { %1789 = vmatpush.bf16.msra.mxu3 %v5474_v21 }
 0x2cc   :  { %895 = vmatmul.bf16.gmra.mxu2 %v766_v14 }
 0x2cf   :  { %1790 = vmatpush.bf16.msra.mxu3 %v5473_v27 }
 0x2d3   :  { %1791 = vmatpush.bf16.msra.mxu3 %v5472_v32 }
 0x2d6   :  { %939 = vmatmul.bf16.gmra.mxu3 %v765_v4 }
 0x2d7   :  { %1792 = vmatpush.bf16.msra.mxu3 %v5471_v33 }
 0x2e6   :  { %944 = vmatmul.bf16.gmra.mxu3 %v766_v14 }
 0x2f3   :  { %v861_v40 = vpop.f32.mrf.mxu0 }
 0x2f4   :  { %v862_v47 = vadd.f32 %v861_v40, %v7003_v42 }
 0x2f6   :  { %v950_v56 = vmax.f32 %v862_v47, 0.0 }
 0x2f9   :  { %v910_v46 = vpop.f32.mrf.mxu3 }
 0x2fa   :  { %v911_v63 = vadd.f32 %v910_v46, %v7006_v53 }
 0x2fb   :  { %v863_v49 = vpop.f32.mrf.mxu0 }
 0x2fc   :  { %v864_v54 = vadd.f32 %v863_v49, %v7003_v42  ;;  %v951_v8 = vmax.f32 %v911_v63, 0.0  ;;  %v5461_v63 = vld [vmem:[#allocation14 + $0x30] sm:$0xff] }
 0x2fd   :  { %1200 = vmatpush.bf16.msrb.mxu1 %v5461_v63  ;;  %v5458_v63 = vld [vmem:[#allocation14 + $0x18] sm:$0xff] }
 0x2fe   :  { %v952_v60 = vmax.f32 %v864_v54, 0.0 }
 0x2ff   :  { %v871_v61 = vpop.f32.mrf.mxu2 }
 0x300   :  { %v999_v2 = vpack.c.bf16 %v952_v60, %v950_v56  ;;  %v872_v56 = vadd.f32 %v871_v61, %v7003_v42 }
 0x301   :  { %v912_v4 = vpop.f32.mrf.mxu3 }
 0x302   :  { %v913_v5 = vadd.f32 %v912_v4, %v7006_v53  ;;  %1066 = vmatmul.bf16.vlgmr.msrb.gmra.mxu0 %v999_v2  ;;  %v958_v2 = vmax.f32 %v872_v56, 0.0 }
 0x303   :  { %v866_v7 = vpop.f32.mrf.mxu0 }
 0x304   :  { %v953_v10 = vmax.f32 %v913_v5, 0.0  ;;  %v867_v15 = vadd.f32 %v866_v7, %v7003_v42 }
 0x306   :  { %v1726_v11 = vpack.c.bf16 %v953_v10, %v951_v8  ;;  %v954_v19 = vmax.f32 %v867_v15, 0.0  ;;  %v5460_v15 = vld [vmem:[#allocation14 + $0x28] sm:$0xff] }
 0x307   :  { %v873_v13 = vpop.f32.mrf.mxu2  ;;  %1201 = vmatpush.bf16.msrb.mxu1 %v5460_v15 }
 0x308   :  { %1793 = vmatmul.bf16.vlgmr.msra.gmra.mxu3 %v1726_v11  ;;  %v874_v49 = vadd.f32 %v873_v13, %v7003_v42 }
 0x309   :  { %v915_v14 = vpop.f32.mrf.mxu3 }
 0x30a   :  { %v916_v27 = vadd.f32 %v915_v14, %v7006_v53  ;;  %v960_v60 = vmax.f32 %v874_v49, 0.0  ;;  %v5459_v49 = vld [vmem:[#allocation14 + $0x20] sm:$0xff] }
 0x30b   :  { %v868_v16 = vpop.f32.mrf.mxu0  ;;  %1202 = vmatpush.bf16.msrb.mxu1 %v5459_v49 }
 0x30c   :  { %v869_v17 = vadd.f32 %v868_v16, %v7003_v42  ;;  %v955_v35 = vmax.f32 %v916_v27, 0.0  ;;  %v1001_v7 = vpack.c.bf16 %v960_v60, %v958_v2 }
 0x30e   :  { %v956_v21 = vmax.f32 %v869_v17, 0.0 }
 0x30f   :  { %v876_v26 = vpop.f32.mrf.mxu2  ;;  %1203 = vmatpush.bf16.msrb.mxu1 %v5458_v63 }
 0x310   :  { %v1000_v30 = vpack.c.bf16 %v956_v21, %v954_v19  ;;  %v877_v18 = vadd.f32 %v876_v26, %v7003_v42 }
 0x311   :  { %v917_v32 = vpop.f32.mrf.mxu3 }
 0x312   :  { %v918_v33 = vadd.f32 %v917_v32, %v7006_v53  ;;  %1071 = vmatmul.bf16.gmra.mxu0 %v1000_v30  ;;  %v962_v21 = vmax.f32 %v877_v18, 0.0 }
 0x314   :  { %v957_v40 = vmax.f32 %v918_v33, 0.0 }
 0x316   :  { %v1727_v46 = vpack.c.bf16 %v957_v40, %v955_v35 }
 0x317   :  { %v878_v47 = vpop.f32.mrf.mxu2 }
 0x318   :  { %1798 = vmatmul.bf16.gmra.mxu3 %v1727_v46  ;;  %v879_v16 = vadd.f32 %v878_v47, %v7003_v42 }
 0x319   :  { %v920_v54 = vpop.f32.mrf.mxu3 }
 0x31a   :  { %v921_v5 = vadd.f32 %v920_v54, %v7006_v53  ;;  %v964_v19 = vmax.f32 %v879_v16, 0.0 }
 0x31c   :  { %v959_v11 = vmax.f32 %v921_v5, 0.0  ;;  %v1002_v30 = vpack.c.bf16 %v964_v19, %v962_v21  ;;  %v5457_v19 = vld [vmem:[#allocation14 + $0x10] sm:$0xff] }
 0x31d   :  { %1204 = vmatpush.bf16.msrb.mxu1 %v5457_v19 }
 0x31f   :  { %v881_v4 = vpop.f32.mrf.mxu2 }
 0x320   :  { %v882_v26 = vadd.f32 %v881_v4, %v7003_v42 }
 0x321   :  { %v922_v8 = vpop.f32.mrf.mxu3 }
 0x322   :  { %v923_v10 = vadd.f32 %v922_v8, %v7006_v53  ;;  %1076 = vmatmul.bf16.gmra.mxu0 %v1001_v7  ;;  %v966_v5 = vmax.f32 %v882_v26, 0.0 }
 0x324   :  { %v961_v14 = vmax.f32 %v923_v10, 0.0 }
 0x326   :  { %v1728_v13 = vpack.c.bf16 %v961_v14, %v959_v11 }
 0x327   :  { %v883_v61 = vpop.f32.mrf.mxu2 }
 0x328   :  { %1803 = vmatmul.bf16.gmra.mxu3 %v1728_v13  ;;  %v884_v47 = vadd.f32 %v883_v61, %v7003_v42 }
 0x329   :  { %v925_v17 = vpop.f32.mrf.mxu3 }
 0x32a   :  { %v926_v27 = vadd.f32 %v925_v17, %v7006_v53  ;;  %v968_v60 = vmax.f32 %v884_v47, 0.0 }
 0x32c   :  { %v963_v40 = vmax.f32 %v926_v27, 0.0  ;;  %v1003_v8 = vpack.c.bf16 %v968_v60, %v966_v5  ;;  %v5485_v5 = vld [vmem:[#allocation19 + $0x30] sm:$0xff] }
 0x32f   :  { %v886_v35 = vpop.f32.mrf.mxu2 }
 0x330   :  { %v887_v17 = vadd.f32 %v886_v35, %v7003_v42  ;;  %v5486_v35 = vld [vmem:[#allocation19 + $0x38] sm:$0xff] }
 0x331   :  { %v927_v32 = vpop.f32.mrf.mxu3  ;;  %1926 = vmatpush.bf16.msra.mxu0 %v5486_v35 }
 0x332   :  { %v928_v33 = vadd.f32 %v927_v32, %v7006_v53  ;;  %1081 = vmatmul.bf16.gmra.mxu0 %v1002_v30  ;;  %v970_v21 = vmax.f32 %v887_v17, 0.0  ;;  %v5483_v17 = vld [vmem:[#allocation19 + $0x20] sm:$0xff] }
 0x334   :  { %v965_v46 = vmax.f32 %v928_v33, 0.0 }
 0x335   :  { %1927 = vmatpush.bf16.msra.mxu0 %v5485_v5 }
 0x336   :  { %v1729_v54 = vpack.c.bf16 %v965_v46, %v963_v40 }
 0x337   :  { %v888_v2 = vpop.f32.mrf.mxu2 }
 0x338   :  { %1808 = vmatmul.bf16.gmra.mxu3 %v1729_v54  ;;  %v889_v61 = vadd.f32 %v888_v2, %v7003_v42  ;;  %v5456_v54 = vld [vmem:[#allocation14 + $0x8] sm:$0xff] }
 0x339   :  { %v930_v56 = vpop.f32.mrf.mxu3  ;;  %1205 = vmatpush.bf16.msrb.mxu1 %v5456_v54 }
 0x33a   :  { %v931_v7 = vadd.f32 %v930_v56, %v7006_v53  ;;  %v972_v18 = vmax.f32 %v889_v61, 0.0 }
 0x33c   :  { %v967_v14 = vmax.f32 %v931_v7, 0.0  ;;  %v1004_v30 = vpack.c.bf16 %v972_v18, %v970_v21 }
 0x33f   :  { %v891_v16 = vpop.f32.mrf.mxu2 }
 0x340   :  { %v892_v60 = vadd.f32 %v891_v16, %v7003_v42 }
 0x341   :  { %v932_v10 = vpop.f32.mrf.mxu3 }
 0x342   :  { %v933_v11 = vadd.f32 %v932_v10, %v7006_v53  ;;  %1086 = vmatmul.bf16.gmra.mxu0 %v1003_v8  ;;  %v974_v7 = vmax.f32 %v892_v60, 0.0  ;;  %v5479_v60 = vld [vmem:[#allocation19] sm:$0xff] }
 0x344   :  { %v969_v15 = vmax.f32 %v933_v11, 0.0 }
 0x346   :  { %v1730_v13 = vpack.c.bf16 %v969_v15, %v967_v14  ;;  %v5484_v14 = vld [vmem:[#allocation19 + $0x28] sm:$0xff] }
 0x347   :  { %v893_v32 = vpop.f32.mrf.mxu2  ;;  %1928 = vmatpush.bf16.msra.mxu0 %v5484_v14 }
 0x348   :  { %1813 = vmatmul.bf16.gmra.mxu3 %v1730_v13  ;;  %v894_v56 = vadd.f32 %v893_v32, %v7003_v42  ;;  %v5455_v13 = vld [vmem:[#allocation14] sm:$0xff] }
 0x349   :  { %v935_v4 = vpop.f32.mrf.mxu3  ;;  %1206 = vmatpush.bf16.msrb.mxu1 %v5455_v13 }
 0x34a   :  { %v936_v27 = vadd.f32 %v935_v4, %v7006_v53  ;;  %v976_v2 = vmax.f32 %v894_v56, 0.0 }
 0x34b   :  { %1929 = vmatpush.bf16.msra.mxu0 %v5483_v17 }
 0x34c   :  { %v971_v46 = vmax.f32 %v936_v27, 0.0  ;;  %v1005_v10 = vpack.c.bf16 %v976_v2, %v974_v7  ;;  %v5482_v27 = vld [vmem:[#allocation19 + $0x18] sm:$0xff] }
 0x34d   :  { %v7040_v2 = vld [vmem:[%s7910_s21] ss:$0 sm:$0xff] }
 0x34f   :  { %v896_v63 = vpop.f32.mrf.mxu2  ;;  %1930 = vmatpush.bf16.msra.mxu0 %v5482_v27 }
 0x351   :  { %v937_v33 = vpop.f32.mrf.mxu3 }
 0x352   :  { %v938_v40 = vadd.f32 %v937_v33, %v7006_v53  ;;  %1091 = vmatmul.bf16.gmra.mxu0 %v1004_v30  ;;  %v897_v30 = vadd.f32 %v896_v63, %v7003_v42  ;;  %v5481_v33 = vld [vmem:[#allocation19 + $0x10] sm:$0xff] }
 0x353   :  { %1931 = vmatpush.bf16.msra.mxu0 %v5481_v33 }
 0x354   :  { %v973_v49 = vmax.f32 %v938_v40, 0.0  ;;  %v978_v40 = vmax.f32 %v897_v30, 0.0 }
 0x356   :  { %v1731_v47 = vpack.c.bf16 %v973_v49, %v971_v46 }
 0x357   :  { %v898_v16 = vpop.f32.mrf.mxu2 }
 0x358   :  { %1818 = vmatmul.bf16.gmra.mxu3 %v1731_v47  ;;  %v899_v19 = vadd.f32 %v898_v16, %v7003_v42  ;;  %v5480_v47 = vld [vmem:[#allocation19 + $0x8] sm:$0xff] }
 0x359   :  { %v940_v26 = vpop.f32.mrf.mxu3  ;;  %1932 = vmatpush.bf16.msra.mxu0 %v5480_v47 }
 0x35a   :  { %v941_v8 = vadd.f32 %v940_v26, %v7006_v53  ;;  %v980_v32 = vmax.f32 %v899_v19, 0.0 }
 0x35c   :  { %v975_v61 = vmax.f32 %v941_v8, 0.0  ;;  %v1006_v49 = vpack.c.bf16 %v980_v32, %v978_v40  ;;  %v5470_v40 = vld [vmem:[#allocation16 + $0x38] sm:$0xff] }
 0x35d   :  { %1933 = vmatpush.bf16.msra.mxu0 %v5479_v60  ;;  %1340 = vmatpush.bf16.msrb.mxu2 %v5470_v40 }
 0x361   :  { %v942_v11 = vpop.f32.mrf.mxu3 }
 0x362   :  { %v943_v15 = vadd.f32 %v942_v11, %v7006_v53  ;;  %1096 = vmatmul.bf16.gmra.mxu0 %v1005_v10 }
 0x364   :  { %v977_v4 = vmax.f32 %v943_v15, 0.0  ;;  %v7045_v15 = vld [vmem:[%s7911_s7] ss:$0 sm:$0xff] }
 0x366   :  { %v1732_v18 = vpack.c.bf16 %v977_v4, %v975_v61 }
 0x368   :  { %1823 = vmatmul.bf16.gmra.mxu3 %v1732_v18 }
 0x369   :  { %v945_v21 = vpop.f32.mrf.mxu3 }
 0x36a   :  { %v946_v46 = vadd.f32 %v945_v21, %v7006_v53 }
 0x36c   :  { %v979_v35 = vmax.f32 %v946_v46, 0.0 }
 0x371   :  { %v947_v54 = vpop.f32.mrf.mxu3 }
 0x372   :  { %v948_v56 = vadd.f32 %v947_v54, %v7006_v53  ;;  %1101 = vmatmul.bf16.gmra.mxu0 %v1006_v49 }
 0x374   :  { %v981_v26 = vmax.f32 %v948_v56, 0.0 }
 0x376   :  { %v1733_v42 = vpack.c.bf16 %v981_v26, %v979_v35 }
 0x378   :  { %1828 = vmatmul.bf16.gmra.mxu3 %v1733_v42 }
 0x37f   :  { %v1067_v63 = vpop.f32.mrf.mxu0 }
 0x380   :  { %v1068_v5 = vadd.f32 %v7040_v2, %v1067_v63  ;;  %v5469_v63 = vld [vmem:[#allocation16 + $0x30] sm:$0xff] }
 0x381   :  { %1341 = vmatpush.bf16.msrb.mxu2 %v5469_v63 }
 0x382   :  { %v1107_v10 = vmax.f32 %v1068_v5, 0.0 }
 0x387   :  { %v1069_v7 = vpop.f32.mrf.mxu0 }
 0x388   :  { %v1070_v8 = vadd.f32 %v7040_v2, %v1069_v7 }
 0x38a   :  { %v1108_v11 = vmax.f32 %v1070_v8, 0.0 }
 0x38b   :  { %v1794_v53 = vpop.f32.mrf.mxu3 }
 0x38c   :  { %v1140_v14 = vpack.c.bf16 %v1108_v11, %v1107_v10  ;;  %v1795_v61 = vadd.f32 %v7045_v15, %v1794_v53 }
 0x38e   :  { %1207 = vmatmul.bf16.vlgmr.msrb.gmra.mxu1 %v1140_v14  ;;  %v1834_v17 = vmax.f32 %v1795_v61, 0.0 }
 0x38f   :  { %v1072_v13 = vpop.f32.mrf.mxu0 }
 0x390   :  { %v1073_v18 = vadd.f32 %v7040_v2, %v1072_v13 }
 0x392   :  { %v1109_v32 = vmax.f32 %v1073_v18, 0.0 }
 0x393   :  { %v1796_v4 = vpop.f32.mrf.mxu3 }
 0x394   :  { %v1797_v16 = vadd.f32 %v7045_v15, %v1796_v4  ;;  %v5468_v4 = vld [vmem:[#allocation16 + $0x28] sm:$0xff] }
 0x395   :  { %1342 = vmatpush.bf16.msrb.mxu2 %v5468_v4 }
 0x396   :  { %v1835_v19 = vmax.f32 %v1797_v16, 0.0 }
 0x397   :  { %v1074_v21 = vpop.f32.mrf.mxu0 }
 0x398   :  { %v1867_v27 = vpack.c.bf16 %v1835_v19, %v1834_v17  ;;  %v1075_v30 = vadd.f32 %v7040_v2, %v1074_v21 }
 0x39a   :  { %v1110_v33 = vmax.f32 %v1075_v30, 0.0  ;;  %1934 = vmatmul.bf16.vlgmr.msra.gmra.mxu0 %v1867_v27 }
 0x39b   :  { %v1799_v46 = vpop.f32.mrf.mxu3 }
 0x39c   :  { %v1141_v49 = vpack.c.bf16 %v1110_v33, %v1109_v32  ;;  %v1800_v47 = vadd.f32 %v7045_v15, %v1799_v46 }
 0x39e   :  { %1212 = vmatmul.bf16.gmra.mxu1 %v1141_v49  ;;  %v1836_v26 = vmax.f32 %v1800_v47, 0.0 }
 0x39f   :  { %v1077_v54 = vpop.f32.mrf.mxu0 }
 0x3a0   :  { %v1078_v60 = vadd.f32 %v7040_v2, %v1077_v54  ;;  %v5467_v54 = vld [vmem:[#allocation16 + $0x20] sm:$0xff] }
 0x3a1   :  { %1343 = vmatpush.bf16.msrb.mxu2 %v5467_v54 }
 0x3a2   :  { %v1111_v10 = vmax.f32 %v1078_v60, 0.0 }
 0x3a3   :  { %v1801_v56 = vpop.f32.mrf.mxu3 }
 0x3a4   :  { %v1802_v35 = vadd.f32 %v7045_v15, %v1801_v56 }
 0x3a6   :  { %v1837_v42 = vmax.f32 %v1802_v35, 0.0 }
 0x3a7   :  { %v1079_v5 = vpop.f32.mrf.mxu0 }
 0x3a8   :  { %v1080_v7 = vadd.f32 %v7040_v2, %v1079_v5  ;;  %v1868_v8 = vpack.c.bf16 %v1837_v42, %v1836_v26 }
 0x3aa   :  { %v1112_v11 = vmax.f32 %v1080_v7, 0.0  ;;  %1939 = vmatmul.bf16.gmra.mxu0 %v1868_v8 }
 0x3ab   :  { %v1804_v53 = vpop.f32.mrf.mxu3 }
 0x3ac   :  { %v1142_v14 = vpack.c.bf16 %v1112_v11, %v1111_v10  ;;  %v1805_v61 = vadd.f32 %v7045_v15, %v1804_v53  ;;  %v5466_v53 = vld [vmem:[#allocation16 + $0x18] sm:$0xff] }
 0x3ad   :  { %1344 = vmatpush.bf16.msrb.mxu2 %v5466_v53 }
 0x3ae   :  { %1217 = vmatmul.bf16.gmra.mxu1 %v1142_v14  ;;  %v1838_v18 = vmax.f32 %v1805_v61, 0.0 }
 0x3af   :  { %v1082_v13 = vpop.f32.mrf.mxu0 }
 0x3b0   :  { %v1083_v19 = vadd.f32 %v7040_v2, %v1082_v13 }
 0x3b2   :  { %v1113_v33 = vmax.f32 %v1083_v19, 0.0  ;;  %v2438_v19 = vld [vmem:[%s7912_s2] sm:$0xff] }
 0x3b3   :  { %v1806_v16 = vpop.f32.mrf.mxu3 }
 0x3b4   :  { %v1807_v17 = vadd.f32 %v7045_v15, %v1806_v16 }
 0x3b6   :  { %v1839_v21 = vmax.f32 %v1807_v17, 0.0 }
 0x3b7   :  { %v1084_v27 = vpop.f32.mrf.mxu0 }
 0x3b8   :  { %v1085_v30 = vadd.f32 %v7040_v2, %v1084_v27  ;;  %v1869_v32 = vpack.c.bf16 %v1839_v21, %v1838_v18  ;;  %v6510_v18 = vmov 0  }
 0x3b9   :  { %5688 = vset.pattern.permute.xlu0 %v6510_v18  ;;  %5689 = vset.pattern.permute.xlu1 %v6510_v18 }
 0x3ba   :  { %v1114_v40 = vmax.f32 %v1085_v30, 0.0  ;;  %1944 = vmatmul.bf16.gmra.mxu0 %v1869_v32  ;;  %2455 = vperm.xlu0 %5688, %v2438_v19   ;;  %v5465_v32 = vld [vmem:[#allocation16 + $0x10] sm:$0xff] }
 0x3bb   :  { %v1809_v46 = vpop.f32.mrf.mxu3  ;;  %5690 = vset.pattern.permute.xlu2 %v6510_v18  ;;  %1345 = vmatpush.bf16.msrb.mxu2 %v5465_v32  ;;  %v2447_v32 = vld [vmem:[%s7912_s2 + $0x48] sm:$0xff] }
 0x3bc   :  { %v1143_v49 = vpack.c.bf16 %v1114_v40, %v1113_v33  ;;  %v1810_v56 = vadd.f32 %v7045_v15, %v1809_v46 }
 0x3be   :  { %1222 = vmatmul.bf16.gmra.mxu1 %v1143_v49  ;;  %v1840_v60 = vmax.f32 %v1810_v56, 0.0 }
 0x3bf   :  { %v1087_v47 = vpop.f32.mrf.mxu0 }
 0x3c0   :  { %v1088_v42 = vadd.f32 %v7040_v2, %v1087_v47 }
 0x3c2   :  { %v1115_v10 = vmax.f32 %v1088_v42, 0.0 }
 0x3c3   :  { %v1811_v35 = vpop.f32.mrf.mxu3 }
 0x3c4   :  { %v1812_v26 = vadd.f32 %v7045_v15, %v1811_v35  ;;  %v2440_v35 = vld [vmem:[%s7912_s2 + $0x10] sm:$0xff] }
 0x3c5   :  { %2461 = vperm.xlu1 %5689, %v2440_v35   ;;  %v2442_v35 = vld [vmem:[%s7912_s2 + $0x20] sm:$0xff] }
 0x3c6   :  { %v1841_v63 = vmax.f32 %v1812_v26, 0.0  ;;  %v2439_v26 = vld [vmem:[%s7912_s2 + $0x8] sm:$0xff]  ;;  %2467 = vperm.xlu2 %5690, %v2442_v35   ;;  %v7093_v35 = vld [vmem:[%s7913_s10] ss:$0 sm:$0xff] }
 0x3c7   :  { %v1089_v5 = vpop.f32.mrf.mxu0  ;;  %2458 = vperm.xlu0 %5688, %v2439_v26   ;;  %v2448_v26 = vld [vmem:[%s7912_s2 + $0x50] sm:$0xff] }
 0x3c8   :  { %v1090_v7 = vadd.f32 %v7040_v2, %v1089_v5  ;;  %v1870_v8 = vpack.c.bf16 %v1841_v63, %v1840_v60  ;;  %v5464_v60 = vld [vmem:[#allocation16 + $0x8] sm:$0xff] }
 0x3c9   :  { %1346 = vmatpush.bf16.msrb.mxu2 %v5464_v60  ;;  %v2450_v60 = vld [vmem:[%s7912_s2 + $0x60] sm:$0xff] }
 0x3ca   :  { %v1116_v11 = vmax.f32 %v1090_v7, 0.0  ;;  %1949 = vmatmul.bf16.gmra.mxu0 %v1870_v8  ;;  %v2441_v8 = vld [vmem:[%s7912_s2 + $0x18] sm:$0xff] }
 0x3cb   :  { %v1814_v14 = vpop.f32.mrf.mxu3 }
 0x3cc   :  { %v1144_v13 = vpack.c.bf16 %v1116_v11, %v1115_v10  ;;  %v1815_v4 = vadd.f32 %v7045_v15, %v1814_v14  ;;  %v2444_v10 = vld [vmem:[%s7912_s2 + $0x30] sm:$0xff]  ;;  %v5494_v11 = vld [vmem:[#allocation20 + $0x38] sm:$0xff] }
 0x3cd   :  { %2464 = vperm.xlu1 %5689, %v2441_v8   ;;  %2067 = vmatpush.bf16.msra.mxu1 %v5494_v11 }
 0x3ce   :  { %1227 = vmatmul.bf16.gmra.mxu1 %v1144_v13  ;;  %v1842_v21 = vmax.f32 %v1815_v4, 0.0 }
 0x3cf   :  { %v1092_v61 = vpop.f32.mrf.mxu0  ;;  %2473 = vperm.xlu0 %5688, %v2444_v10  }
 0x3d0   :  { %v1093_v27 = vadd.f32 %v7040_v2, %v1092_v61 }
 0x3d2   :  { %v1117_v49 = vmax.f32 %v1093_v27, 0.0 }
 0x3d3   :  { %v1816_v16 = vpop.f32.mrf.mxu3 }
 0x3d4   :  { %v1817_v17 = vadd.f32 %v7045_v15, %v1816_v16 }
 0x3d6   :  { %v1843_v30 = vmax.f32 %v1817_v17, 0.0  ;;  %v5493_v17 = vld [vmem:[#allocation20 + $0x30] sm:$0xff] }
 0x3d7   :  { %v1094_v33 = vpop.f32.mrf.mxu0  ;;  %2068 = vmatpush.bf16.msra.mxu1 %v5493_v17  ;;  %2482 = vperm.xlu0 %5688, %v2447_v32   ;;  %v2443_v17 = vld [vmem:[%s7912_s2 + $0x28] sm:$0xff] }
 0x3d8   :  { %v1095_v40 = vadd.f32 %v7040_v2, %v1094_v33  ;;  %v1871_v46 = vpack.c.bf16 %v1843_v30, %v1842_v21  ;;  %v2445_v30 = vld [vmem:[%s7912_s2 + $0x38] sm:$0xff]  ;;  %v5492_v33 = vld [vmem:[#allocation20 + $0x28] sm:$0xff]  ;;  %2470 = vperm.xlu2 %5690, %v2443_v17  }
 0x3d9   :  { %2476 = vperm.xlu1 %5689, %v2445_v30  }
 0x3da   :  { %v1118_v54 = vmax.f32 %v1095_v40, 0.0  ;;  %1954 = vmatmul.bf16.gmra.mxu0 %v1871_v46  ;;  %v5463_v40 = vld [vmem:[#allocation16] sm:$0xff] }
 0x3db   :  { %v1819_v47 = vpop.f32.mrf.mxu3  ;;  %2069 = vmatpush.bf16.msra.mxu1 %v5492_v33  ;;  %1347 = vmatpush.bf16.msrb.mxu2 %v5463_v40  ;;  %v2446_v33 = vld [vmem:[%s7912_s2 + $0x40] sm:$0xff] }
 0x3dc   :  { %v1145_v56 = vpack.c.bf16 %v1118_v54, %v1117_v49  ;;  %v1820_v63 = vadd.f32 %v7045_v15, %v1819_v47  ;;  %v5491_v49 = vld [vmem:[#allocation20 + $0x20] sm:$0xff] }
 0x3de   :  { %1232 = vmatmul.bf16.gmra.mxu1 %v1145_v56  ;;  %v1844_v53 = vmax.f32 %v1820_v63, 0.0 }
 0x3df   :  { %v1097_v42 = vpop.f32.mrf.mxu0  ;;  %2070 = vmatpush.bf16.msra.mxu1 %v5491_v49  ;;  %2491 = vperm.xlu0 %5688, %v2450_v60  }
 0x3e0   :  { %v1098_v14 = vadd.f32 %v7040_v2, %v1097_v42  ;;  %v5490_v42 = vld [vmem:[#allocation20 + $0x18] sm:$0xff]  ;;  %2479 = vperm.xlu2 %5690, %v2446_v33  }
 0x3e1   :  { %2485 = vperm.xlu1 %5689, %v2448_v26   ;;  %v5499_v33 = vld [vmem:[#allocation2 + $0x20] sm:$0xff] }
 0x3e2   :  { %v1119_v18 = vmax.f32 %v1098_v14, 0.0 }
 0x3e3   :  { %v1821_v5 = vpop.f32.mrf.mxu3  ;;  %2071 = vmatpush.bf16.msra.mxu1 %v5490_v42  ;;  %v2452_v42 = vld [vmem:[%s7912_s2 + $0x70] sm:$0xff] }
 0x3e4   :  { %v1822_v7 = vadd.f32 %v7045_v15, %v1821_v5 }
 0x3e6   :  { %v1845_v13 = vmax.f32 %v1822_v7, 0.0 }
 0x3e7   :  { %v1099_v61 = vpop.f32.mrf.mxu0 }
 0x3e8   :  { %v1100_v4 = vadd.f32 %v7040_v2, %v1099_v61  ;;  %v1872_v16 = vpack.c.bf16 %v1845_v13, %v1844_v53  ;;  %v5489_v53 = vld [vmem:[#allocation20 + $0x10] sm:$0xff] }
 0x3e9   :  { %v5502_v61 = vld [vmem:[#allocation2 + $0x38] sm:$0xff]  ;;  %2072 = vmatpush.bf16.msra.mxu1 %v5489_v53 }
 0x3ea   :  { %v1120_v19 = vmax.f32 %v1100_v4, 0.0  ;;  %1959 = vmatmul.bf16.gmra.mxu0 %v1872_v16  ;;  %2622 = vmatpush.bf16.msra.mxu2 %v5502_v61 }
 0x3eb   :  { %v1824_v21 = vpop.f32.mrf.mxu3 }
 0x3ec   :  { %v1146_v27 = vpack.c.bf16 %v1120_v19, %v1119_v18  ;;  %v1825_v54 = vadd.f32 %v7045_v15, %v1824_v21  ;;  %v2451_v18 = vld [vmem:[%s7912_s2 + $0x68] sm:$0xff]  ;;  %v2453_v19 = vld [vmem:[%s7912_s2 + $0x78] sm:$0xff] }
 0x3ed   :  { %2494 = vperm.xlu1 %5689, %v2451_v18   ;;  %v5488_v21 = vld [vmem:[#allocation20 + $0x8] sm:$0xff]  ;;  %2500 = vperm.xlu0 %5688, %v2453_v19  }
 0x3ee   :  { %1237 = vmatmul.bf16.gmra.mxu1 %v1146_v27  ;;  %v1846_v63 = vmax.f32 %v1825_v54, 0.0  ;;  %v5501_v54 = vld [vmem:[#allocation2 + $0x30] sm:$0xff] }
 0x3ef   :  { %v1102_v46 = vpop.f32.mrf.mxu0  ;;  %2073 = vmatpush.bf16.msra.mxu1 %v5488_v21  ;;  %2623 = vmatpush.bf16.msra.mxu2 %v5501_v54 }
 0x3f0   :  { %v1103_v5 = vadd.f32 %v7040_v2, %v1102_v46 }
 0x3f2   :  { %v1121_v14 = vmax.f32 %v1103_v5, 0.0 }
 0x3f3   :  { %v1826_v47 = vpop.f32.mrf.mxu3 }
 0x3f4   :  { %v1827_v56 = vadd.f32 %v7045_v15, %v1826_v47 }
 0x3f6   :  { %v1847_v7 = vmax.f32 %v1827_v56, 0.0  ;;  %v2449_v56 = vld [vmem:[%s7912_s2 + $0x58] sm:$0xff] }
 0x3f7   :  { %v1104_v8 = vpop.f32.mrf.mxu0  ;;  %2488 = vperm.xlu2 %5690, %v2449_v56  }
 0x3f8   :  { %v1105_v10 = vadd.f32 %v7040_v2, %v1104_v8  ;;  %v1873_v11 = vpack.c.bf16 %v1847_v7, %v1846_v63  ;;  %v5487_v2 = vld [vmem:[#allocation20] sm:$0xff] }
 0x3f9   :  { %2074 = vmatpush.bf16.msra.mxu1 %v5487_v2 }
 0x3fa   :  { %v1122_v13 = vmax.f32 %v1105_v10, 0.0  ;;  %1964 = vmatmul.bf16.gmra.mxu0 %v1873_v11  ;;  %v7099_v10 = vld [vmem:[%s7914_s30] ss:$0 sm:$0xff]  ;;  %v5500_v11 = vld [vmem:[#allocation2 + $0x28] sm:$0xff] }
 0x3fb   :  { %v1829_v4 = vpop.f32.mrf.mxu3  ;;  %2624 = vmatpush.bf16.msra.mxu2 %v5500_v11  ;;  %v5498_v11 = vld [vmem:[#allocation2 + $0x18] sm:$0xff] }
 0x3fc   :  { %v1147_v16 = vpack.c.bf16 %v1122_v13, %v1121_v14  ;;  %v1830_v27 = vadd.f32 %v7045_v15, %v1829_v4 }
 0x3fe   :  { %1242 = vmatmul.bf16.gmra.mxu1 %v1147_v16  ;;  %v1848_v40 = vmax.f32 %v1830_v27, 0.0 }
 0x3ff   :  { %2497 = vperm.xlu2 %5690, %v2452_v42   ;;  %2625 = vmatpush.bf16.msra.mxu2 %v5499_v33  ;;  %v5497_v33 = vld [vmem:[#allocation2 + $0x10] sm:$0xff] }
 0x403   :  { %v1831_v30 = vpop.f32.mrf.mxu3  ;;  %2626 = vmatpush.bf16.msra.mxu2 %v5498_v11  ;;  %v5496_v11 = vld [vmem:[#allocation2 + $0x8] sm:$0xff] }
 0x404   :  { %v1832_v32 = vadd.f32 %v7045_v15, %v1831_v30 }
 0x406   :  { %v1849_v46 = vmax.f32 %v1832_v32, 0.0 }
 0x407   :  { %2627 = vmatpush.bf16.msra.mxu2 %v5497_v33  ;;  %v5495_v33 = vld [vmem:[#allocation2] sm:$0xff] }
 0x408   :  { %v1874_v49 = vpack.c.bf16 %v1849_v46, %v1848_v40 }
 0x40a   :  { %1969 = vmatmul.bf16.gmra.mxu0 %v1874_v49 }
 0x40b   :  { %v1208_v47 = vpop.f32.mrf.mxu1  ;;  %2628 = vmatpush.bf16.msra.mxu2 %v5496_v11 }
 0x40c   :  { %v1209_v26 = vadd.f32 %v7093_v35, %v1208_v47 }
 0x40e   :  { %v1248_v63 = vmax.f32 %v1209_v26, 0.0 }
 0x40f   :  { %2629 = vmatpush.bf16.msra.mxu2 %v5495_v33  ;;  %v2436_v33 = vlaneseq }
 0x413   :  { %v1210_v60 = vpop.f32.mrf.mxu1 }
 0x414   :  { %v1211_v15 = vadd.f32 %v7093_v35, %v1210_v60 }
 0x416   :  { %v1249_v5 = vmax.f32 %v1211_v15, 0.0 }
 0x417   :  { %v1935_v7 = vpop.f32.mrf.mxu0 }
 0x418   :  { %v1281_v8 = vpack.c.bf16 %v1249_v5, %v1248_v63  ;;  %v1936_v14 = vadd.f32 %v7099_v10, %v1935_v7 }
 0x41a   :  { %1348 = vmatmul.bf16.vlgmr.msrb.gmra.mxu2 %v1281_v8  ;;  %v1975_v4 = vmax.f32 %v1936_v14, 0.0 }
 0x41b   :  { %v1213_v53 = vpop.f32.mrf.mxu1 }
 0x41c   :  { %v1214_v16 = vadd.f32 %v7093_v35, %v1213_v53 }
 0x41e   :  { %v1250_v2 = vmax.f32 %v1214_v16, 0.0 }
 0x41f   :  { %v1937_v13 = vpop.f32.mrf.mxu0 }
 0x420   :  { %v1938_v61 = vadd.f32 %v7099_v10, %v1937_v13 }
 0x422   :  { %v1976_v17 = vmax.f32 %v1938_v61, 0.0 }
 0x423   :  { %v1215_v18 = vpop.f32.mrf.mxu1 }
 0x424   :  { %v2008_v19 = vpack.c.bf16 %v1976_v17, %v1975_v4  ;;  %v1216_v21 = vadd.f32 %v7093_v35, %v1215_v18 }
 0x426   :  { %v1251_v27 = vmax.f32 %v1216_v21, 0.0  ;;  %2075 = vmatmul.bf16.vlgmr.msra.gmra.mxu1 %v2008_v19 }
 0x427   :  { %v1940_v30 = vpop.f32.mrf.mxu0 }
 0x428   :  { %v1282_v32 = vpack.c.bf16 %v1251_v27, %v1250_v2  ;;  %v1941_v46 = vadd.f32 %v7099_v10, %v1940_v30 }
 0x42a   :  { %1353 = vmatmul.bf16.gmra.mxu2 %v1282_v32  ;;  %v1977_v47 = vmax.f32 %v1941_v46, 0.0 }
 0x42b   :  { %v1218_v40 = vpop.f32.mrf.mxu1 }
 0x42c   :  { %v1219_v56 = vadd.f32 %v7093_v35, %v1218_v40 }
 0x42e   :  { %v1252_v63 = vmax.f32 %v1219_v56, 0.0 }
 0x42f   :  { %v1942_v49 = vpop.f32.mrf.mxu0 }
 0x430   :  { %v1943_v54 = vadd.f32 %v7099_v10, %v1942_v49 }
 0x432   :  { %v1978_v26 = vmax.f32 %v1943_v54, 0.0 }
 0x433   :  { %v1220_v60 = vpop.f32.mrf.mxu1 }
 0x434   :  { %v1221_v15 = vadd.f32 %v7093_v35, %v1220_v60  ;;  %v2009_v42 = vpack.c.bf16 %v1978_v26, %v1977_v47 }
 0x436   :  { %v1253_v5 = vmax.f32 %v1221_v15, 0.0  ;;  %2080 = vmatmul.bf16.gmra.mxu1 %v2009_v42 }
 0x437   :  { %v1945_v7 = vpop.f32.mrf.mxu0 }
 0x438   :  { %v1283_v8 = vpack.c.bf16 %v1253_v5, %v1252_v63  ;;  %v1946_v14 = vadd.f32 %v7099_v10, %v1945_v7 }
 0x43a   :  { %1358 = vmatmul.bf16.gmra.mxu2 %v1283_v8  ;;  %v1979_v4 = vmax.f32 %v1946_v14, 0.0 }
 0x43b   :  { %v1223_v53 = vpop.f32.mrf.mxu1 }
 0x43c   :  { %v1224_v16 = vadd.f32 %v7093_v35, %v1223_v53 }
 0x43e   :  { %v1254_v2 = vmax.f32 %v1224_v16, 0.0 }
 0x43f   :  { %v1947_v13 = vpop.f32.mrf.mxu0 }
 0x440   :  { %v1948_v61 = vadd.f32 %v7099_v10, %v1947_v13 }
 0x442   :  { %v1980_v17 = vmax.f32 %v1948_v61, 0.0 }
 0x443   :  { %v1225_v18 = vpop.f32.mrf.mxu1 }
 0x444   :  { %v1226_v19 = vadd.f32 %v7093_v35, %v1225_v18  ;;  %v2010_v21 = vpack.c.bf16 %v1980_v17, %v1979_v4 }
 0x446   :  { %v1255_v27 = vmax.f32 %v1226_v19, 0.0  ;;  %2085 = vmatmul.bf16.gmra.mxu1 %v2010_v21 }
 0x447   :  { %v1950_v30 = vpop.f32.mrf.mxu0 }
 0x448   :  { %v1284_v32 = vpack.c.bf16 %v1255_v27, %v1254_v2  ;;  %v1951_v46 = vadd.f32 %v7099_v10, %v1950_v30 }
 0x44a   :  { %1363 = vmatmul.bf16.gmra.mxu2 %v1284_v32  ;;  %v1981_v47 = vmax.f32 %v1951_v46, 0.0 }
 0x44b   :  { %v1228_v40 = vpop.f32.mrf.mxu1 }
 0x44c   :  { %v1229_v56 = vadd.f32 %v7093_v35, %v1228_v40 }
 0x44e   :  { %v1256_v63 = vmax.f32 %v1229_v56, 0.0 }
 0x44f   :  { %v1952_v49 = vpop.f32.mrf.mxu0 }
 0x450   :  { %v1953_v54 = vadd.f32 %v7099_v10, %v1952_v49 }
 0x452   :  { %v1982_v26 = vmax.f32 %v1953_v54, 0.0 }
 0x453   :  { %v1230_v60 = vpop.f32.mrf.mxu1 }
 0x454   :  { %v1231_v15 = vadd.f32 %v7093_v35, %v1230_v60  ;;  %v2011_v42 = vpack.c.bf16 %v1982_v26, %v1981_v47 }
 0x456   :  { %v1257_v5 = vmax.f32 %v1231_v15, 0.0  ;;  %2090 = vmatmul.bf16.gmra.mxu1 %v2011_v42 }
 0x457   :  { %v1955_v7 = vpop.f32.mrf.mxu0 }
 0x458   :  { %v1285_v8 = vpack.c.bf16 %v1257_v5, %v1256_v63  ;;  %v1956_v14 = vadd.f32 %v7099_v10, %v1955_v7 }
 0x45a   :  { %1368 = vmatmul.bf16.gmra.mxu2 %v1285_v8  ;;  %v1983_v4 = vmax.f32 %v1956_v14, 0.0 }
 0x45b   :  { %v1233_v53 = vpop.f32.mrf.mxu1 }
 0x45c   :  { %v1234_v16 = vadd.f32 %v7093_v35, %v1233_v53 }
 0x45e   :  { %v1258_v2 = vmax.f32 %v1234_v16, 0.0 }
 0x45f   :  { %v1957_v13 = vpop.f32.mrf.mxu0 }
 0x460   :  { %v1958_v61 = vadd.f32 %v7099_v10, %v1957_v13 }
 0x462   :  { %v1984_v17 = vmax.f32 %v1958_v61, 0.0 }
 0x463   :  { %v1235_v18 = vpop.f32.mrf.mxu1 }
 0x464   :  { %v1236_v19 = vadd.f32 %v7093_v35, %v1235_v18  ;;  %v2012_v21 = vpack.c.bf16 %v1984_v17, %v1983_v4 }
 0x466   :  { %v1259_v27 = vmax.f32 %v1236_v19, 0.0  ;;  %2095 = vmatmul.bf16.gmra.mxu1 %v2012_v21 }
 0x467   :  { %v1960_v30 = vpop.f32.mrf.mxu0 }
 0x468   :  { %v1286_v32 = vpack.c.bf16 %v1259_v27, %v1258_v2  ;;  %v1961_v46 = vadd.f32 %v7099_v10, %v1960_v30 }
 0x46a   :  { %1373 = vmatmul.bf16.gmra.mxu2 %v1286_v32  ;;  %v1985_v47 = vmax.f32 %v1961_v46, 0.0  ;;  %v2456_v32 = vpop.permute.xlu0 %2455 }
 0x46b   :  { %v1238_v40 = vpop.f32.mrf.mxu1 }
 0x46c   :  { %v1239_v56 = vadd.f32 %v7093_v35, %v1238_v40 }
 0x46e   :  { %v1260_v63 = vmax.f32 %v1239_v56, 0.0 }
 0x46f   :  { %v1962_v49 = vpop.f32.mrf.mxu0 }
 0x470   :  { %v1963_v54 = vadd.f32 %v7099_v10, %v1962_v49 }
 0x472   :  { %v1986_v26 = vmax.f32 %v1963_v54, 0.0  ;;  %v7131_v54 = vand.u32 127, %v2436_v33 }
 0x473   :  { %v1240_v60 = vpop.f32.mrf.mxu1 }
 0x474   :  { %v1241_v15 = vadd.f32 %v7093_v35, %v1240_v60  ;;  %v2013_v42 = vpack.c.bf16 %v1986_v26, %v1985_v47  ;;  %v2459_v26 = vpop.permute.xlu0 %2458  ;;  %vm2502_vm0 = vcmp.eq.s32.totalorder %v7131_v54, %v2456_v32  ;;  %v6511_v60 = vmov 1.0|1.0  }
 0x475   :  { %vm2503_vm1 = vcmp.eq.s32.totalorder %v7131_v54, %v2459_v26 }
 0x476   :  { %v1261_v5 = vmax.f32 %v1241_v15, 0.0  ;;  %2100 = vmatmul.bf16.gmra.mxu1 %v2013_v42  ;;  %vm4999_vm2 = vmpackc.low %vm2503_vm1, %vm2502_vm0  ;;  %v7137_v15 = vld [vmem:[%s7915_s29] ss:$0 sm:$0xff]  ;;  %v2462_v42 = vpop.permute.xlu1 %2461 }
 0x477   :  { %v1965_v7 = vpop.f32.mrf.mxu0  ;;  %vm2504_vm3 = vcmp.eq.s32.totalorder %v7131_v54, %v2462_v42 }
 0x478   :  { %v1287_v8 = vpack.c.bf16 %v1261_v5, %v1260_v63  ;;  %v1966_v53 = vadd.f32 %v7099_v10, %v1965_v7  ;;  %v7141_v7 = vld [vmem:[%s7916_s16] ss:$0 sm:$0xff] }
 0x47a   :  { %1378 = vmatmul.bf16.gmra.mxu2 %v1287_v8  ;;  %v1987_v61 = vmax.f32 %v1966_v53, 0.0 }
 0x47b   :  { %v1243_v11 = vpop.f32.mrf.mxu1 }
 0x47c   :  { %v1244_v4 = vadd.f32 %v7093_v35, %v1243_v11 }
 0x47e   :  { %v1262_v21 = vmax.f32 %v1244_v4, 0.0  ;;  %v2465_v53 = vpop.permute.xlu1 %2464 }
 0x47f   :  { %v1967_v14 = vpop.f32.mrf.mxu0  ;;  %vm2505_vm4 = vcmp.eq.s32.totalorder %v7131_v54, %v2465_v53 }
 0x480   :  { %v1968_v13 = vadd.f32 %v7099_v10, %v1967_v14  ;;  %vm5001_vm5 = vmpackc.low %vm2505_vm4, %vm2504_vm3 }
 0x482   :  { %v1988_v16 = vmax.f32 %v1968_v13, 0.0  ;;  %v5510_v13 = vld [vmem:[#allocation22 + $0x38] sm:$0xff] }
 0x483   :  { %v1245_v17 = vpop.f32.mrf.mxu1  ;;  %2747 = vmatpush.bf16.msrb.mxu3 %v5510_v13 }
 0x484   :  { %v1246_v18 = vadd.f32 %v7093_v35, %v1245_v17  ;;  %v2014_v19 = vpack.c.bf16 %v1988_v16, %v1987_v61 }
 0x486   :  { %v1263_v2 = vmax.f32 %v1246_v18, 0.0  ;;  %2105 = vmatmul.bf16.gmra.mxu1 %v2014_v19  ;;  %v2468_v19 = vpop.permute.xlu2 %2467 }
 0x487   :  { %v1970_v27 = vpop.f32.mrf.mxu0  ;;  %vm2506_vm6 = vcmp.eq.s32.totalorder %v7131_v54, %v2468_v19 }
 0x488   :  { %v1288_v30 = vpack.c.bf16 %v1263_v2, %v1262_v21  ;;  %v1971_v40 = vadd.f32 %v7099_v10, %v1970_v27 }
 0x48a   :  { %1383 = vmatmul.bf16.gmra.mxu2 %v1288_v30  ;;  %v1989_v47 = vmax.f32 %v1971_v40, 0.0 }
 0x48e   :  { %v2471_v42 = vpop.permute.xlu2 %2470 }
 0x48f   :  { %v1972_v46 = vpop.f32.mrf.mxu0  ;;  %vm2507_vm7 = vcmp.eq.s32.totalorder %v7131_v54, %v2471_v42 }
 0x490   :  { %v1973_v49 = vadd.f32 %v7099_v10, %v1972_v46  ;;  %vm7164_vm9 = vmpackc.low %vm2507_vm7, %vm2506_vm6 }
 0x492   :  { %v1990_v35 = vmax.f32 %v1973_v49, 0.0 }
 0x494   :  { %v2015_v56 = vpack.c.bf16 %v1990_v35, %v1989_v47 }
 0x496   :  { %2110 = vmatmul.bf16.gmra.mxu1 %v2015_v56 }
 0x49a   :  { %5000 = vmatmul.msk.bf16.vlgmr.msra.gmra.mxu2 %vm4999_vm2, %v6511_v60 }
 0x49d   :  { %v1349_v10 = vpop.f32.mrf.mxu2 }
 0x49e   :  { %v1350_v63 = vadd.f32 %v7137_v15, %v1349_v10 }
 0x4a0   :  { %v4823_v5 = vmul.f32 -1.442695, %v1350_v63 }
 0x4a2   :  { %5704 = vpow2.f32 %v4823_v5 }
 0x4a3   :  { %v2076_v8 = vpop.f32.mrf.mxu1 }
 0x4a4   :  { %v2077_v11 = vadd.f32 %v7141_v7, %v2076_v8 }
 0x4a5   :  { %v1351_v14 = vpop.f32.mrf.mxu2 }
 0x4a6   :  { %v4935_v61 = vmul.f32 -1.442695, %v2077_v11  ;;  %v1352_v4 = vadd.f32 %v7137_v15, %v1351_v14 }
 0x4a8   :  { %v5705_v16 = vpop.eup %5704  ;;  %5706 = vpow2.f32 %v4935_v61  ;;  %v4824_v17 = vmul.f32 -1.442695, %v1352_v4 }
 0x4a9   :  { %v1437_v18 = vadd.f32 1.0, %v5705_v16 }
 0x4aa   :  { %5708 = vpow2.f32 %v4824_v17  ;;  %5002 = vmatmul.msk.bf16.gmra.mxu2 %vm5001_vm5, %v6511_v60 }
 0x4ab   :  { %5710 = vrcp.f32 %v1437_v18  ;;  %v2078_v21 = vpop.f32.mrf.mxu1  ;;  %v1462_v63 = vand.u32 2147483647, %v1437_v18  ;;  %v1464_v5 = vand.u32 2147483648, %v1437_v18  ;;  %vm1458_vm10 = vweird.f32 %v1437_v18 }
 0x4ac   :  { %v2079_v2 = vadd.f32 %v7141_v7, %v2078_v21 }
 0x4ad   :  { %v1354_v27 = vpop.f32.mrf.mxu2  ;;  %vm1463_vm12 = vcmp.eq.f32.partialorder %v1462_v63, 8.507059e+37 }
 0x4ae   :  { %v5707_v30 = vpop.eup %5706  ;;  %v4936_v32 = vmul.f32 -1.442695, %v2079_v2  ;;  %v1355_v33 = vadd.f32 %v7137_v15, %v1354_v27 }
 0x4af   :  { %v7150_v40 = vadd.f32 1.0, %v5707_v30  ;;  %v5509_v30 = vld [vmem:[#allocation22 + $0x30] sm:$0xff] }
 0x4b0   :  { %v5709_v46 = vpop.eup %5708  ;;  %5712 = vpow2.f32 %v4936_v32  ;;  %v4825_v49 = vmul.f32 -1.442695, %v1355_v33  ;;  %v1465_v32 = vor.u32 1.1754944e-38, %v1464_v5  ;;  %2748 = vmatpush.bf16.msrb.mxu3 %v5509_v30  ;;  %v7178_v5 = vpop.permute.xlu0 %2473 }
 0x4b1   :  { %v5711_v47 = vpop.eup %5710  ;;  %5714 = vrcp.f32 %v7150_v40  ;;  %v7153_v56 = vadd.f32 1.0, %v5709_v46  ;;  %v2189_v19 = vand.u32 2147483647, %v7150_v40  ;;  %v2191_v42 = vand.u32 2147483648, %v7150_v40 }
 0x4b2   :  { %v1454_v35 = vmul.f32 %v5711_v47, %v1437_v18  ;;  %5716 = vpow2.f32 %v4825_v49  ;;  %vm1459_vm8 = vweird.f32 %v5711_v47  ;;  %vm2185_vm14 = vweird.f32 %v7150_v40 }
 0x4b3   :  { %v2081_v26 = vpop.f32.mrf.mxu1  ;;  %5718 = vrcp.f32 %v7153_v56  ;;  %vm1460_vm11 = vmor %vm1458_vm10, %vm1459_vm8  ;;  %vm2508_vm15 = vcmp.eq.s32.totalorder %v7131_v54, %v7178_v5  ;;  %vm2190_vm2 = vcmp.eq.f32.partialorder %v2189_v19, 8.507059e+37  ;;  %vm1473_vm4 = vweird.f32 %v7153_v56 }
 0x4b4   :  { %v1455_v10 = vsub.f32 1.0, %v1454_v35  ;;  %v2082_v8 = vadd.f32 %v7141_v7, %v2081_v26 }
 0x4b5   :  { %v1356_v11 = vpop.f32.mrf.mxu2 }
 0x4b6   :  { %v5713_v53 = vpop.eup %5712  ;;  %v1456_v14 = vmul.f32 %v5711_v47, %v1455_v10  ;;  %v1357_v13 = vadd.f32 %v7137_v15, %v1356_v11  ;;  %v4937_v16 = vmul.f32 -1.442695, %v2082_v8  ;;  %v7181_v8 = vpop.permute.xlu1 %2476 }
 0x4b7   :  { %v5715_v61 = vpop.eup %5714  ;;  %v7160_v4 = vadd.f32 1.0, %v5713_v53  ;;  %v1477_v53 = vand.u32 2147483647, %v7153_v56  ;;  %vm2509_vm0 = vcmp.eq.s32.totalorder %v7131_v54, %v7181_v8 }
 0x4b8   :  { %v5717_v17 = vpop.eup %5716  ;;  %v1457_v2 = vadd.f32 %v5711_v47, %v1456_v14  ;;  %v2181_v27 = vmul.f32 %v5715_v61, %v7150_v40  ;;  %v4826_v33 = vmul.f32 -1.442695, %v1357_v13  ;;  %vm2186_vm13 = vweird.f32 %v5715_v61 }
 0x4b9   :  { %5720 = vrcp.f32 %v7160_v4  ;;  %v5719_v46 = vpop.eup %5718  ;;  %v7170_v26 = vadd.f32 1.0, %v5717_v17  ;;  %vm2187_vm1 = vmor %vm2185_vm14, %vm2186_vm13  ;;  %v2192_v40 = vor.u32 1.1754944e-38, %v2191_v42  ;;  %vm1478_vm6 = vcmp.eq.f32.partialorder %v1477_v53, 8.507059e+37 }
 0x4ba   :  { %v1461_v49 = vsel %vm1460_vm11, %v5711_v47, %v1457_v2  ;;  %v2182_v35 = vsub.f32 1.0, %v2181_v27  ;;  %5722 = vpow2.f32 %v4937_v16  ;;  %5004 = vmatmul.msk.bf16.gmra.mxu2 %vm7164_vm9, %v6511_v60  ;;  %v1469_v10 = vmul.f32 %v5719_v46, %v7153_v56  ;;  %vm5005_vm13 = vmpackc.low %vm2509_vm0, %vm2508_vm15 }
 0x4bb   :  { %v1466_v18 = vsel %vm1463_vm12, %v1465_v32, %v1461_v49  ;;  %v2083_v63 = vpop.f32.mrf.mxu1  ;;  %5724 = vrcp.f32 %v7170_v26  ;;  %v1479_v16 = vand.u32 2147483648, %v7153_v56  ;;  %vm1474_vm3 = vweird.f32 %v5719_v46 }
 0x4bc   :  { %1693 = vst [vmem:[#allocation32] sm:$0xff] %v1466_v18  ;;  %v2183_v47 = vmul.f32 %v5715_v61, %v2182_v35  ;;  %v1470_v11 = vsub.f32 1.0, %v1469_v10  ;;  %5726 = vpow2.f32 %v4826_v33  ;;  %v2084_v17 = vadd.f32 %v7141_v7, %v2083_v63  ;;  %vm1475_vm5 = vmor %vm1473_vm4, %vm1474_vm3 }
 0x4bd   :  { %v1359_v14 = vpop.f32.mrf.mxu2  ;;  %v1480_v19 = vor.u32 1.1754944e-38, %v1479_v16  ;;  %vm2200_vm8 = vweird.f32 %v7160_v4  ;;  %vm1488_vm12 = vweird.f32 %v7170_v26 }
 0x4be   :  { %v2184_v13 = vadd.f32 %v5715_v61, %v2183_v47  ;;  %v1360_v21 = vadd.f32 %v7137_v15, %v1359_v14  ;;  %v1471_v27 = vmul.f32 %v5719_v46, %v1470_v11  ;;  %v4938_v49 = vmul.f32 -1.442695, %v2084_v17 }
 0x4bf   :  { %v5721_v2 = vpop.eup %5720 }
 0x4c0   :  { %v5723_v30 = vpop.eup %5722  ;;  %v2188_v32 = vsel %vm2187_vm1, %v5715_v61, %v2184_v13  ;;  %v2196_v33 = vmul.f32 %v5721_v2, %v7160_v4  ;;  %v1472_v18 = vadd.f32 %v5719_v46, %v1471_v27  ;;  %v4827_v63 = vmul.f32 -1.442695, %v1360_v21 }
 0x4c1   :  { %v2193_v35 = vsel %vm2190_vm2, %v2192_v40, %v2188_v32  ;;  %v7195_v10 = vadd.f32 1.0, %v5723_v30  ;;  %v5725_v47 = vpop.eup %5724  ;;  %5728 = vpow2.f32 %v4938_v49  ;;  %v2206_v61 = vand.u32 2147483648, %v7160_v4 }
 0x4c2   :  { %2420 = vst [vmem:[#allocation35] sm:$0xff] %v2193_v35  ;;  %v2197_v42 = vsub.f32 1.0, %v2196_v33  ;;  %v5727_v11 = vpop.eup %5726  ;;  %v1476_v14 = vsel %vm1475_vm5, %v5719_v46, %v1472_v18  ;;  %v1484_v56 = vmul.f32 %v5725_v47, %v7170_v26  ;;  %vm2201_vm7 = vweird.f32 %v5721_v2 }
 0x4c3   :  { %5730 = vrcp.f32 %v7195_v10  ;;  %v2086_v13 = vpop.f32.mrf.mxu1  ;;  %v1481_v17 = vsel %vm1478_vm6, %v1480_v19, %v1476_v14  ;;  %v2204_v21 = vand.u32 2147483647, %v7160_v4  ;;  %v7202_v16 = vadd.f32 1.0, %v5727_v11  ;;  %vm2202_vm9 = vmor %vm2200_vm8, %vm2201_vm7 }
 0x4c4   :  { %v2198_v40 = vmul.f32 %v5721_v2, %v2197_v42  ;;  %1694 = vst [vmem:[#allocation32 + $0x8] sm:$0xff] %v1481_v17  ;;  %v1485_v53 = vsub.f32 1.0, %v1484_v56  ;;  %5732 = vpow2.f32 %v4827_v63  ;;  %v1492_v30 = vand.u32 2147483647, %v7170_v26  ;;  %v5508_v17 = vld [vmem:[#allocation22 + $0x28] sm:$0xff] }
 0x4c5   :  { %v1361_v46 = vpop.f32.mrf.mxu2  ;;  %v1494_v32 = vand.u32 2147483648, %v7170_v26  ;;  %v2087_v33 = vadd.f32 %v7141_v7, %v2086_v13  ;;  %v2207_v49 = vor.u32 1.1754944e-38, %v2206_v61  ;;  %vm1489_vm10 = vweird.f32 %v5725_v47  ;;  %2749 = vmatpush.bf16.msrb.mxu3 %v5508_v17 }
 0x4c6   :  { %v2199_v27 = vadd.f32 %v5721_v2, %v2198_v40  ;;  %v1486_v35 = vmul.f32 %v5725_v47, %v1485_v53  ;;  %5734 = vrcp.f32 %v7202_v16  ;;  %vm2205_vm11 = vcmp.eq.f32.partialorder %v2204_v21, 8.507059e+37  ;;  %vm1490_vm14 = vmor %vm1488_vm12, %vm1489_vm10  ;;  %v2480_v21 = vpop.permute.xlu2 %2479 }
 0x4c7   :  { %v5729_v18 = vpop.eup %5728  ;;  %v1362_v63 = vadd.f32 %v7137_v15, %v1361_v46  ;;  %v4939_v61 = vmul.f32 -1.442695, %v2087_v33  ;;  %vm1493_vm1 = vcmp.eq.f32.partialorder %v1492_v30, 8.507059e+37  ;;  %v2219_v5 = vand.u32 2147483647, %v7195_v10  ;;  %v2483_v33 = vpop.permute.xlu0 %2482 }
 0x4c8   :  { %v2203_v4 = vsel %vm2202_vm9, %v5721_v2, %v2199_v27  ;;  %v1487_v11 = vadd.f32 %v5725_v47, %v1486_v35  ;;  %v7216_v14 = vadd.f32 1.0, %v5729_v18  ;;  %v1495_v2 = vor.u32 1.1754944e-38, %v1494_v32 }
 0x4c9   :  { %v5731_v19 = vpop.eup %5730  ;;  %v2208_v42 = vsel %vm2205_vm11, %v2207_v49, %v2203_v4  ;;  %v2221_v8 = vand.u32 2147483648, %v7195_v10  ;;  %v4828_v30 = vmul.f32 -1.442695, %v1362_v63  ;;  %vm2510_vm15 = vcmp.eq.s32.totalorder %v7131_v54, %v2480_v21 }
 0x4ca   :  { %2421 = vst [vmem:[#allocation35 + $0x8] sm:$0xff] %v2208_v42  ;;  %v2211_v26 = vmul.f32 %v5731_v19, %v7195_v10  ;;  %5006 = vmatmul.msk.bf16.gmra.mxu2 %vm5005_vm13, %v6511_v60  ;;  %v5733_v56 = vpop.eup %5732  ;;  %v1491_v13 = vsel %vm1490_vm14, %v5725_v47, %v1487_v11  ;;  %5736 = vrcp.f32 %v7216_v14  ;;  %vm2511_vm0 = vcmp.eq.s32.totalorder %v7131_v54, %v2483_v33 }
 0x4cb   :  { %v2088_v40 = vpop.f32.mrf.mxu1  ;;  %v1496_v53 = vsel %vm1493_vm1, %v1495_v2, %v1491_v13  ;;  %v7223_v27 = vadd.f32 1.0, %v5733_v56  ;;  %5738 = vpow2.f32 %v4939_v61  ;;  %vm2216_vm2 = vweird.f32 %v5731_v19  ;;  %vm7260_vm13 = vmpackc.low %vm2511_vm0, %vm2510_vm15 }
 0x4cc   :  { %v2212_v46 = vsub.f32 1.0, %v2211_v26  ;;  %v5735_v32 = vpop.eup %5734  ;;  %1695 = vst [vmem:[#allocation32 + $0x10] sm:$0xff] %v1496_v53  ;;  %v2089_v47 = vadd.f32 %v7141_v7, %v2088_v40  ;;  %vm2215_vm3 = vweird.f32 %v7195_v10  ;;  %vm7230_vm4 = vcmp.eq.f32.partialorder %v2219_v5, 8.507059e+37 }
 0x4cd   :  { %v1364_v49 = vpop.f32.mrf.mxu2  ;;  %v1499_v18 = vmul.f32 %v5735_v32, %v7202_v16  ;;  %v2222_v63 = vor.u32 1.1754944e-38, %v2221_v8  ;;  %5740 = vrcp.f32 %v7223_v27  ;;  %vm2217_vm5 = vmor %vm2215_vm3, %vm2216_vm2  ;;  %vm1503_vm6 = vweird.f32 %v7202_v16 }
 0x4ce   :  { %v2213_v35 = vmul.f32 %v5731_v19, %v2212_v46  ;;  %5742 = vpow2.f32 %v4828_v30  ;;  %v4940_v61 = vmul.f32 -1.442695, %v2089_v47  ;;  %v1507_v26 = vand.u32 2147483647, %v7202_v16 }
 0x4cf   :  { %v1500_v11 = vsub.f32 1.0, %v1499_v18  ;;  %v1509_v56 = vand.u32 2147483648, %v7202_v16  ;;  %v1365_v10 = vadd.f32 %v7137_v15, %v1364_v49  ;;  %vm1504_vm7 = vweird.f32 %v5735_v32  ;;  %v2486_v16 = vpop.permute.xlu1 %2485 }
 0x4d0   :  { %v2214_v42 = vadd.f32 %v5731_v19, %v2213_v35  ;;  %v5737_v2 = vpop.eup %5736  ;;  %v2234_v53 = vand.u32 2147483647, %v7216_v14  ;;  %5744 = vpow2.f32 %v4940_v61  ;;  %v2236_v18 = vand.u32 2147483648, %v7216_v14  ;;  %vm1505_vm8 = vmor %vm1503_vm6, %vm1504_vm7 }
 0x4d1   :  { %v1501_v5 = vmul.f32 %v5735_v32, %v1500_v11  ;;  %v2226_v8 = vmul.f32 %v5737_v2, %v7216_v14  ;;  %v5739_v17 = vpop.eup %5738  ;;  %v4829_v46 = vmul.f32 -1.442695, %v1365_v10  ;;  %vm1508_vm9 = vcmp.eq.f32.partialorder %v1507_v26, 8.507059e+37 }
 0x4d2   :  { %v2218_v13 = vsel %vm2217_vm5, %v5731_v19, %v2214_v42  ;;  %v7244_v49 = vadd.f32 1.0, %v5739_v17  ;;  %v1510_v42 = vor.u32 1.1754944e-38, %v1509_v56  ;;  %vm2231_vm10 = vweird.f32 %v5737_v2 }
 0x4d3   :  { %v2223_v40 = vsel %vm7230_vm4, %v2222_v63, %v2218_v13  ;;  %v2091_v30 = vpop.f32.mrf.mxu1  ;;  %v1502_v47 = vadd.f32 %v5735_v32, %v1501_v5  ;;  %v2227_v35 = vsub.f32 1.0, %v2226_v8  ;;  %v5741_v19 = vpop.eup %5740  ;;  %5746 = vpow2.f32 %v4829_v46 }
 0x4d4   :  { %2422 = vst [vmem:[#allocation35 + $0x10] sm:$0xff] %v2223_v40  ;;  %v2092_v4 = vadd.f32 %v7141_v7, %v2091_v30  ;;  %v5743_v11 = vpop.eup %5742  ;;  %v1514_v13 = vmul.f32 %v5741_v19, %v7223_v27  ;;  %vm2230_vm11 = vweird.f32 %v7216_v14  ;;  %vm7251_vm12 = vcmp.eq.f32.partialorder %v2234_v53, 8.507059e+37 }
 0x4d5   :  { %v1366_v63 = vpop.f32.mrf.mxu2  ;;  %v1506_v61 = vsel %vm1505_vm8, %v5735_v32, %v1502_v47  ;;  %v2228_v10 = vmul.f32 %v5737_v2, %v2227_v35  ;;  %5748 = vrcp.f32 %v7244_v49  ;;  %v2237_v26 = vor.u32 1.1754944e-38, %v2236_v18  ;;  %vm2232_vm14 = vmor %vm2230_vm11, %vm2231_vm10 }
 0x4d6   :  { %v1511_v5 = vsel %vm1508_vm9, %v1510_v42, %v1506_v61  ;;  %v1515_v56 = vsub.f32 1.0, %v1514_v13  ;;  %v7264_v17 = vadd.f32 1.0, %v5743_v11  ;;  %v5745_v14 = vpop.eup %5744  ;;  %vm1519_vm1 = vweird.f32 %v5741_v19 }
 0x4d7   :  { %1696 = vst [vmem:[#allocation32 + $0x18] sm:$0xff] %v1511_v5  ;;  %v2229_v32 = vadd.f32 %v5737_v2, %v2228_v10  ;;  %v1522_v40 = vand.u32 2147483647, %v7223_v27  ;;  %v1524_v53 = vand.u32 2147483648, %v7223_v27  ;;  %v4941_v21 = vmul.f32 -1.442695, %v2092_v4  ;;  %v7281_v10 = vpop.permute.xlu2 %2488 }
 0x4d8   :  { %v1516_v33 = vmul.f32 %v5741_v19, %v1515_v56  ;;  %5750 = vrcp.f32 %v7264_v17  ;;  %v1367_v30 = vadd.f32 %v7137_v15, %v1366_v63  ;;  %vm1518_vm15 = vweird.f32 %v7223_v27  ;;  %v5507_v63 = vld [vmem:[#allocation22 + $0x20] sm:$0xff] }
 0x4d9   :  { %v2233_v46 = vsel %vm2232_vm14, %v5737_v2, %v2229_v32  ;;  %v5747_v47 = vpop.eup %5746  ;;  %v2249_v18 = vand.u32 2147483647, %v7244_v49  ;;  %v7277_v4 = vadd.f32 1.0, %v5745_v14  ;;  %5752 = vpow2.f32 %v4941_v21  ;;  %vm1520_vm0 = vmor %vm1518_vm15, %vm1519_vm1  ;;  %2750 = vmatpush.bf16.msrb.mxu3 %v5507_v63 }
 0x4da   :  { %5008 = vmatmul.msk.bf16.gmra.mxu2 %vm7260_vm13, %v6511_v60  ;;  %v2238_v35 = vsel %vm7251_vm12, %v2237_v26, %v2233_v46  ;;  %v1517_v2 = vadd.f32 %v5741_v19, %v1516_v33  ;;  %v7279_v11 = vadd.f32 1.0, %v5747_v47  ;;  %vm1523_vm2 = vcmp.eq.f32.partialorder %v1522_v40, 8.507059e+37 }
 0x4db   :  { %v2093_v42 = vpop.f32.mrf.mxu1  ;;  %2423 = vst [vmem:[#allocation35 + $0x18] sm:$0xff] %v2238_v35  ;;  %v5749_v61 = vpop.eup %5748  ;;  %v1525_v13 = vor.u32 1.1754944e-38, %v1524_v53  ;;  %v2251_v27 = vand.u32 2147483648, %v7244_v49  ;;  %v1537_v5 = vand.u32 2147483647, %v7264_v17  ;;  %vm2513_vm3 = vcmp.eq.s32.totalorder %v7131_v54, %v7281_v10 }
 0x4dc   :  { %v1521_v32 = vsel %vm1520_vm0, %v5741_v19, %v1517_v2  ;;  %v2241_v26 = vmul.f32 %v5749_v61, %v7244_v49  ;;  %5754 = vrcp.f32 %v7277_v4  ;;  %v4830_v56 = vmul.f32 -1.442695, %v1367_v30 }
 0x4dd   :  { %v1369_v8 = vpop.f32.mrf.mxu2  ;;  %vm2512_vm4 = vcmp.eq.s32.totalorder %v7131_v54, %v2486_v16  ;;  %v1526_v14 = vsel %vm1523_vm2, %v1525_v13, %v1521_v32  ;;  %vm2245_vm5 = vweird.f32 %v7244_v49  ;;  %v1539_v40 = vand.u32 2147483648, %v7264_v17 }
 0x4de   :  { %v5751_v53 = vpop.eup %5750  ;;  %1697 = vst [vmem:[#allocation32 + $0x20] sm:$0xff] %v1526_v14  ;;  %v2242_v21 = vsub.f32 1.0, %v2241_v26  ;;  %vm7293_vm6 = vcmp.eq.f32.partialorder %v2249_v18, 8.507059e+37  ;;  %5756 = vrcp.f32 %v7279_v11  ;;  %v2094_v19 = vadd.f32 %v7141_v7, %v2093_v42  ;;  %vm5009_vm0 = vmpackc.low %vm2513_vm3, %vm2512_vm4 }
 0x4df   :  { %v2252_v33 = vor.u32 1.1754944e-38, %v2251_v27  ;;  %v1529_v30 = vmul.f32 %v5751_v53, %v7264_v17  ;;  %vm1533_vm7 = vweird.f32 %v7264_v17  ;;  %vm7301_vm8 = vcmp.eq.f32.partialorder %v1537_v5, 8.507059e+37  ;;  %v5753_v35 = vpop.eup %5752 }
 0x4e0   :  { %v2243_v2 = vmul.f32 %v5749_v61, %v2242_v21  ;;  %vm2246_vm9 = vweird.f32 %v5749_v61  ;;  %v2264_v18 = vand.u32 2147483647, %v7277_v4  ;;  %5758 = vpow2.f32 %v4830_v56 }
 0x4e1   :  { %v1530_v63 = vsub.f32 1.0, %v1529_v30  ;;  %v1540_v13 = vor.u32 1.1754944e-38, %v1539_v40  ;;  %vm2260_vm10 = vweird.f32 %v7277_v4  ;;  %v7307_v42 = vadd.f32 1.0, %v5753_v35  ;;  %vm2247_vm11 = vmor %vm2245_vm5, %vm2246_vm9 }
 0x4e2   :  { %v5755_v32 = vpop.eup %5754  ;;  %v2244_v26 = vadd.f32 %v5749_v61, %v2243_v2  ;;  %v2266_v5 = vand.u32 2147483648, %v7277_v4  ;;  %v1552_v14 = vand.u32 2147483647, %v7279_v11  ;;  %v4942_v12 = vmul.f32 -1.442695, %v2094_v19 }
 0x4e3   :  { %v2096_v27 = vpop.f32.mrf.mxu1  ;;  %v1531_v21 = vmul.f32 %v5751_v53, %v1530_v63  ;;  %vm1534_vm12 = vweird.f32 %v5751_v53  ;;  %v2256_v56 = vmul.f32 %v5755_v32, %v7277_v4  ;;  %vm1548_vm13 = vweird.f32 %v7279_v11 }
 0x4e4   :  { %5760 = vrcp.f32 %v7307_v42  ;;  %v5757_v30 = vpop.eup %5756  ;;  %v2248_v35 = vsel %vm2247_vm11, %v5749_v61, %v2244_v26  ;;  %vm7316_vm14 = vcmp.eq.f32.partialorder %v2264_v18, 8.507059e+37  ;;  %v1370_v19 = vadd.f32 %v7137_v15, %v1369_v8  ;;  %vm1535_vm1 = vmor %vm1533_vm7, %vm1534_vm12 }
 0x4e5   :  { %v1371_v40 = vpop.f32.mrf.mxu2  ;;  %v2097_v49 = vadd.f32 %v7141_v7, %v2096_v27  ;;  %v2253_v63 = vsel %vm7293_vm6, %v2252_v33, %v2248_v35  ;;  %v1532_v41 = vadd.f32 %v5751_v53, %v1531_v21  ;;  %v2257_v3 = vsub.f32 1.0, %v2256_v56 }
 0x4e6   :  { %v1544_v0 = vmul.f32 %v5757_v30, %v7279_v11  ;;  %v5759_v59 = vpop.eup %5758  ;;  %2424 = vst [vmem:[#allocation35 + $0x20] sm:$0xff] %v2253_v63  ;;  %vm2261_vm15 = vweird.f32 %v5755_v32  ;;  %v2267_v61 = vor.u32 1.1754944e-38, %v2266_v5  ;;  %v1554_v18 = vand.u32 2147483648, %v7279_v11 }
 0x4e7   :  { %5762 = vpow2.f32 %v4942_v12  ;;  %v1536_v8 = vsel %vm1535_vm1, %v5751_v53, %v1532_v41  ;;  %v2258_v46 = vmul.f32 %v5755_v32, %v2257_v3  ;;  %v7334_v27 = vadd.f32 1.0, %v5759_v59  ;;  %v5506_v3 = vld [vmem:[#allocation22 + $0x18] sm:$0xff]  ;;  %vm2262_vm3 = vmor %vm2260_vm10, %vm2261_vm15 }
 0x4e8   :  { %v1545_v33 = vsub.f32 1.0, %v1544_v0  ;;  %v1541_v17 = vsel %vm7301_vm8, %v1540_v13, %v1536_v8  ;;  %vm1549_vm2 = vweird.f32 %v5757_v30  ;;  %v4831_v26 = vmul.f32 -1.442695, %v1370_v19  ;;  %2751 = vmatpush.bf16.msrb.mxu3 %v5506_v3 }
 0x4e9   :  { %v1372_v5 = vadd.f32 %v7137_v15, %v1371_v40  ;;  %1698 = vst [vmem:[#allocation32 + $0x28] sm:$0xff] %v1541_v17  ;;  %v2259_v16 = vadd.f32 %v5755_v32, %v2258_v46  ;;  %5764 = vrcp.f32 %v7334_v27  ;;  %v4943_v41 = vmul.f32 -1.442695, %v2097_v49  ;;  %v2495_v49 = vpop.permute.xlu1 %2494  ;;  %vm1550_vm5 = vmor %vm1548_vm13, %vm1549_vm2  ;;  %v2492_v46 = vpop.permute.xlu0 %2491 }
 0x4ea   :  { %5010 = vmatmul.msk.bf16.gmra.mxu2 %vm5009_vm0, %v6511_v60  ;;  %v5761_v12 = vpop.eup %5760  ;;  %v1546_v21 = vmul.f32 %v5757_v30, %v1545_v33  ;;  %vm7344_vm4 = vcmp.eq.f32.partialorder %v1552_v14, 8.507059e+37  ;;  %v1555_v10 = vor.u32 1.1754944e-38, %v1554_v18  ;;  %v2279_v47 = vand.u32 2147483647, %v7307_v42 }
 0x4eb   :  { %v2098_v0 = vpop.f32.mrf.mxu1  ;;  %v2271_v53 = vmul.f32 %v5761_v12, %v7307_v42  ;;  %v2263_v13 = vsel %vm2262_vm3, %v5755_v32, %v2259_v16  ;;  %5766 = vpow2.f32 %v4831_v26  ;;  %v4832_v40 = vmul.f32 -1.442695, %v1372_v5 }
 0x4ec   :  { %v1547_v56 = vadd.f32 %v5757_v30, %v1546_v21  ;;  %v2268_v4 = vsel %vm7316_vm14, %v2267_v61, %v2263_v13  ;;  %vm2276_vm6 = vweird.f32 %v5761_v12  ;;  %v2281_v63 = vand.u32 2147483648, %v7307_v42 }
 0x4ed   :  { %v1374_v35 = vpop.f32.mrf.mxu2  ;;  %v5763_v19 = vpop.eup %5762  ;;  %v2272_v14 = vsub.f32 1.0, %v2271_v53  ;;  %2425 = vst [vmem:[#allocation35 + $0x28] sm:$0xff] %v2268_v4  ;;  %5768 = vpow2.f32 %v4943_v41  ;;  %v2099_v8 = vadd.f32 %v7141_v7, %v2098_v0  ;;  %vm2514_vm7 = vcmp.eq.s32.totalorder %v7131_v54, %v2492_v46 }
 0x4ee   :  { %v1551_v32 = vsel %vm1550_vm5, %v5757_v30, %v1547_v56  ;;  %v7356_v18 = vadd.f32 1.0, %v5763_v19  ;;  %5770 = vpow2.f32 %v4832_v40  ;;  %v1375_v11 = vadd.f32 %v7137_v15, %v1374_v35 }
 0x4ef   :  { %v1556_v2 = vsel %vm7344_vm4, %v1555_v10, %v1551_v32  ;;  %v2273_v61 = vmul.f32 %v5761_v12, %v2272_v14  ;;  %v5765_v33 = vpop.eup %5764  ;;  %vm2515_vm8 = vcmp.eq.s32.totalorder %v7131_v54, %v2495_v49  ;;  %vm2275_vm9 = vweird.f32 %v7307_v42 }
 0x4f0   :  { %1699 = vst [vmem:[#allocation32 + $0x30] sm:$0xff] %v1556_v2  ;;  %5772 = vrcp.f32 %v7356_v18  ;;  %vm2280_vm10 = vcmp.eq.f32.partialorder %v2279_v47, 8.507059e+37  ;;  %v1559_v17 = vmul.f32 %v5765_v33, %v7334_v27  ;;  %v4944_v26 = vmul.f32 -1.442695, %v2099_v8  ;;  %vm2277_vm11 = vmor %vm2275_vm9, %vm2276_vm6 }
 0x4f1   :  { %v2274_v30 = vadd.f32 %v5761_v12, %v2273_v61  ;;  %v5767_v5 = vpop.eup %5766  ;;  %v2282_v16 = vor.u32 1.1754944e-38, %v2281_v63  ;;  %v1567_v21 = vand.u32 2147483647, %v7334_v27  ;;  %v1569_v41 = vand.u32 2147483648, %v7334_v27  ;;  %vm7391_vm1 = vmpackc.low %vm2515_vm8, %vm2514_vm7 }
 0x4f2   :  { %v4833_v3 = vmul.f32 -1.442695, %v1375_v11  ;;  %v1560_v10 = vsub.f32 1.0, %v1559_v17  ;;  %v7370_v42 = vadd.f32 1.0, %v5767_v5  ;;  %5774 = vpow2.f32 %v4944_v26  ;;  %v7403_v17 = vpop.permute.xlu2 %2497  ;;  %v5505_v11 = vld [vmem:[#allocation22 + $0x10] sm:$0xff] }
 0x4f3   :  { %v2101_v0 = vpop.f32.mrf.mxu1  ;;  %v2278_v59 = vsel %vm2277_vm11, %v5761_v12, %v2274_v30  ;;  %v5769_v53 = vpop.eup %5768  ;;  %v2294_v13 = vand.u32 2147483647, %v7356_v18  ;;  %v2296_v56 = vand.u32 2147483648, %v7356_v18  ;;  %vm1563_vm12 = vweird.f32 %v7334_v27  ;;  %2752 = vmatpush.bf16.msrb.mxu3 %v5505_v11 }
 0x4f4   :  { %v2283_v47 = vsel %vm2280_vm10, %v2282_v16, %v2278_v59  ;;  %5776 = vpow2.f32 %v4833_v3  ;;  %v5771_v35 = vpop.eup %5770  ;;  %v1561_v19 = vmul.f32 %v5765_v33, %v1560_v10  ;;  %vm1564_vm13 = vweird.f32 %v5765_v33 }
 0x4f5   :  { %v7374_v40 = vpop.f32.mrf.mxu2  ;;  %2426 = vst [vmem:[#allocation35 + $0x30] sm:$0xff] %v2283_v47  ;;  %5778 = vrcp.f32 %v7370_v42  ;;  %vm7378_vm14 = vcmp.eq.f32.partialorder %v1567_v21, 8.507059e+37  ;;  %v7382_v14 = vadd.f32 1.0, %v5769_v53  ;;  %v7384_v63 = vadd.f32 1.0, %v5771_v35  ;;  %vm1565_vm0 = vmor %vm1563_vm12, %vm1564_vm13 }
 0x4f6   :  { %v5773_v12 = vpop.eup %5772  ;;  %v2102_v32 = vadd.f32 %v7141_v7, %v2101_v0  ;;  %v1562_v8 = vadd.f32 %v5765_v33, %v1561_v19  ;;  %v1570_v2 = vor.u32 1.1754944e-38, %v1569_v41  ;;  %vm2290_vm15 = vweird.f32 %v7356_v18  ;;  %v7410_v41 = vpop.permute.xlu0 %2500 }
 0x4f7   :  { %v2286_v61 = vmul.f32 %v5773_v12, %v7356_v18  ;;  %vm7397_vm2 = vcmp.eq.f32.partialorder %v2294_v13, 8.507059e+37  ;;  %v2297_v30 = vor.u32 1.1754944e-38, %v2296_v56  ;;  %v1582_v46 = vand.u32 2147483647, %v7370_v42 }
 0x4f8   :  { %5780 = vrcp.f32 %v7382_v14  ;;  %v5775_v49 = vpop.eup %5774  ;;  %v1566_v26 = vsel %vm1565_vm0, %v5765_v33, %v1562_v8  ;;  %v1584_v16 = vand.u32 2147483648, %v7370_v42  ;;  %vm2291_vm3 = vweird.f32 %v5773_v12 }
 0x4f9   :  { %v2287_v5 = vsub.f32 1.0, %v2286_v61  ;;  %5782 = vrcp.f32 %v7384_v63  ;;  %v1571_v3 = vsel %vm7378_vm14, %v1570_v2, %v1566_v26  ;;  %vm1578_vm4 = vweird.f32 %v7370_v42  ;;  %vm2292_vm8 = vmor %vm2290_vm15, %vm2291_vm3 }
 0x4fa   :  { %5012 = vmatmul.msk.bf16.gmra.mxu2 %vm7391_vm1, %v6511_v60  ;;  %v5777_v21 = vpop.eup %5776  ;;  %v4945_v0 = vmul.f32 -1.442695, %v2102_v32  ;;  %1700 = vst [vmem:[#allocation32 + $0x38] sm:$0xff] %v1571_v3  ;;  %v2309_v53 = vand.u32 2147483647, %v7382_v14  ;;  %v2311_v47 = vand.u32 2147483648, %v7382_v14  ;;  %vm2516_vm5 = vcmp.eq.s32.totalorder %v7131_v54, %v7403_v17 }
 0x4fb   :  { %v2103_v33 = vpop.f32.mrf.mxu1  ;;  %v5779_v59 = vpop.eup %5778  ;;  %v2288_v10 = vmul.f32 %v5773_v12, %v2287_v5  ;;  %v7417_v13 = vadd.f32 1.0, %v5775_v49  ;;  %v1597_v35 = vand.u32 2147483647, %v7384_v63  ;;  %v1599_v19 = vand.u32 2147483648, %v7384_v63 }
 0x4fc   :  { %v1574_v56 = vmul.f32 %v5779_v59, %v7370_v42  ;;  %v7422_v4 = vadd.f32 1.0, %v5777_v21  ;;  %vm2517_vm6 = vcmp.eq.s32.totalorder %v7131_v54, %v7410_v41  ;;  %vm7430_vm7 = vcmp.eq.f32.partialorder %v1582_v46, 8.507059e+37  ;;  %v7491_v41 = vld [vmem:[%s7916_s16] ss:$0 sm:$0xff] }
 0x4fd   :  { %v7424_v27 = vpop.f32.mrf.mxu2  ;;  %v2289_v32 = vadd.f32 %v5773_v12, %v2288_v10  ;;  %v1585_v2 = vor.u32 1.1754944e-38, %v1584_v16  ;;  %5784 = vrcp.f32 %v7417_v13  ;;  %vm2305_vm9 = vweird.f32 %v7382_v14 }
 0x4fe   :  { %v5781_v61 = vpop.eup %5780  ;;  %v1575_v49 = vsub.f32 1.0, %v1574_v56  ;;  %vm1593_vm10 = vweird.f32 %v7384_v63  ;;  %5786 = vrcp.f32 %v7422_v4  ;;  %vm1579_vm11 = vweird.f32 %v5779_v59 }
 0x4ff   :  { %v5783_v26 = vpop.eup %5782  ;;  %v2293_v46 = vsel %vm2292_vm8, %v5773_v12, %v2289_v32  ;;  %v2301_v5 = vmul.f32 %v5781_v61, %v7382_v14  ;;  %vm7442_vm12 = vcmp.eq.f32.partialorder %v2309_v53, 8.507059e+37  ;;  %v2312_v21 = vor.u32 1.1754944e-38, %v2311_v47  ;;  %vm1580_vm0 = vmor %vm1578_vm4, %vm1579_vm11 }
 0x500   :  { %v2298_v18 = vsel %vm7397_vm2, %v2297_v30, %v2293_v46  ;;  %v1576_v3 = vmul.f32 %v5779_v59, %v1575_v49  ;;  %v1589_v10 = vmul.f32 %v5783_v26, %v7384_v63  ;;  %vm7449_vm13 = vcmp.eq.f32.partialorder %v1597_v35, 8.507059e+37 }
 0x501   :  { %v1600_v57 = vor.u32 1.1754944e-38, %v1599_v19  ;;  %2427 = vst [vmem:[#allocation35 + $0x38] sm:$0xff] %v2298_v18  ;;  %v2302_v12 = vsub.f32 1.0, %v2301_v5  ;;  %vm2306_vm14 = vweird.f32 %v5781_v61  ;;  %v2324_v53 = vand.u32 2147483647, %v7417_v13 }
 0x502   :  { %v2326_v32 = vand.u32 2147483648, %v7417_v13  ;;  %v1577_v52 = vadd.f32 %v5779_v59, %v1576_v3  ;;  %v1590_v47 = vsub.f32 1.0, %v1589_v10  ;;  %vm1594_vm1 = vweird.f32 %v5783_v26  ;;  %vm2307_vm4 = vmor %vm2305_vm9, %vm2306_vm14 }
 0x503   :  { %vm2320_vm15 = vweird.f32 %v7417_v13  ;;  %5788 = vpow2.f32 %v4945_v0  ;;  %v2106_v30 = vpop.f32.mrf.mxu1  ;;  %v5785_v35 = vpop.eup %5784  ;;  %v2303_v19 = vmul.f32 %v5781_v61, %v2302_v12  ;;  %vm1608_vm2 = vweird.f32 %v7422_v4  ;;  %vm1595_vm11 = vmor %vm1593_vm10, %vm1594_vm1 }
 0x504   :  { %v1612_v49 = vand.u32 2147483647, %v7422_v4  ;;  %v1377_v46 = vadd.f32 %v7137_v15, %v7374_v40  ;;  %v2104_v5 = vadd.f32 %v7141_v7, %v2103_v33  ;;  %v5787_v18 = vpop.eup %5786  ;;  %v1581_v3 = vsel %vm1580_vm0, %v5779_v59, %v1577_v52 }
 0x505   :  { %v1591_v0 = vmul.f32 %v5783_v26, %v1590_v47  ;;  %v2316_v10 = vmul.f32 %v5785_v35, %v7417_v13  ;;  %v1614_v50 = vand.u32 2147483648, %v7422_v4  ;;  %v1381_v42 = vpop.f32.mrf.mxu2  ;;  %v1586_v12 = vsel %vm7430_vm7, %v1585_v2, %v1581_v3  ;;  %vm5013_vm7 = vmpackc.low %vm2517_vm6, %vm2516_vm5  ;;  %v5504_v3 = vld [vmem:[#allocation22 + $0x8] sm:$0xff] }
 0x506   :  { %v2304_v45 = vadd.f32 %v5781_v61, %v2303_v19  ;;  %vm2321_vm3 = vweird.f32 %v5785_v35  ;;  %v1604_v43 = vmul.f32 %v5787_v18, %v7422_v4  ;;  %1701 = vst [vmem:[#allocation32 + $0x40] sm:$0xff] %v1586_v12  ;;  %vm1609_vm8 = vweird.f32 %v5787_v18  ;;  %2753 = vmatpush.bf16.msrb.mxu3 %v5504_v3 }
 0x507   :  { %v1592_v52 = vadd.f32 %v5783_v26, %v1591_v0  ;;  %v2317_v7 = vsub.f32 1.0, %v2316_v10  ;;  %v4834_v40 = vmul.f32 -1.442695, %v1377_v46  ;;  %v4946_v8 = vmul.f32 -1.442695, %v2104_v5  ;;  %vm2322_vm5 = vmor %vm2320_vm15, %vm2321_vm3 }
 0x508   :  { %v2308_v33 = vsel %vm2307_vm4, %v5781_v61, %v2304_v45  ;;  %v1605_v59 = vsub.f32 1.0, %v1604_v43  ;;  %v1380_v2 = vadd.f32 %v7137_v15, %v7424_v27  ;;  %v2107_v61 = vadd.f32 %v7491_v41, %v2106_v30  ;;  %vm1610_vm9 = vmor %vm1608_vm2, %vm1609_vm8 }
 0x509   :  { %v5789_v47 = vpop.eup %5788  ;;  %v2313_v45 = vsel %vm7442_vm12, %v2312_v21, %v2308_v33  ;;  %v1596_v14 = vsel %vm1595_vm11, %v5783_v26, %v1592_v52  ;;  %v2318_v63 = vmul.f32 %v5785_v35, %v2317_v7  ;;  %5790 = vpow2.f32 %v4834_v40  ;;  %v7495_v26 = vld [vmem:[%s7915_s29] ss:$0 sm:$0xff] }
 0x50a   :  { %2428 = vst [vmem:[#allocation35 + $0x40] sm:$0xff] %v2313_v45  ;;  %v1601_v43 = vsel %vm7449_vm13, %v1600_v57, %v1596_v14  ;;  %v1606_v15 = vmul.f32 %v5787_v18, %v1605_v59  ;;  %v7487_v27 = vadd.f32 1.0, %v5789_v47  ;;  %5792 = vpow2.f32 %v4946_v8  ;;  %5014 = vmatmul.msk.bf16.gmra.mxu2 %vm5013_vm7, %v6511_v60 }
 0x50b   :  { %1702 = vst [vmem:[#allocation32 + $0x48] sm:$0xff] %v1601_v43  ;;  %v2319_v54 = vadd.f32 %v5785_v35, %v2318_v63  ;;  %v4835_v17 = vmul.f32 -1.442695, %v1380_v2  ;;  %v1382_v16 = vadd.f32 %v7495_v26, %v1381_v42  ;;  %vm2325_vm6 = vcmp.eq.f32.partialorder %v2324_v53, 8.507059e+37  ;;  %v2108_v60 = vpop.f32.mrf.mxu1 }
 0x50c   :  { %v2327_v57 = vor.u32 1.1754944e-38, %v2326_v32  ;;  %v1607_v21 = vadd.f32 %v5787_v18, %v1606_v15  ;;  %5794 = vrcp.f32 %v7487_v27  ;;  %v1615_v11 = vor.u32 1.1754944e-38, %v1614_v50 }
 0x50d   :  { %v2323_v56 = vsel %vm2322_vm5, %v5785_v35, %v2319_v54  ;;  %5796 = vpow2.f32 %v4835_v17  ;;  %v4947_v30 = vmul.f32 -1.442695, %v2107_v61  ;;  %v1384_v19 = vpop.f32.mrf.mxu2  ;;  %vm1613_vm10 = vcmp.eq.f32.partialorder %v1612_v49, 8.507059e+37 }
 0x50e   :  { %v2328_v46 = vsel %vm2325_vm6, %v2327_v57, %v2323_v56  ;;  %v1611_v5 = vsel %vm1610_vm9, %v5787_v18, %v1607_v21  ;;  %v4836_v13 = vmul.f32 -1.442695, %v1382_v16  ;;  %v2109_v0 = vadd.f32 %v7491_v41, %v2108_v60  ;;  %v5503_v21 = vld [vmem:[#allocation22] sm:$0xff] }
 0x50f   :  { %v5791_v53 = vpop.eup %5790  ;;  %2429 = vst [vmem:[#allocation35 + $0x48] sm:$0xff] %v2328_v46  ;;  %v1616_v32 = vsel %vm1613_vm10, %v1615_v11, %v1611_v5  ;;  %5798 = vpow2.f32 %v4947_v30  ;;  %v2339_v12 = vand.u32 2147483647, %v7487_v27  ;;  %vm2335_vm12 = vweird.f32 %v7487_v27  ;;  %2754 = vmatpush.bf16.msrb.mxu3 %v5503_v21 }
 0x510   :  { %v5793_v35 = vpop.eup %5792  ;;  %1703 = vst [vmem:[#allocation32 + $0x50] sm:$0xff] %v1616_v32  ;;  %v7506_v10 = vadd.f32 1.0, %v5791_v53  ;;  %5800 = vpow2.f32 %v4836_v13  ;;  %v4948_v4 = vmul.f32 -1.442695, %v2109_v0  ;;  %v2341_v52 = vand.u32 2147483648, %v7487_v27 }
 0x511   :  { %v7508_v50 = vadd.f32 1.0, %v5793_v35  ;;  %v1385_v7 = vadd.f32 %v7495_v26, %v1384_v19  ;;  %vm7527_vm14 = vcmp.eq.f32.partialorder %v2339_v12, 8.507059e+37 }
 0x512   :  { %v5795_v42 = vpop.eup %5794  ;;  %5802 = vrcp.f32 %v7506_v10  ;;  %v1627_v59 = vand.u32 2147483647, %v7506_v10  ;;  %v1629_v47 = vand.u32 2147483648, %v7506_v10  ;;  %v2342_v61 = vor.u32 1.1754944e-38, %v2341_v52 }
 0x513   :  { %v5797_v49 = vpop.eup %5796  ;;  %v2331_v18 = vmul.f32 %v5795_v42, %v7487_v27  ;;  %5804 = vrcp.f32 %v7508_v50  ;;  %v2354_v45 = vand.u32 2147483647, %v7508_v50  ;;  %v2356_v14 = vand.u32 2147483648, %v7508_v50  ;;  %v2111_v57 = vpop.f32.mrf.mxu1 }
 0x514   :  { %v7518_v8 = vadd.f32 1.0, %v5797_v49  ;;  %5806 = vpow2.f32 %v4948_v4  ;;  %vm2336_vm13 = vweird.f32 %v5795_v42  ;;  %vm1623_vm1 = vweird.f32 %v7506_v10 }
 0x515   :  { %v5799_v40 = vpop.eup %5798  ;;  %v2332_v33 = vsub.f32 1.0, %v2331_v18  ;;  %v7520_v2 = vpop.f32.mrf.mxu2  ;;  %v4837_v16 = vmul.f32 -1.442695, %v1385_v7  ;;  %vm7535_vm15 = vcmp.eq.f32.partialorder %v1627_v59, 8.507059e+37  ;;  %vm2350_vm0 = vweird.f32 %v7508_v50  ;;  %vm2337_vm2 = vmor %vm2335_vm12, %vm2336_vm13 }
 0x516   :  { %v7525_v63 = vadd.f32 1.0, %v5799_v40  ;;  %v5801_v43 = vpop.eup %5800  ;;  %5808 = vrcp.f32 %v7518_v8  ;;  %v1630_v19 = vor.u32 1.1754944e-38, %v1629_v47  ;;  %vm7544_vm3 = vcmp.eq.f32.partialorder %v2354_v45, 8.507059e+37 }
 0x517   :  { %v2333_v15 = vmul.f32 %v5795_v42, %v2332_v33  ;;  %v2357_v13 = vor.u32 1.1754944e-38, %v2356_v14  ;;  %v7548_v0 = vadd.f32 1.0, %v5801_v43  ;;  %v7551_v35 = vadd.f32 %v7491_v41, %v2111_v57 }
 0x518   :  { %v5803_v17 = vpop.eup %5802  ;;  %5810 = vrcp.f32 %v7525_v63  ;;  %vm1638_vm8 = vweird.f32 %v7518_v8  ;;  %v1642_v33 = vand.u32 2147483647, %v7518_v8  ;;  %v1644_v47 = vand.u32 2147483648, %v7518_v8 }
 0x519   :  { %v5805_v60 = vpop.eup %5804  ;;  %v2334_v56 = vadd.f32 %v5795_v42, %v2333_v15  ;;  %v1619_v11 = vmul.f32 %v5803_v17, %v7506_v10  ;;  %5812 = vpow2.f32 %v4837_v16  ;;  %vm1624_vm4 = vweird.f32 %v5803_v17 }
 0x51a   :  { %v2346_v46 = vmul.f32 %v5805_v60, %v7508_v50  ;;  %v5807_v3 = vpop.eup %5806  ;;  %5814 = vrcp.f32 %v7548_v0  ;;  %vm2351_vm11 = vweird.f32 %v5805_v60  ;;  %vm2365_vm7 = vweird.f32 %v7525_v63  ;;  %vm1625_vm5 = vmor %vm1623_vm1, %vm1624_vm4 }
 0x51b   :  { %v2338_v53 = vsel %vm2337_vm2, %v5795_v42, %v2334_v56  ;;  %v1620_v32 = vsub.f32 1.0, %v1619_v11  ;;  %v7555_v49 = vadd.f32 1.0, %v5807_v3  ;;  %v2369_v15 = vand.u32 2147483647, %v7525_v63  ;;  %vm2352_vm6 = vmor %vm2350_vm0, %vm2351_vm11 }
 0x51c   :  { %v2343_v27 = vsel %vm7527_vm14, %v2342_v61, %v2338_v53  ;;  %v2347_v4 = vsub.f32 1.0, %v2346_v46  ;;  %v5809_v18 = vpop.eup %5808  ;;  %v2371_v16 = vand.u32 2147483648, %v7525_v63  ;;  %v1659_v50 = vand.u32 2147483648, %v7548_v0 }
 0x51d   :  { %2430 = vst [vmem:[#allocation35 + $0x50] sm:$0xff] %v2343_v27  ;;  %v1621_v12 = vmul.f32 %v5803_v17, %v1620_v32  ;;  %v7559_v42 = vpop.f32.mrf.mxu2  ;;  %v1634_v40 = vmul.f32 %v5809_v18, %v7518_v8  ;;  %5816 = vrcp.f32 %v7555_v49  ;;  %vm1639_vm9 = vweird.f32 %v5809_v18 }
 0x51e   :  { %v5811_v52 = vpop.eup %5810  ;;  %v2348_v7 = vmul.f32 %v5805_v60, %v2347_v4  ;;  %vm7580_vm12 = vcmp.eq.f32.partialorder %v1642_v33, 8.507059e+37  ;;  %v1645_v30 = vor.u32 1.1754944e-38, %v1644_v47  ;;  %vm1640_vm13 = vmor %vm1638_vm8, %vm1639_vm9  ;;  %vm7588_vm14 = vcmp.eq.f32.partialorder %v2369_v15, 8.507059e+37 }
 0x51f   :  { %v1622_v59 = vadd.f32 %v5803_v17, %v1621_v12  ;;  %v2361_v45 = vmul.f32 %v5811_v52, %v7525_v63  ;;  %v1635_v43 = vsub.f32 1.0, %v1634_v40  ;;  %v5813_v57 = vpop.eup %5812  ;;  %vm2366_vm10 = vweird.f32 %v5811_v52  ;;  %v2113_v40 = vpop.f32.mrf.mxu1 }
 0x520   :  { %v2349_v14 = vadd.f32 %v5805_v60, %v2348_v7  ;;  %v5815_v11 = vpop.eup %5814  ;;  %v7578_v3 = vadd.f32 1.0, %v5813_v57  ;;  %vm2367_vm1 = vmor %vm2365_vm7, %vm2366_vm10  ;;  %v1657_v8 = vand.u32 2147483647, %v7548_v0  ;;  %v1660_v47 = vor.u32 1.1754944e-38, %v1659_v50 }
 0x521   :  { %v1626_v54 = vsel %vm1625_vm5, %v5803_v17, %v1622_v59  ;;  %v2362_v61 = vsub.f32 1.0, %v2361_v45  ;;  %v1636_v56 = vmul.f32 %v5809_v18, %v1635_v43  ;;  %vm1654_vm0 = vweird.f32 %v5815_v11 }
 0x522   :  { %v1631_v21 = vsel %vm7535_vm15, %v1630_v19, %v1626_v54  ;;  %v2353_v10 = vsel %vm2352_vm6, %v5805_v60, %v2349_v14  ;;  %v1649_v60 = vmul.f32 %v5815_v11, %v7548_v0  ;;  %5818 = vrcp.f32 %v7578_v3 }
 0x523   :  { %1704 = vst [vmem:[#allocation32 + $0x58] sm:$0xff] %v1631_v21  ;;  %v2358_v46 = vsel %vm7544_vm3, %v2357_v13, %v2353_v10  ;;  %v2363_v17 = vmul.f32 %v5811_v52, %v2362_v61  ;;  %v1637_v53 = vadd.f32 %v5809_v18, %v1636_v56  ;;  %v2372_v13 = vor.u32 1.1754944e-38, %v2371_v16  ;;  %v5817_v4 = vpop.eup %5816  ;;  %v5518_v61 = vld [vmem:[#allocation23 + $0x38] sm:$0xff] }
 0x524   :  { %2431 = vst [vmem:[#allocation35 + $0x58] sm:$0xff] %v2358_v46  ;;  %v1650_v7 = vsub.f32 1.0, %v1649_v60  ;;  %vm1653_vm15 = vweird.f32 %v7548_v0  ;;  %v2376_v45 = vmul.f32 %v5817_v4, %v7555_v49  ;;  %v2384_v63 = vand.u32 2147483647, %v7555_v49  ;;  %2904 = vmatpush.bf16.msrb.mxu0 %v5518_v61 }
 0x525   :  { %v2364_v19 = vadd.f32 %v5811_v52, %v2363_v17  ;;  %v2633_v27 = vpop.f32.mrf.mxu2  ;;  %v1641_v12 = vsel %vm1640_vm13, %v5809_v18, %v1637_v53  ;;  %v4949_v15 = vmul.f32 -1.442695, %v7551_v35  ;;  %v1387_v54 = vadd.f32 %v7495_v26, %v7520_v2  ;;  %vm1655_vm3 = vmor %vm1653_vm15, %vm1654_vm0  ;;  %v5517_v26 = vld [vmem:[#allocation23 + $0x30] sm:$0xff] }
 0x526   :  { %v1646_v33 = vsel %vm7580_vm12, %v1645_v30, %v1641_v12  ;;  %v1651_v14 = vmul.f32 %v5815_v11, %v1650_v7  ;;  %v2377_v43 = vsub.f32 1.0, %v2376_v45  ;;  %vm2381_vm2 = vweird.f32 %v5817_v4 }
 0x527   :  { %v2368_v59 = vsel %vm2367_vm1, %v5811_v52, %v2364_v19  ;;  %1705 = vst [vmem:[#allocation32 + $0x60] sm:$0xff] %v1646_v33  ;;  %v2114_v52 = vadd.f32 %v7491_v41, %v2113_v40  ;;  %v2386_v57 = vand.u32 2147483648, %v7555_v49  ;;  %v2688_v21 = vpack.c.bf16 %v2633_v27, %v7559_v42 }
 0x528   :  { %v2373_v18 = vsel %vm7588_vm14, %v2372_v13, %v2368_v59  ;;  %v1652_v16 = vadd.f32 %v5815_v11, %v1651_v14  ;;  %v5819_v10 = vpop.eup %5818  ;;  %v2378_v56 = vmul.f32 %v5817_v4, %v2377_v43  ;;  %5820 = vpow2.f32 %v4949_v15  ;;  %2905 = vmatpush.bf16.msrb.mxu0 %v5517_v26 }
 0x529   :  { %2432 = vst [vmem:[#allocation35 + $0x60] sm:$0xff] %v2373_v18  ;;  %v4838_v46 = vmul.f32 -1.442695, %v1387_v54  ;;  %v4950_v35 = vmul.f32 -1.442695, %v2114_v52  ;;  %vm1658_vm4 = vcmp.eq.f32.partialorder %v1657_v8, 8.507059e+37  ;;  %v1664_v41 = vmul.f32 %v5819_v10, %v7578_v3  ;;  %2755 = vmatmul.bf16.vlgmr.msrb.gmra.mxu3 %v2688_v21 }
 0x52a   :  { %v1656_v17 = vsel %vm1655_vm3, %v5815_v11, %v1652_v16  ;;  %v2379_v50 = vadd.f32 %v5817_v4, %v2378_v56  ;;  %vm2380_vm8 = vweird.f32 %v7555_v49  ;;  %v2387_v0 = vor.u32 1.1754944e-38, %v2386_v57 }
 0x52b   :  { %v1661_v2 = vsel %vm1658_vm4, %v1660_v47, %v1656_v17  ;;  %5822 = vpow2.f32 %v4838_v46  ;;  %vm2382_vm11 = vmor %vm2380_vm8, %vm2381_vm2  ;;  %v1665_v53 = vsub.f32 1.0, %v1664_v41  ;;  %vm2385_vm7 = vcmp.eq.f32.partialorder %v2384_v63, 8.507059e+37 }
 0x52c   :  { %1706 = vst [vmem:[#allocation32 + $0x68] sm:$0xff] %v1661_v2  ;;  %5824 = vpow2.f32 %v4950_v35  ;;  %v2383_v32 = vsel %vm2382_vm11, %v5817_v4, %v2379_v50  ;;  %v1674_v11 = vand.u32 2147483648, %v7578_v3  ;;  %vm1669_vm5 = vweird.f32 %v5819_v10 }
 0x52d   :  { %v2636_v42 = vpop.f32.mrf.mxu2  ;;  %v2388_v30 = vsel %vm2385_vm7, %v2387_v0, %v2383_v32  ;;  %v1666_v60 = vmul.f32 %v5819_v10, %v1665_v53  ;;  %v1672_v19 = vand.u32 2147483647, %v7578_v3  ;;  %vm1668_vm6 = vweird.f32 %v7578_v3  ;;  %v5516_v3 = vld [vmem:[#allocation23 + $0x28] sm:$0xff] }
 0x52e   :  { %v5821_v5 = vpop.eup %5820  ;;  %2433 = vst [vmem:[#allocation35 + $0x68] sm:$0xff] %v2388_v30  ;;  %vm1670_vm9 = vmor %vm1668_vm6, %vm1669_vm5  ;;  %v1675_v12 = vor.u32 1.1754944e-38, %v1674_v11  ;;  %2906 = vmatpush.bf16.msrb.mxu0 %v5516_v3 }
 0x52f   :  { %v1667_v49 = vadd.f32 %v5819_v10, %v1666_v60  ;;  %v2178_v13 = vadd.f32 1.0, %v5821_v5  ;;  %vm1673_vm10 = vcmp.eq.f32.partialorder %v1672_v19, 8.507059e+37 }
 0x531   :  { %v5823_v27 = vpop.eup %5822  ;;  %v1671_v4 = vsel %vm1670_vm9, %v5819_v10, %v1667_v49  ;;  %5826 = vrcp.f32 %v2178_v13  ;;  %v2399_v14 = vand.u32 2147483647, %v2178_v13  ;;  %v2401_v15 = vand.u32 2147483648, %v2178_v13 }
 0x532   :  { %v5825_v7 = vpop.eup %5824  ;;  %v1676_v8 = vsel %vm1673_vm10, %v1675_v12, %v1671_v4  ;;  %v1452_v40 = vadd.f32 1.0, %v5823_v27  ;;  %vm2395_vm13 = vweird.f32 %v2178_v13  ;;  %v5515_v12 = vld [vmem:[#allocation23 + $0x20] sm:$0xff] }
 0x533   :  { %v2179_v33 = vadd.f32 1.0, %v5825_v7  ;;  %1707 = vst [vmem:[#allocation32 + $0x70] sm:$0xff] %v1676_v8  ;;  %vm2400_vm14 = vcmp.eq.f32.partialorder %v2399_v14, 8.507059e+37  ;;  %v2402_v56 = vor.u32 1.1754944e-38, %v2401_v15  ;;  %2907 = vmatpush.bf16.msrb.mxu0 %v5515_v12 }
 0x534   :  { %5828 = vrcp.f32 %v1452_v40  ;;  %v1689_v46 = vand.u32 2147483648, %v1452_v40  ;;  %v1687_v41 = vand.u32 2147483647, %v1452_v40  ;;  %vm1683_vm2 = vweird.f32 %v1452_v40 }
 0x535   :  { %v2638_v59 = vpop.f32.mrf.mxu2  ;;  %5830 = vrcp.f32 %v2179_v33  ;;  %v2416_v26 = vand.u32 2147483648, %v2179_v33  ;;  %vm2410_vm4 = vweird.f32 %v2179_v33 }
 0x536   :  { %v2689_v47 = vpack.c.bf16 %v2638_v59, %v2636_v42  ;;  %v2414_v42 = vand.u32 2147483647, %v2179_v33  ;;  %v1690_v32 = vor.u32 1.1754944e-38, %v1689_v46  ;;  %vm1688_vm8 = vcmp.eq.f32.partialorder %v1687_v41, 8.507059e+37 }
 0x537   :  { %v5827_v45 = vpop.eup %5826  ;;  %v2417_v19 = vor.u32 1.1754944e-38, %v2416_v26 }
 0x538   :  { %v2391_v18 = vmul.f32 %v5827_v45, %v2178_v13  ;;  %vm2396_vm12 = vweird.f32 %v5827_v45  ;;  %vm2415_vm7 = vcmp.eq.f32.partialorder %v2414_v42, 8.507059e+37  ;;  %v5525_v42 = vld [vmem:[#allocation25 + $0x30] sm:$0xff] }
 0x539   :  { %2760 = vmatmul.bf16.gmra.mxu3 %v2689_v47  ;;  %vm2397_vm1 = vmor %vm2395_vm13, %vm2396_vm12 }
 0x53a   :  { %v5829_v63 = vpop.eup %5828  ;;  %v2392_v43 = vsub.f32 1.0, %v2391_v18 }
 0x53b   :  { %v5831_v52 = vpop.eup %5830  ;;  %v1679_v61 = vmul.f32 %v5829_v63, %v1452_v40  ;;  %vm1684_vm15 = vweird.f32 %v5829_v63  ;;  %v5514_v40 = vld [vmem:[#allocation23 + $0x18] sm:$0xff] }
 0x53c   :  { %v2393_v16 = vmul.f32 %v5827_v45, %v2392_v43  ;;  %v2406_v57 = vmul.f32 %v5831_v52, %v2179_v33  ;;  %vm2411_vm0 = vweird.f32 %v5831_v52  ;;  %vm1685_vm3 = vmor %vm1683_vm2, %vm1684_vm15  ;;  %2908 = vmatpush.bf16.msrb.mxu0 %v5514_v40 }
 0x53d   :  { %v2641_v54 = vpop.f32.mrf.mxu2  ;;  %v1680_v21 = vsub.f32 1.0, %v1679_v61  ;;  %vm2412_vm11 = vmor %vm2410_vm4, %vm2411_vm0  ;;  %v5511_v61 = vld [vmem:[#allocation23] sm:$0xff] }
 0x53e   :  { %v2394_v10 = vadd.f32 %v5827_v45, %v2393_v16  ;;  %v2407_v35 = vsub.f32 1.0, %v2406_v57 }
 0x53f   :  { %v1681_v17 = vmul.f32 %v5829_v63, %v1680_v21  ;;  %v5526_v21 = vld [vmem:[#allocation25 + $0x38] sm:$0xff] }
 0x540   :  { %v2398_v2 = vsel %vm2397_vm1, %v5827_v45, %v2394_v10  ;;  %v2408_v50 = vmul.f32 %v5831_v52, %v2407_v35  ;;  %v5513_v45 = vld [vmem:[#allocation23 + $0x10] sm:$0xff]  ;;  %3045 = vmatpush.bf16.msrb.mxu1 %v5526_v21 }
 0x541   :  { %v2403_v0 = vsel %vm2400_vm14, %v2402_v56, %v2398_v2  ;;  %v1682_v53 = vadd.f32 %v5829_v63, %v1681_v17  ;;  %2909 = vmatpush.bf16.msrb.mxu0 %v5513_v45  ;;  %v7619_v56 = vld [vmem:[%s7955_s27] ss:$0 sm:$0xff]  ;;  %v7956_v45 = vmax.f32 %v6938_v38, 0.0  ;;  %v7959_v38 = vmax.f32 %v6959_v51, 0.0  ;;  %v5520_v51 = vld [vmem:[#allocation25 + $0x8] sm:$0xff] }
 0x542   :  { %2434 = vst [vmem:[#allocation35 + $0x70] sm:$0xff] %v2403_v0  ;;  %v2409_v11 = vadd.f32 %v5831_v52, %v2408_v50 }
 0x543   :  { %v1686_v60 = vsel %vm1685_vm3, %v5829_v63, %v1682_v53  ;;  %v5512_v63 = vld [vmem:[#allocation23 + $0x8] sm:$0xff] }
 0x544   :  { %v1691_v5 = vsel %vm1688_vm8, %v1690_v32, %v1686_v60  ;;  %v2413_v49 = vsel %vm2412_vm11, %v5831_v52, %v2409_v11  ;;  %3046 = vmatpush.bf16.msrb.mxu1 %v5525_v42 }
 0x545   :  { %v2643_v30 = vpop.f32.mrf.mxu2  ;;  %1708 = vst [vmem:[#allocation32 + $0x78] sm:$0xff] %v1691_v5  ;;  %v2418_v13 = vsel %vm2415_vm7, %v2417_v19, %v2413_v49  ;;  %2910 = vmatpush.bf16.msrb.mxu0 %v5512_v63 }
 0x546   :  { %v2690_v27 = vpack.c.bf16 %v2643_v30, %v2641_v54  ;;  %2435 = vst [vmem:[#allocation35 + $0x78] sm:$0xff] %v2418_v13 }
 0x548   :  { %3047 = vmatpush.bf16.msrb.mxu1 %v5524_v22 }
 0x549   :  { %2765 = vmatmul.bf16.gmra.mxu3 %v2690_v27  ;;  %2911 = vmatpush.bf16.msrb.mxu0 %v5511_v61 }
 0x54c   :  { %3048 = vmatpush.bf16.msrb.mxu1 %v5523_v36 }
 0x54d   :  { %v2646_v7 = vpop.f32.mrf.mxu2 }
 0x550   :  { %3049 = vmatpush.bf16.msrb.mxu1 %v5522_v29 }
 0x554   :  { %3050 = vmatpush.bf16.msrb.mxu1 %v5521_v44 }
 0x555   :  { %v2648_v4 = vpop.f32.mrf.mxu2 }
 0x556   :  { %v2691_v8 = vpack.c.bf16 %v2648_v4, %v2646_v7 }
 0x558   :  { %3051 = vmatpush.bf16.msrb.mxu1 %v5520_v51 }
 0x559   :  { %2770 = vmatmul.bf16.gmra.mxu3 %v2691_v8 }
 0x55d   :  { %v2651_v33 = vpop.f32.mrf.mxu2 }
 0x565   :  { %v2653_v59 = vpop.f32.mrf.mxu2 }
 0x566   :  { %v2692_v47 = vpack.c.bf16 %v2653_v59, %v2651_v33 }
 0x569   :  { %2775 = vmatmul.bf16.gmra.mxu3 %v2692_v47 }
 0x56d   :  { %v2656_v18 = vpop.f32.mrf.mxu2 }
 0x575   :  { %v2658_v14 = vpop.f32.mrf.mxu2 }
 0x576   :  { %v2693_v3 = vpack.c.bf16 %v2658_v14, %v2656_v18 }
 0x579   :  { %2780 = vmatmul.bf16.gmra.mxu3 %v2693_v3 }
 0x57d   :  { %v2661_v43 = vpop.f32.mrf.mxu2 }
 0x585   :  { %v2663_v15 = vpop.f32.mrf.mxu2 }
 0x586   :  { %v2694_v54 = vpack.c.bf16 %v2663_v15, %v2661_v43 }
 0x589   :  { %2785 = vmatmul.bf16.gmra.mxu3 %v2694_v54 }
 0x58d   :  { %v2666_v52 = vpop.f32.mrf.mxu2 }
 0x595   :  { %v2668_v16 = vpop.f32.mrf.mxu2 }
 0x596   :  { %v2695_v57 = vpack.c.bf16 %v2668_v16, %v2666_v52  ;;  %v7958_v52 = vmax.f32 %v6955_v48, 0.0  ;;  %v7961_v48 = vmax.f32 %v6971_v58, 0.0  ;;  %v7963_v58 = vmax.f32 %v6983_v1, 0.0  ;;  %v5534_v1 = vld [vmem:[#allocation26 + $0x38] sm:$0xff] }
 0x597   :  { %3186 = vmatpush.bf16.msrb.mxu2 %v5534_v1 }
 0x599   :  { %2790 = vmatmul.bf16.gmra.mxu3 %v2695_v57 }
 0x5ac   :  { %v2756_v10 = vpop.f32.mrf.mxu3 }
 0x5ad   :  { %v2757_v46 = vadd.f32 %v7619_v56, %v2756_v10 }
 0x5af   :  { %v2796_v17 = vmax.f32 %v2757_v46, 0.0 }
 0x5b1   :  { %v2812_v2 = vadd.f32 %v2796_v17, %v726_v23 }
 0x5b4   :  { %v2758_v35 = vpop.f32.mrf.mxu3 }
 0x5b5   :  { %v2759_v41 = vadd.f32 %v7619_v56, %v2758_v35 }
 0x5b7   :  { %v2797_v26 = vmax.f32 %v2759_v41, 0.0 }
 0x5b9   :  { %v2813_v50 = vadd.f32 %v2797_v26, %v727_v25  ;;  %v7960_v26 = vmax.f32 %v6967_v55, 0.0  ;;  %v7962_v55 = vmax.f32 %v6979_v62, 0.0  ;;  %v7966_v62 = vmax.f32 %v6995_v9, 0.0 }
 0x5bb   :  { %v2845_v0 = vpack.c.bf16 %v2813_v50, %v2812_v2 }
 0x5bc   :  { %v2761_v53 = vpop.f32.mrf.mxu3 }
 0x5bd   :  { %2912 = vmatmul.bf16.vlgmr.msrb.gmra.mxu0 %v2845_v0  ;;  %v2762_v32 = vadd.f32 %v7619_v56, %v2761_v53  ;;  %v5519_v53 = vld [vmem:[#allocation25] sm:$0xff] }
 0x5be   :  { %3052 = vmatpush.bf16.msrb.mxu1 %v5519_v53 }
 0x5bf   :  { %v2798_v30 = vmax.f32 %v2762_v32, 0.0 }
 0x5c1   :  { %v2814_v5 = vadd.f32 %v2798_v30, %v728_v37 }
 0x5c4   :  { %v2763_v11 = vpop.f32.mrf.mxu3 }
 0x5c5   :  { %v2764_v60 = vadd.f32 %v7619_v56, %v2763_v11 }
 0x5c7   :  { %v2799_v19 = vmax.f32 %v2764_v60, 0.0 }
 0x5c9   :  { %v2815_v20 = vadd.f32 %v2799_v19, %v729_v39 }
 0x5cb   :  { %v2846_v23 = vpack.c.bf16 %v2815_v20, %v2814_v5 }
 0x5cc   :  { %v2766_v25 = vpop.f32.mrf.mxu3 }
 0x5cd   :  { %2917 = vmatmul.bf16.gmra.mxu0 %v2846_v23  ;;  %v2767_v49 = vadd.f32 %v7619_v56, %v2766_v25 }
 0x5cf   :  { %v2800_v27 = vmax.f32 %v2767_v49, 0.0 }
 0x5d1   :  { %v2816_v4 = vadd.f32 %v2800_v27, %v730_v28 }
 0x5d4   :  { %v2768_v13 = vpop.f32.mrf.mxu3 }
 0x5d5   :  { %v2769_v12 = vadd.f32 %v7619_v56, %v2768_v13 }
 0x5d7   :  { %v2801_v7 = vmax.f32 %v2769_v12, 0.0 }
 0x5d9   :  { %v2817_v34 = vadd.f32 %v2801_v7, %v731_v31  ;;  %v7965_v7 = vmax.f32 %v6991_v6, 0.0 }
 0x5db   :  { %v2847_v37 = vpack.c.bf16 %v2817_v34, %v2816_v4 }
 0x5dc   :  { %v2771_v39 = vpop.f32.mrf.mxu3 }
 0x5dd   :  { %2922 = vmatmul.bf16.gmra.mxu0 %v2847_v37  ;;  %v2772_v8 = vadd.f32 %v7619_v56, %v2771_v39  ;;  %v7670_v39 = vld [vmem:[%s7964_s18] ss:$0 sm:$0xff] }
 0x5df   :  { %v2802_v33 = vmax.f32 %v2772_v8, 0.0 }
 0x5e1   :  { %v2818_v18 = vadd.f32 %v2802_v33, %v7956_v45 }
 0x5e4   :  { %v2773_v40 = vpop.f32.mrf.mxu3 }
 0x5e5   :  { %v2774_v59 = vadd.f32 %v7619_v56, %v2773_v40 }
 0x5e7   :  { %v2803_v47 = vmax.f32 %v2774_v59, 0.0 }
 0x5e9   :  { %v2819_v28 = vadd.f32 %v2803_v47, %v7957_v24  ;;  %v5533_v47 = vld [vmem:[#allocation26 + $0x30] sm:$0xff] }
 0x5ea   :  { %3187 = vmatpush.bf16.msrb.mxu2 %v5533_v47 }
 0x5eb   :  { %v2848_v31 = vpack.c.bf16 %v2819_v28, %v2818_v18 }
 0x5ec   :  { %v2776_v14 = vpop.f32.mrf.mxu3 }
 0x5ed   :  { %2927 = vmatmul.bf16.gmra.mxu0 %v2848_v31  ;;  %v2777_v3 = vadd.f32 %v7619_v56, %v2776_v14  ;;  %v5532_v31 = vld [vmem:[#allocation26 + $0x28] sm:$0xff] }
 0x5ee   :  { %3188 = vmatpush.bf16.msrb.mxu2 %v5532_v31  ;;  %v5193_v31 = vld [vmem:[#allocation28 + $0x60] sm:$0xf] }
 0x5ef   :  { %v2804_v43 = vmax.f32 %v2777_v3, 0.0 }
 0x5f1   :  { %v2820_v61 = vadd.f32 %v2804_v43, %v7958_v52 }
 0x5f4   :  { %v2778_v63 = vpop.f32.mrf.mxu3 }
 0x5f5   :  { %v2779_v15 = vadd.f32 %v7619_v56, %v2778_v63 }
 0x5f7   :  { %v2805_v54 = vmax.f32 %v2779_v15, 0.0 }
 0x5f9   :  { %v2821_v16 = vadd.f32 %v2805_v54, %v7959_v38 }
 0x5fb   :  { %v2849_v57 = vpack.c.bf16 %v2821_v16, %v2820_v61  ;;  %v5531_v61 = vld [vmem:[#allocation26 + $0x20] sm:$0xff] }
 0x5fc   :  { %v2781_v21 = vpop.f32.mrf.mxu3  ;;  %3189 = vmatpush.bf16.msrb.mxu2 %v5531_v61  ;;  %v5547_v61 = vld [vmem:[#allocation28 + $0x64] sm:$0xf] }
 0x5fd   :  { %2932 = vmatmul.bf16.gmra.mxu0 %v2849_v57  ;;  %v2782_v10 = vadd.f32 %v7619_v56, %v2781_v21 }
 0x5ff   :  { %v2806_v35 = vmax.f32 %v2782_v10, 0.0 }
 0x601   :  { %v2822_v2 = vadd.f32 %v2806_v35, %v7960_v26  ;;  %v5530_v35 = vld [vmem:[#allocation26 + $0x18] sm:$0xff] }
 0x602   :  { %3190 = vmatpush.bf16.msrb.mxu2 %v5530_v35 }
 0x604   :  { %v2783_v46 = vpop.f32.mrf.mxu3 }
 0x605   :  { %v2784_v17 = vadd.f32 %v7619_v56, %v2783_v46 }
 0x607   :  { %v2807_v41 = vmax.f32 %v2784_v17, 0.0 }
 0x609   :  { %v2823_v50 = vadd.f32 %v2807_v41, %v7961_v48 }
 0x60b   :  { %v2850_v42 = vpack.c.bf16 %v2823_v50, %v2822_v2 }
 0x60c   :  { %v2786_v0 = vpop.f32.mrf.mxu3 }
 0x60d   :  { %2937 = vmatmul.bf16.gmra.mxu0 %v2850_v42  ;;  %v2787_v32 = vadd.f32 %v7619_v56, %v2786_v0  ;;  %v5529_v42 = vld [vmem:[#allocation26 + $0x10] sm:$0xff] }
 0x60e   :  { %3191 = vmatpush.bf16.msrb.mxu2 %v5529_v42 }
 0x60f   :  { %v2808_v30 = vmax.f32 %v2787_v32, 0.0 }
 0x611   :  { %v2824_v5 = vadd.f32 %v2808_v30, %v7962_v55  ;;  %v5528_v55 = vld [vmem:[#allocation26 + $0x8] sm:$0xff] }
 0x612   :  { %3192 = vmatpush.bf16.msrb.mxu2 %v5528_v55 }
 0x614   :  { %v2788_v11 = vpop.f32.mrf.mxu3 }
 0x615   :  { %v2789_v60 = vadd.f32 %v7619_v56, %v2788_v11 }
 0x617   :  { %v2809_v19 = vmax.f32 %v2789_v60, 0.0 }
 0x619   :  { %v2825_v20 = vadd.f32 %v2809_v19, %v7963_v58  ;;  %v5527_v58 = vld [vmem:[#allocation26] sm:$0xff] }
 0x61a   :  { %3193 = vmatpush.bf16.msrb.mxu2 %v5527_v58  ;;  %v5543_v58 = vld [vmem:[#allocation28 + $0x44] sm:$0xf] }
 0x61b   :  { %v2851_v22 = vpack.c.bf16 %v2825_v20, %v2824_v5 }
 0x61c   :  { %v2791_v23 = vpop.f32.mrf.mxu3 }
 0x61d   :  { %2942 = vmatmul.bf16.gmra.mxu0 %v2851_v22  ;;  %v2792_v25 = vadd.f32 %v7619_v56, %v2791_v23 }
 0x61f   :  { %v2810_v13 = vmax.f32 %v2792_v25, 0.0 }
 0x621   :  { %v2826_v4 = vadd.f32 %v2810_v13, %v7965_v7 }
 0x624   :  { %v2793_v49 = vpop.f32.mrf.mxu3 }
 0x625   :  { %v2794_v27 = vadd.f32 %v7619_v56, %v2793_v49 }
 0x627   :  { %v2811_v12 = vmax.f32 %v2794_v27, 0.0 }
 0x629   :  { %v2827_v34 = vadd.f32 %v2811_v12, %v7966_v62 }
 0x62b   :  { %v2852_v36 = vpack.c.bf16 %v2827_v34, %v2826_v4 }
 0x62d   :  { %2947 = vmatmul.bf16.gmra.mxu0 %v2852_v36 }
 0x63a   :  { %v2913_v37 = vpop.f32.mrf.mxu0 }
 0x63b   :  { %v2914_v8 = vadd.f32 %v7670_v39, %v2913_v37 }
 0x63d   :  { %v2953_v56 = vmax.f32 %v2914_v8, 0.0  ;;  %v7689_v8 = vld [vmem:[%s7967_s1] ss:$0 sm:$0xff] }
 0x642   :  { %v2915_v40 = vpop.f32.mrf.mxu0 }
 0x643   :  { %v2916_v33 = vadd.f32 %v7670_v39, %v2915_v40  ;;  %v5201_v40 = vld [vmem:[#allocation28 + $0x70] sm:$0xf] }
 0x645   :  { %v2954_v59 = vmax.f32 %v2916_v33, 0.0  ;;  %v5550_v33 = vld [vmem:[#allocation28 + $0x74] sm:$0xf0] }
 0x647   :  { %v2986_v6 = vpack.c.bf16 %v2954_v59, %v2953_v56  ;;  %v5202_v56 = vor.u32 %v5550_v33, %v5201_v40 }
 0x649   :  { %3053 = vmatmul.bf16.vlgmr.msrb.gmra.mxu1 %v2986_v6  ;;  %3361 = vmatpush.bf16.msra.mxu3 %v5202_v56  ;;  %v5161_v56 = vld [vmem:[#allocation28 + $0x20] sm:$0xf] }
 0x64a   :  { %v2918_v9 = vpop.f32.mrf.mxu0 }
 0x64b   :  { %v2919_v45 = vadd.f32 %v7670_v39, %v2918_v9 }
 0x64d   :  { %v2955_v28 = vmax.f32 %v2919_v45, 0.0 }
 0x652   :  { %v2920_v18 = vpop.f32.mrf.mxu0 }
 0x653   :  { %v2921_v24 = vadd.f32 %v7670_v39, %v2920_v18  ;;  %v5549_v18 = vld [vmem:[#allocation28 + $0x74] sm:$0xf] }
 0x655   :  { %v2956_v29 = vmax.f32 %v2921_v24, 0.0 }
 0x657   :  { %v2987_v14 = vpack.c.bf16 %v2956_v29, %v2955_v28 }
 0x659   :  { %3058 = vmatmul.bf16.gmra.mxu1 %v2987_v14  ;;  %v5548_v14 = vld [vmem:[#allocation28 + $0x64] sm:$0xf0] }
 0x65a   :  { %v2923_v3 = vpop.f32.mrf.mxu0 }
 0x65b   :  { %v2924_v63 = vadd.f32 %v7670_v39, %v2923_v3  ;;  %v5194_v3 = vor.u32 %v5548_v14, %v5193_v31  ;;  %v5153_v14 = vld [vmem:[#allocation28 + $0x10] sm:$0xf] }
 0x65d   :  { %v2957_v54 = vmax.f32 %v2924_v63, 0.0  ;;  %3362 = vmatpush.bf16.msra.mxu3 %v5194_v3  ;;  %v5538_v3 = vld [vmem:[#allocation28 + $0x14] sm:$0xf0] }
 0x662   :  { %v2925_v43 = vpop.f32.mrf.mxu0 }
 0x663   :  { %v2926_v15 = vadd.f32 %v7670_v39, %v2925_v43 }
 0x665   :  { %v2958_v52 = vmax.f32 %v2926_v15, 0.0 }
 0x667   :  { %v2988_v38 = vpack.c.bf16 %v2958_v52, %v2957_v54 }
 0x669   :  { %3063 = vmatmul.bf16.gmra.mxu1 %v2988_v38  ;;  %v5195_v38 = vld [vmem:[#allocation28 + $0x68] sm:$0xf0] }
 0x66a   :  { %v2928_v16 = vpop.f32.mrf.mxu0 }
 0x66b   :  { %v2929_v44 = vadd.f32 %v7670_v39, %v2928_v16  ;;  %v5198_v16 = vor.u32 %v5547_v61, %v5195_v38  ;;  %v5536_v61 = vld [vmem:[#allocation28 + $0x4] sm:$0xf0] }
 0x66d   :  { %v2959_v10 = vmax.f32 %v2929_v44, 0.0 }
 0x672   :  { %v2930_v57 = vpop.f32.mrf.mxu0 }
 0x673   :  { %v2931_v21 = vadd.f32 %v7670_v39, %v2930_v57 }
 0x675   :  { %v2960_v46 = vmax.f32 %v2931_v21, 0.0  ;;  %v5185_v21 = vld [vmem:[#allocation28 + $0x50] sm:$0xf] }
 0x677   :  { %v2989_v17 = vpack.c.bf16 %v2960_v46, %v2959_v10  ;;  %v5546_v10 = vld [vmem:[#allocation28 + $0x54] sm:$0xf0] }
 0x678   :  { %v5186_v46 = vor.u32 %v5546_v10, %v5185_v21 }
 0x679   :  { %3068 = vmatmul.bf16.gmra.mxu1 %v2989_v17 }
 0x67a   :  { %v2933_v41 = vpop.f32.mrf.mxu0  ;;  %3363 = vmatpush.bf16.msra.mxu3 %v5186_v46 }
 0x67b   :  { %v2934_v26 = vadd.f32 %v7670_v39, %v2933_v41 }
 0x67d   :  { %v2961_v50 = vmax.f32 %v2934_v26, 0.0 }
 0x682   :  { %v2935_v2 = vpop.f32.mrf.mxu0 }
 0x683   :  { %v2936_v48 = vadd.f32 %v7670_v39, %v2935_v2 }
 0x685   :  { %v2962_v51 = vmax.f32 %v2936_v48, 0.0  ;;  %v5545_v48 = vld [vmem:[#allocation28 + $0x54] sm:$0xf] }
 0x687   :  { %v2990_v0 = vpack.c.bf16 %v2962_v51, %v2961_v50  ;;  %v5187_v50 = vld [vmem:[#allocation28 + $0x58] sm:$0xf0] }
 0x688   :  { %v5190_v51 = vor.u32 %v5545_v48, %v5187_v50 }
 0x689   :  { %3073 = vmatmul.bf16.gmra.mxu1 %v2990_v0 }
 0x68a   :  { %v2938_v53 = vpop.f32.mrf.mxu0 }
 0x68b   :  { %v2939_v32 = vadd.f32 %v7670_v39, %v2938_v53  ;;  %v5177_v53 = vld [vmem:[#allocation28 + $0x40] sm:$0xf] }
 0x68d   :  { %v2963_v60 = vmax.f32 %v2939_v32, 0.0  ;;  %v5544_v32 = vld [vmem:[#allocation28 + $0x44] sm:$0xf0] }
 0x692   :  { %v2940_v11 = vpop.f32.mrf.mxu0 }
 0x693   :  { %v2941_v30 = vadd.f32 %v7670_v39, %v2940_v11  ;;  %v5178_v11 = vor.u32 %v5544_v32, %v5177_v53 }
 0x695   :  { %v2964_v19 = vmax.f32 %v2941_v30, 0.0  ;;  %3364 = vmatpush.bf16.msra.mxu3 %v5178_v11  ;;  %v7708_v11 = vld [vmem:[%s7968_s14] ss:$0 sm:$0xff] }
 0x697   :  { %v2991_v5 = vpack.c.bf16 %v2964_v19, %v2963_v60 }
 0x699   :  { %3078 = vmatmul.bf16.gmra.mxu1 %v2991_v5 }
 0x69a   :  { %v2943_v20 = vpop.f32.mrf.mxu0 }
 0x69b   :  { %v2944_v22 = vadd.f32 %v7670_v39, %v2943_v20  ;;  %v5179_v20 = vld [vmem:[#allocation28 + $0x48] sm:$0xf0] }
 0x69d   :  { %v2965_v49 = vmax.f32 %v2944_v22, 0.0  ;;  %v5182_v22 = vor.u32 %v5543_v58, %v5179_v20 }
 0x6a2   :  { %v2945_v23 = vpop.f32.mrf.mxu0 }
 0x6a3   :  { %v2946_v25 = vadd.f32 %v7670_v39, %v2945_v23 }
 0x6a5   :  { %v2966_v13 = vmax.f32 %v2946_v25, 0.0 }
 0x6a7   :  { %v2992_v27 = vpack.c.bf16 %v2966_v13, %v2965_v49  ;;  %v5169_v49 = vld [vmem:[#allocation28 + $0x30] sm:$0xf]  ;;  %v5542_v13 = vld [vmem:[#allocation28 + $0x34] sm:$0xf0] }
 0x6a9   :  { %3083 = vmatmul.bf16.gmra.mxu1 %v2992_v27  ;;  %v5170_v27 = vor.u32 %v5542_v13, %v5169_v49  ;;  %v5581_v49 = vld [vmem:[#allocation29 + $0xf4] sm:$0xf]  ;;  %v5331_v13 = vld [vmem:[#allocation29 + $0xf8] sm:$0xf0] }
 0x6aa   :  { %v2948_v12 = vpop.f32.mrf.mxu0 }
 0x6ab   :  { %v2949_v7 = vadd.f32 %v7670_v39, %v2948_v12  ;;  %3365 = vmatpush.bf16.msra.mxu3 %v5170_v27  ;;  %v5334_v27 = vor.u32 %v5581_v49, %v5331_v13 }
 0x6ad   :  { %v2967_v34 = vmax.f32 %v2949_v7, 0.0 }
 0x6b2   :  { %v2950_v4 = vpop.f32.mrf.mxu0 }
 0x6b3   :  { %v2951_v62 = vadd.f32 %v7670_v39, %v2950_v4  ;;  %v5203_v39 = vld [vmem:[#allocation28 + $0x78] sm:$0xf0] }
 0x6b4   :  { %v5206_v24 = vor.u32 %v5549_v18, %v5203_v39 }
 0x6b5   :  { %v2968_v36 = vmax.f32 %v2951_v62, 0.0 }
 0x6b6   :  { %3410 = vmatpush.bf16.msra.mxu0 %v5206_v24  ;;  %v5539_v24 = vld [vmem:[#allocation28 + $0x24] sm:$0xf] }
 0x6b7   :  { %v2993_v1 = vpack.c.bf16 %v2968_v36, %v2967_v34  ;;  %v5541_v36 = vld [vmem:[#allocation28 + $0x34] sm:$0xf] }
 0x6b9   :  { %3088 = vmatmul.bf16.gmra.mxu1 %v2993_v1  ;;  %v5171_v1 = vld [vmem:[#allocation28 + $0x38] sm:$0xf0] }
 0x6ba   :  { %3411 = vmatpush.bf16.msra.mxu0 %v5198_v16 }
 0x6be   :  { %3412 = vmatpush.bf16.msra.mxu0 %v5190_v51 }
 0x6c2   :  { %3413 = vmatpush.bf16.msra.mxu0 %v5182_v22 }
 0x6c6   :  { %v3054_v37 = vpop.f32.mrf.mxu1 }
 0x6c7   :  { %v3055_v59 = vadd.f32 %v7689_v8, %v3054_v37  ;;  %v5174_v37 = vor.u32 %v5541_v36, %v5171_v1  ;;  %v5563_v36 = vld [vmem:[#allocation29 + $0x64] sm:$0xf]  ;;  %v5259_v1 = vld [vmem:[#allocation29 + $0x68] sm:$0xf0] }
 0x6c9   :  { %v3094_v9 = vmax.f32 %v3055_v59, 0.0  ;;  %3414 = vmatpush.bf16.msra.mxu0 %v5174_v37  ;;  %v5540_v59 = vld [vmem:[#allocation28 + $0x24] sm:$0xf0]  ;;  %v5262_v37 = vor.u32 %v5563_v36, %v5259_v1 }
 0x6ce   :  { %v3056_v47 = vpop.f32.mrf.mxu1 }
 0x6cf   :  { %v3057_v6 = vadd.f32 %v7689_v8, %v3056_v47  ;;  %v5162_v47 = vor.u32 %v5540_v59, %v5161_v56 }
 0x6d1   :  { %v3095_v45 = vmax.f32 %v3057_v6, 0.0  ;;  %3366 = vmatpush.bf16.msra.mxu3 %v5162_v47 }
 0x6d3   :  { %v3127_v28 = vpack.c.bf16 %v3095_v45, %v3094_v9 }
 0x6d5   :  { %3194 = vmatmul.bf16.vlgmr.msrb.gmra.mxu2 %v3127_v28  ;;  %v5163_v28 = vld [vmem:[#allocation28 + $0x28] sm:$0xf0] }
 0x6d6   :  { %v3059_v29 = vpop.f32.mrf.mxu1 }
 0x6d7   :  { %v3060_v63 = vadd.f32 %v7689_v8, %v3059_v29  ;;  %v5166_v29 = vor.u32 %v5539_v24, %v5163_v28  ;;  %v5257_v28 = vld [vmem:[#allocation29 + $0x60] sm:$0xf] }
 0x6d9   :  { %v3096_v54 = vmax.f32 %v3060_v63, 0.0  ;;  %3415 = vmatpush.bf16.msra.mxu0 %v5166_v29  ;;  %v5537_v63 = vld [vmem:[#allocation28 + $0x14] sm:$0xf]  ;;  %v5564_v29 = vld [vmem:[#allocation29 + $0x64] sm:$0xf0] }
 0x6de   :  { %v3061_v43 = vpop.f32.mrf.mxu1 }
 0x6df   :  { %v3062_v15 = vadd.f32 %v7689_v8, %v3061_v43 }
 0x6e1   :  { %v3097_v52 = vmax.f32 %v3062_v15, 0.0  ;;  %v5154_v15 = vor.u32 %v5538_v3, %v5153_v14  ;;  %v5258_v14 = vor.u32 %v5564_v29, %v5257_v28  ;;  %v5227_v28 = vld [vmem:[#allocation29 + $0x28] sm:$0xf0] }
 0x6e3   :  { %v3128_v44 = vpack.c.bf16 %v3097_v52, %v3096_v54  ;;  %v5155_v54 = vld [vmem:[#allocation28 + $0x18] sm:$0xf0]  ;;  %v5145_v52 = vld [vmem:[#allocation28] sm:$0xf]  ;;  %3367 = vmatpush.bf16.msra.mxu3 %v5154_v15 }
 0x6e4   :  { %v5158_v38 = vor.u32 %v5537_v63, %v5155_v54  ;;  %v5146_v16 = vor.u32 %v5536_v61, %v5145_v52  ;;  %v5561_v63 = vld [vmem:[#allocation29 + $0x54] sm:$0xf]  ;;  %v5313_v54 = vld [vmem:[#allocation29 + $0xd0] sm:$0xf]  ;;  %v5578_v52 = vld [vmem:[#allocation29 + $0xd4] sm:$0xf0] }
 0x6e5   :  { %3199 = vmatmul.bf16.gmra.mxu2 %v3128_v44  ;;  %v5314_v61 = vor.u32 %v5578_v52, %v5313_v54 }
 0x6e6   :  { %v3064_v57 = vpop.f32.mrf.mxu1  ;;  %3416 = vmatpush.bf16.msra.mxu0 %v5158_v38 }
 0x6e7   :  { %v3065_v35 = vadd.f32 %v7689_v8, %v3064_v57  ;;  %3368 = vmatpush.bf16.msra.mxu3 %v5146_v16 }
 0x6e9   :  { %v3098_v26 = vmax.f32 %v3065_v35, 0.0 }
 0x6ee   :  { %v3066_v17 = vpop.f32.mrf.mxu1 }
 0x6ef   :  { %v3067_v41 = vadd.f32 %v7689_v8, %v3066_v17 }
 0x6f1   :  { %v3099_v2 = vmax.f32 %v3067_v41, 0.0 }
 0x6f3   :  { %v3129_v42 = vpack.c.bf16 %v3099_v2, %v3098_v26 }
 0x6f5   :  { %3204 = vmatmul.bf16.gmra.mxu2 %v3129_v42  ;;  %v5535_v42 = vld [vmem:[#allocation28 + $0x4] sm:$0xf] }
 0x6f6   :  { %v3069_v0 = vpop.f32.mrf.mxu1 }
 0x6f7   :  { %v3070_v30 = vadd.f32 %v7689_v8, %v3069_v0  ;;  %v5147_v0 = vld [vmem:[#allocation28 + $0x8] sm:$0xf0] }
 0x6f8   :  { %v5150_v53 = vor.u32 %v5535_v42, %v5147_v0  ;;  %v5305_v0 = vld [vmem:[#allocation29 + $0xc0] sm:$0xf] }
 0x6f9   :  { %v3100_v55 = vmax.f32 %v3070_v30, 0.0  ;;  %v5565_v30 = vld [vmem:[#allocation29 + $0x74] sm:$0xf] }
 0x6fa   :  { %3417 = vmatpush.bf16.msra.mxu0 %v5150_v53  ;;  %v5576_v53 = vld [vmem:[#allocation29 + $0xc4] sm:$0xf0] }
 0x6fe   :  { %v3071_v60 = vpop.f32.mrf.mxu1  ;;  %3852 = vmatpush.bf16.msrb.mxu0 %v5334_v27  ;;  %v5557_v27 = vld [vmem:[#allocation29 + $0x34] sm:$0xf] }
 0x6ff   :  { %v3072_v19 = vadd.f32 %v7689_v8, %v3071_v60  ;;  %v5267_v60 = vld [vmem:[#allocation29 + $0x78] sm:$0xf0] }
 0x701   :  { %v3101_v5 = vmax.f32 %v3072_v19, 0.0  ;;  %v5270_v19 = vor.u32 %v5565_v30, %v5267_v60 }
 0x703   :  { %v3130_v23 = vpack.c.bf16 %v3101_v5, %v3100_v55  ;;  %v5329_v55 = vld [vmem:[#allocation29 + $0xf0] sm:$0xf]  ;;  %v5582_v5 = vld [vmem:[#allocation29 + $0xf4] sm:$0xf0]  ;;  %3803 = vmatpush.bf16.msrb.mxu3 %v5270_v19 }
 0x704   :  { %v5330_v58 = vor.u32 %v5582_v5, %v5329_v55 }
 0x705   :  { %3209 = vmatmul.bf16.gmra.mxu2 %v3130_v23 }
 0x706   :  { %v3074_v25 = vpop.f32.mrf.mxu1  ;;  %3754 = vmatpush.bf16.msra.mxu2 %v5330_v58  ;;  %v5575_v58 = vld [vmem:[#allocation29 + $0xc4] sm:$0xf] }
 0x707   :  { %v3075_v12 = vadd.f32 %v7689_v8, %v3074_v25  ;;  %3804 = vmatpush.bf16.msrb.mxu3 %v5262_v37 }
 0x709   :  { %v3102_v62 = vmax.f32 %v3075_v12, 0.0  ;;  %v5265_v12 = vld [vmem:[#allocation29 + $0x70] sm:$0xf] }
 0x70e   :  { %v3076_v7 = vpop.f32.mrf.mxu1 }
 0x70f   :  { %v3077_v4 = vadd.f32 %v7689_v8, %v3076_v7  ;;  %v5566_v7 = vld [vmem:[#allocation29 + $0x74] sm:$0xf0] }
 0x711   :  { %v3103_v34 = vmax.f32 %v3077_v4, 0.0 }
 0x713   :  { %v3131_v40 = vpack.c.bf16 %v3103_v34, %v3102_v62  ;;  %v5266_v62 = vor.u32 %v5566_v7, %v5265_v12  ;;  %v5235_v12 = vld [vmem:[#allocation29 + $0x38] sm:$0xf0] }
 0x714   :  { %v5238_v7 = vor.u32 %v5557_v27, %v5235_v12  ;;  %v5273_v27 = vld [vmem:[#allocation29 + $0x80] sm:$0xf]  ;;  %v5568_v12 = vld [vmem:[#allocation29 + $0x84] sm:$0xf0] }
 0x715   :  { %3214 = vmatmul.bf16.gmra.mxu2 %v3131_v40  ;;  %3705 = vmatpush.bf16.msra.mxu1 %v5266_v62  ;;  %v5321_v40 = vld [vmem:[#allocation29 + $0xe0] sm:$0xf]  ;;  %v5574_v62 = vld [vmem:[#allocation29 + $0xb4] sm:$0xf0] }
 0x716   :  { %v3079_v33 = vpop.f32.mrf.mxu1 }
 0x717   :  { %v3080_v6 = vadd.f32 %v7689_v8, %v3079_v33  ;;  %v5580_v33 = vld [vmem:[#allocation29 + $0xe4] sm:$0xf0] }
 0x718   :  { %v5322_v56 = vor.u32 %v5580_v33, %v5321_v40 }
 0x719   :  { %v3104_v18 = vmax.f32 %v3080_v6, 0.0  ;;  %3706 = vmatpush.bf16.msra.mxu1 %v5258_v14  ;;  %v5572_v14 = vld [vmem:[#allocation29 + $0xa4] sm:$0xf0] }
 0x71a   :  { %3755 = vmatpush.bf16.msra.mxu2 %v5322_v56  ;;  %v5573_v56 = vld [vmem:[#allocation29 + $0xb4] sm:$0xf] }
 0x71e   :  { %v3081_v9 = vpop.f32.mrf.mxu1  ;;  %3756 = vmatpush.bf16.msra.mxu2 %v5314_v61  ;;  %v5571_v61 = vld [vmem:[#allocation29 + $0xa4] sm:$0xf] }
 0x71f   :  { %v3082_v45 = vadd.f32 %v7689_v8, %v3081_v9 }
 0x721   :  { %v3105_v39 = vmax.f32 %v3082_v45, 0.0 }
 0x723   :  { %v3132_v31 = vpack.c.bf16 %v3105_v39, %v3104_v18  ;;  %v5579_v18 = vld [vmem:[#allocation29 + $0xe4] sm:$0xf]  ;;  %v5323_v39 = vld [vmem:[#allocation29 + $0xe8] sm:$0xf0] }
 0x724   :  { %v5326_v24 = vor.u32 %v5579_v18, %v5323_v39 }
 0x725   :  { %3219 = vmatmul.bf16.gmra.mxu2 %v3132_v31 }
 0x726   :  { %v3084_v43 = vpop.f32.mrf.mxu1  ;;  %3853 = vmatpush.bf16.msrb.mxu0 %v5326_v24  ;;  %v5555_v24 = vld [vmem:[#allocation29 + $0x24] sm:$0xf] }
 0x727   :  { %v3085_v44 = vadd.f32 %v7689_v8, %v3084_v43  ;;  %v5251_v43 = vld [vmem:[#allocation29 + $0x58] sm:$0xf0]  ;;  %v5230_v29 = vor.u32 %v5555_v24, %v5227_v28 }
 0x728   :  { %v5254_v15 = vor.u32 %v5561_v63, %v5251_v43 }
 0x729   :  { %v3106_v10 = vmax.f32 %v3085_v44, 0.0 }
 0x72a   :  { %3805 = vmatpush.bf16.msrb.mxu3 %v5254_v15 }
 0x72e   :  { %v3086_v57 = vpop.f32.mrf.mxu1 }
 0x72f   :  { %v3087_v21 = vadd.f32 %v7689_v8, %v3086_v57 }
 0x731   :  { %v3107_v46 = vmax.f32 %v3087_v21, 0.0 }
 0x733   :  { %v3133_v35 = vpack.c.bf16 %v3107_v46, %v3106_v10  ;;  %v5577_v10 = vld [vmem:[#allocation29 + $0xd4] sm:$0xf]  ;;  %v5315_v46 = vld [vmem:[#allocation29 + $0xd8] sm:$0xf0] }
 0x735   :  { %3224 = vmatmul.bf16.gmra.mxu2 %v3133_v35  ;;  %v5318_v35 = vor.u32 %v5577_v10, %v5315_v46  ;;  %v5553_v46 = vld [vmem:[#allocation29 + $0x14] sm:$0xf] }
 0x736   :  { %v3089_v17 = vpop.f32.mrf.mxu1 }
 0x737   :  { %v3090_v41 = vadd.f32 %v7689_v8, %v3089_v17  ;;  %v5249_v17 = vld [vmem:[#allocation29 + $0x50] sm:$0xf]  ;;  %3854 = vmatpush.bf16.msrb.mxu0 %v5318_v35  ;;  %v5219_v35 = vld [vmem:[#allocation29 + $0x18] sm:$0xf0] }
 0x739   :  { %v3108_v48 = vmax.f32 %v3090_v41, 0.0  ;;  %v5562_v41 = vld [vmem:[#allocation29 + $0x54] sm:$0xf0] }
 0x73e   :  { %v3091_v26 = vpop.f32.mrf.mxu1 }
 0x73f   :  { %v3092_v2 = vadd.f32 %v7689_v8, %v3091_v26 }
 0x741   :  { %v3109_v50 = vmax.f32 %v3092_v2, 0.0  ;;  %v5250_v2 = vor.u32 %v5562_v41, %v5249_v17  ;;  %v5281_v17 = vld [vmem:[#allocation29 + $0x90] sm:$0xf] }
 0x743   :  { %v3134_v51 = vpack.c.bf16 %v3109_v50, %v3108_v48  ;;  %3707 = vmatpush.bf16.msra.mxu1 %v5250_v2  ;;  %v5559_v50 = vld [vmem:[#allocation29 + $0x44] sm:$0xf]  ;;  %v5570_v2 = vld [vmem:[#allocation29 + $0x94] sm:$0xf0] }
 0x745   :  { %3229 = vmatmul.bf16.gmra.mxu2 %v3134_v51  ;;  %v5243_v51 = vld [vmem:[#allocation29 + $0x48] sm:$0xf0] }
 0x746   :  { %v5246_v42 = vor.u32 %v5559_v50, %v5243_v51  ;;  %v5283_v50 = vld [vmem:[#allocation29 + $0x98] sm:$0xf0]  ;;  %v5282_v51 = vor.u32 %v5570_v2, %v5281_v17 }
 0x748   :  { %3806 = vmatpush.bf16.msrb.mxu3 %v5246_v42 }
 0x74c   :  { %3807 = vmatpush.bf16.msrb.mxu3 %v5238_v7  ;;  %v5567_v7 = vld [vmem:[#allocation29 + $0x84] sm:$0xf] }
 0x750   :  { %3808 = vmatpush.bf16.msrb.mxu3 %v5230_v29  ;;  %v5598_v29 = vld [vmem:[#allocation31 + $0x78] sm:$0xff] }
 0x758   :  { %v3195_v32 = vpop.f32.mrf.mxu2 }
 0x759   :  { %v3196_v8 = vadd.f32 %v7708_v11, %v3195_v32  ;;  %v5306_v32 = vor.u32 %v5576_v53, %v5305_v0  ;;  %v5217_v0 = vld [vmem:[#allocation29 + $0x10] sm:$0xf]  ;;  %v5554_v53 = vld [vmem:[#allocation29 + $0x14] sm:$0xf0] }
 0x75b   :  { %v3235_v23 = vmax.f32 %v3196_v8, 0.0  ;;  %3757 = vmatpush.bf16.msra.mxu2 %v5306_v32  ;;  %v5307_v8 = vld [vmem:[#allocation29 + $0xc8] sm:$0xf0]  ;;  %v5218_v32 = vor.u32 %v5554_v53, %v5217_v0 }
 0x760   :  { %v3197_v20 = vpop.f32.mrf.mxu2 }
 0x761   :  { %v3198_v22 = vadd.f32 %v7708_v11, %v3197_v20  ;;  %v5310_v20 = vor.u32 %v5575_v58, %v5307_v8  ;;  %v5551_v8 = vld [vmem:[#allocation29 + $0x4] sm:$0xf] }
 0x763   :  { %v3236_v25 = vmax.f32 %v3198_v22, 0.0  ;;  %v5241_v22 = vld [vmem:[#allocation29 + $0x40] sm:$0xf]  ;;  %3855 = vmatpush.bf16.msrb.mxu0 %v5310_v20  ;;  %v5211_v20 = vld [vmem:[#allocation29 + $0x8] sm:$0xf0] }
 0x765   :  { %v3268_v4 = vpack.c.bf16 %v3236_v25, %v3235_v23  ;;  %v5560_v23 = vld [vmem:[#allocation29 + $0x44] sm:$0xf0] }
 0x766   :  { %v5242_v49 = vor.u32 %v5560_v23, %v5241_v22  ;;  %v5214_v23 = vor.u32 %v5551_v8, %v5211_v20  ;;  %v5588_v8 = vld [vmem:[#allocation31 + $0x28] sm:$0xff] }
 0x767   :  { %3369 = vmatmul.bf16.vlgmr.msra.gmra.mxu3 %v3268_v4  ;;  %3418 = vmatmul.bf16.vlgmr.msra.gmra.mxu0 %v3268_v4  ;;  %v5297_v4 = vld [vmem:[#allocation29 + $0xb0] sm:$0xf] }
 0x768   :  { %v3200_v34 = vpop.f32.mrf.mxu2  ;;  %3708 = vmatpush.bf16.msra.mxu1 %v5242_v49 }
 0x769   :  { %v3201_v59 = vadd.f32 %v7708_v11, %v3200_v34  ;;  %v5298_v34 = vor.u32 %v5574_v62, %v5297_v4  ;;  %v5274_v4 = vor.u32 %v5568_v12, %v5273_v27  ;;  %v5275_v62 = vld [vmem:[#allocation29 + $0x88] sm:$0xf0] }
 0x76b   :  { %v3237_v9 = vmax.f32 %v3201_v59, 0.0  ;;  %3758 = vmatpush.bf16.msra.mxu2 %v5298_v34  ;;  %v5299_v59 = vld [vmem:[#allocation29 + $0xb8] sm:$0xf0] }
 0x770   :  { %v3202_v47 = vpop.f32.mrf.mxu2 }
 0x771   :  { %v3203_v6 = vadd.f32 %v7708_v11, %v3202_v47  ;;  %v5302_v47 = vor.u32 %v5573_v56, %v5299_v59  ;;  %v3267_v59 = vld [vmem:[%s7969_s24] sm:$0x3] }
 0x773   :  { %v3238_v45 = vmax.f32 %v3203_v6, 0.0  ;;  %v5233_v6 = vld [vmem:[#allocation29 + $0x30] sm:$0xf]  ;;  %3856 = vmatpush.bf16.msrb.mxu0 %v5302_v47  ;;  %v7727_v47 = vperm.slane %v3267_v59, 1 }
 0x775   :  { %v3269_v31 = vpack.c.bf16 %v3238_v45, %v3237_v9  ;;  %v5558_v9 = vld [vmem:[#allocation29 + $0x34] sm:$0xf0] }
 0x776   :  { %v5234_v18 = vor.u32 %v5558_v9, %v5233_v6 }
 0x777   :  { %3374 = vmatmul.bf16.gmra.mxu3 %v3269_v31  ;;  %3423 = vmatmul.bf16.gmra.mxu0 %v3269_v31  ;;  %v5289_v31 = vld [vmem:[#allocation29 + $0xa0] sm:$0xf] }
 0x778   :  { %v3205_v3 = vpop.f32.mrf.mxu2  ;;  %3709 = vmatpush.bf16.msra.mxu1 %v5234_v18  ;;  %v7730_v18 = vperm.slane %v3267_v59, 0 }
 0x779   :  { %v3206_v38 = vadd.f32 %v7708_v11, %v3205_v3  ;;  %v5290_v3 = vor.u32 %v5572_v14, %v5289_v31  ;;  %v5590_v31 = vld [vmem:[#allocation31 + $0x38] sm:$0xff] }
 0x77b   :  { %v3239_v57 = vmax.f32 %v3206_v38, 0.0  ;;  %3759 = vmatpush.bf16.msra.mxu2 %v5290_v3  ;;  %v5291_v38 = vld [vmem:[#allocation29 + $0xa8] sm:$0xf0] }
 0x77f   :  { %3760 = vmatpush.bf16.msra.mxu2 %v5282_v51 }
 0x780   :  { %v3207_v16 = vpop.f32.mrf.mxu2 }
 0x781   :  { %v3208_v44 = vadd.f32 %v7708_v11, %v3207_v16  ;;  %v5294_v16 = vor.u32 %v5571_v61, %v5291_v38 }
 0x783   :  { %v3240_v21 = vmax.f32 %v3208_v44, 0.0  ;;  %v5225_v44 = vld [vmem:[#allocation29 + $0x20] sm:$0xf]  ;;  %3857 = vmatpush.bf16.msrb.mxu0 %v5294_v16  ;;  %3761 = vmatpush.bf16.msra.mxu2 %v5274_v4 }
 0x785   :  { %v3270_v26 = vpack.c.bf16 %v3240_v21, %v3239_v57  ;;  %v5556_v57 = vld [vmem:[#allocation29 + $0x24] sm:$0xf0] }
 0x786   :  { %v5226_v10 = vor.u32 %v5556_v57, %v5225_v44 }
 0x787   :  { %3379 = vmatmul.bf16.gmra.mxu3 %v3270_v26  ;;  %3428 = vmatmul.bf16.gmra.mxu0 %v3270_v26  ;;  %v5222_v26 = vor.u32 %v5553_v46, %v5219_v35  ;;  %v5597_v46 = vld [vmem:[#allocation31 + $0x70] sm:$0xff] }
 0x788   :  { %v3210_v48 = vpop.f32.mrf.mxu2  ;;  %3710 = vmatpush.bf16.msra.mxu1 %v5226_v10  ;;  %4130 = vmatpush.bf16.msrb.mxu2 %v5598_v29  ;;  %v5589_v35 = vld [vmem:[#allocation31 + $0x30] sm:$0xff] }
 0x789   :  { %v3211_v30 = vadd.f32 %v7708_v11, %v3210_v48  ;;  %v5569_v48 = vld [vmem:[#allocation29 + $0x94] sm:$0xf]  ;;  %3809 = vmatpush.bf16.msrb.mxu3 %v5222_v26 }
 0x78a   :  { %v5286_v42 = vor.u32 %v5569_v48, %v5283_v50 }
 0x78b   :  { %v3241_v55 = vmax.f32 %v3211_v30, 0.0 }
 0x78c   :  { %3858 = vmatpush.bf16.msrb.mxu0 %v5286_v42  ;;  %3711 = vmatpush.bf16.msra.mxu1 %v5218_v32 }
 0x78d   :  { %3810 = vmatpush.bf16.msrb.mxu3 %v5214_v23  ;;  %4131 = vmatpush.bf16.msrb.mxu2 %v5597_v46 }
 0x790   :  { %v3212_v60 = vpop.f32.mrf.mxu2 }
 0x791   :  { %v3213_v19 = vadd.f32 %v7708_v11, %v3212_v60 }
 0x793   :  { %v3242_v5 = vmax.f32 %v3213_v19, 0.0 }
 0x795   :  { %v3271_v25 = vpack.c.bf16 %v3242_v5, %v3241_v55 }
 0x797   :  { %3384 = vmatmul.bf16.gmra.mxu3 %v3271_v25  ;;  %3433 = vmatmul.bf16.gmra.mxu0 %v3271_v25 }
 0x798   :  { %v3215_v13 = vpop.f32.mrf.mxu2 }
 0x799   :  { %v3216_v36 = vadd.f32 %v7708_v11, %v3215_v13 }
 0x79b   :  { %v3243_v40 = vmax.f32 %v3216_v36, 0.0 }
 0x7a0   :  { %v3217_v1 = vpop.f32.mrf.mxu2 }
 0x7a1   :  { %v3218_v37 = vadd.f32 %v7708_v11, %v3217_v1  ;;  %v5278_v1 = vor.u32 %v5567_v7, %v5275_v62 }
 0x7a3   :  { %v3244_v33 = vmax.f32 %v3218_v37, 0.0  ;;  %3859 = vmatpush.bf16.msrb.mxu0 %v5278_v1 }
 0x7a5   :  { %v3272_v45 = vpack.c.bf16 %v3244_v33, %v3243_v40  ;;  %v5209_v40 = vld [vmem:[#allocation29] sm:$0xf]  ;;  %v5552_v33 = vld [vmem:[#allocation29 + $0x4] sm:$0xf0] }
 0x7a6   :  { %v5210_v56 = vor.u32 %v5552_v33, %v5209_v40  ;;  %v5587_v40 = vld [vmem:[#allocation31 + $0x20] sm:$0xff] }
 0x7a7   :  { %3389 = vmatmul.bf16.gmra.mxu3 %v3272_v45  ;;  %3438 = vmatmul.bf16.gmra.mxu0 %v3272_v45 }
 0x7a8   :  { %v3220_v39 = vpop.f32.mrf.mxu2  ;;  %3712 = vmatpush.bf16.msra.mxu1 %v5210_v56 }
 0x7a9   :  { %v3221_v63 = vadd.f32 %v7708_v11, %v3220_v39 }
 0x7ab   :  { %v3245_v54 = vmax.f32 %v3221_v63, 0.0 }
 0x7ac   :  { %4081 = vmatpush.bf16.msrb.mxu1 %v5590_v31 }
 0x7b0   :  { %v3222_v43 = vpop.f32.mrf.mxu2  ;;  %4082 = vmatpush.bf16.msrb.mxu1 %v5589_v35 }
 0x7b1   :  { %v3223_v15 = vadd.f32 %v7708_v11, %v3222_v43 }
 0x7b3   :  { %v3246_v52 = vmax.f32 %v3223_v15, 0.0 }
 0x7b4   :  { %4083 = vmatpush.bf16.msrb.mxu1 %v5588_v8  ;;  %v5584_v8 = vld [vmem:[#allocation31 + $0x8] sm:$0xff] }
 0x7b5   :  { %v3273_v21 = vpack.c.bf16 %v3246_v52, %v3245_v54 }
 0x7b7   :  { %3394 = vmatmul.bf16.gmra.mxu3 %v3273_v21  ;;  %3443 = vmatmul.bf16.gmra.mxu0 %v3273_v21 }
 0x7b8   :  { %v3225_v41 = vpop.f32.mrf.mxu2  ;;  %4084 = vmatpush.bf16.msrb.mxu1 %v5587_v40 }
 0x7b9   :  { %v3226_v30 = vadd.f32 %v7708_v11, %v3225_v41 }
 0x7bb   :  { %v3247_v55 = vmax.f32 %v3226_v30, 0.0 }
 0x7c0   :  { %v3227_v60 = vpop.f32.mrf.mxu2 }
 0x7c1   :  { %v3228_v19 = vadd.f32 %v7708_v11, %v3227_v60 }
 0x7c3   :  { %v3248_v5 = vmax.f32 %v3228_v19, 0.0 }
 0x7c5   :  { %v3274_v58 = vpack.c.bf16 %v3248_v5, %v3247_v55 }
 0x7c7   :  { %3399 = vmatmul.bf16.gmra.mxu3 %v3274_v58  ;;  %3448 = vmatmul.bf16.gmra.mxu0 %v3274_v58  ;;  %v5596_v58 = vld [vmem:[#allocation31 + $0x68] sm:$0xff] }
 0x7c8   :  { %v3230_v22 = vpop.f32.mrf.mxu2  ;;  %4132 = vmatpush.bf16.msrb.mxu2 %v5596_v58 }
 0x7c9   :  { %v3231_v25 = vadd.f32 %v7708_v11, %v3230_v22 }
 0x7cb   :  { %v3249_v34 = vmax.f32 %v3231_v25, 0.0 }
 0x7d0   :  { %v3232_v49 = vpop.f32.mrf.mxu2 }
 0x7d1   :  { %v3233_v13 = vadd.f32 %v7708_v11, %v3232_v49 }
 0x7d3   :  { %v3250_v36 = vmax.f32 %v3233_v13, 0.0 }
 0x7d5   :  { %v3275_v37 = vpack.c.bf16 %v3250_v36, %v3249_v34 }
 0x7d7   :  { %3404 = vmatmul.bf16.gmra.mxu3 %v3275_v37  ;;  %3453 = vmatmul.bf16.gmra.mxu0 %v3275_v37  ;;  %v5595_v37 = vld [vmem:[#allocation31 + $0x60] sm:$0xff] }
 0x7d8   :  { %4133 = vmatpush.bf16.msrb.mxu2 %v5595_v37 }
 0x7e4   :  { %v3419_v11 = vpop.f32.mrf.mxu0 }
 0x7e5   :  { %v3420_v9 = vadd.f32 %v3419_v11, %v7727_v47 }
 0x7e7   :  { %v3460_v24 = vmax.f32 %v3420_v9, 0.0 }
 0x7ea   :  { %v3370_v6 = vpop.f32.mrf.mxu3 }
 0x7eb   :  { %v3371_v14 = vadd.f32 %v3370_v6, %v7730_v18 }
 0x7ec   :  { %v3421_v45 = vpop.f32.mrf.mxu0 }
 0x7ed   :  { %v3422_v39 = vadd.f32 %v3421_v45, %v7727_v47  ;;  %v3459_v54 = vmax.f32 %v3371_v14, 0.0 }
 0x7ef   :  { %v3462_v28 = vmax.f32 %v3422_v39, 0.0 }
 0x7f1   :  { %v3525_v3 = vpack.c.bf16 %v3462_v28, %v3460_v24 }
 0x7f2   :  { %v3372_v63 = vpop.f32.mrf.mxu3 }
 0x7f3   :  { %v3373_v43 = vadd.f32 %v3372_v63, %v7730_v18  ;;  %3762 = vmatmul.bf16.vlgmr.msra.gmra.mxu2 %v3525_v3  ;;  %3860 = vmatmul.bf16.vlgmr.msrb.gmra.mxu0 %v3525_v3  ;;  %v5594_v63 = vld [vmem:[#allocation31 + $0x58] sm:$0xff] }
 0x7f4   :  { %v3424_v15 = vpop.f32.mrf.mxu0  ;;  %4134 = vmatpush.bf16.msrb.mxu2 %v5594_v63 }
 0x7f5   :  { %v3461_v52 = vmax.f32 %v3373_v43, 0.0  ;;  %v3425_v16 = vadd.f32 %v3424_v15, %v7727_v47  ;;  %v5586_v43 = vld [vmem:[#allocation31 + $0x18] sm:$0xff] }
 0x7f6   :  { %4085 = vmatpush.bf16.msrb.mxu1 %v5586_v43 }
 0x7f7   :  { %v3524_v61 = vpack.c.bf16 %v3461_v52, %v3459_v54  ;;  %v3464_v21 = vmax.f32 %v3425_v16, 0.0 }
 0x7f9   :  { %3713 = vmatmul.bf16.vlgmr.msra.gmra.mxu1 %v3524_v61  ;;  %3811 = vmatmul.bf16.vlgmr.msrb.gmra.mxu3 %v3524_v61 }
 0x7fa   :  { %v3375_v38 = vpop.f32.mrf.mxu3 }
 0x7fb   :  { %v3376_v17 = vadd.f32 %v3375_v38, %v7730_v18 }
 0x7fc   :  { %v3426_v44 = vpop.f32.mrf.mxu0 }
 0x7fd   :  { %v3427_v57 = vadd.f32 %v3426_v44, %v7727_v47  ;;  %v3463_v50 = vmax.f32 %v3376_v17, 0.0 }
 0x7ff   :  { %v3466_v10 = vmax.f32 %v3427_v57, 0.0 }
 0x801   :  { %v3527_v41 = vpack.c.bf16 %v3466_v10, %v3464_v21 }
 0x802   :  { %v3377_v26 = vpop.f32.mrf.mxu3 }
 0x803   :  { %v3378_v2 = vadd.f32 %v3377_v26, %v7730_v18  ;;  %3767 = vmatmul.bf16.gmra.mxu2 %v3527_v41  ;;  %3865 = vmatmul.bf16.gmra.mxu0 %v3527_v41  ;;  %v5593_v26 = vld [vmem:[#allocation31 + $0x50] sm:$0xff] }
 0x804   :  { %v3429_v48 = vpop.f32.mrf.mxu0  ;;  %4135 = vmatpush.bf16.msrb.mxu2 %v5593_v26 }
 0x805   :  { %v3465_v51 = vmax.f32 %v3378_v2, 0.0  ;;  %v3430_v53 = vadd.f32 %v3429_v48, %v7727_v47  ;;  %v5585_v2 = vld [vmem:[#allocation31 + $0x10] sm:$0xff] }
 0x806   :  { %4086 = vmatpush.bf16.msrb.mxu1 %v5585_v2 }
 0x807   :  { %v3526_v42 = vpack.c.bf16 %v3465_v51, %v3463_v50  ;;  %v3468_v60 = vmax.f32 %v3430_v53, 0.0 }
 0x809   :  { %3718 = vmatmul.bf16.gmra.mxu1 %v3526_v42  ;;  %3816 = vmatmul.bf16.gmra.mxu3 %v3526_v42 }
 0x80a   :  { %v3380_v0 = vpop.f32.mrf.mxu3  ;;  %4087 = vmatpush.bf16.msrb.mxu1 %v5584_v8 }
 0x80b   :  { %v3381_v55 = vadd.f32 %v3380_v0, %v7730_v18 }
 0x80c   :  { %v3431_v32 = vpop.f32.mrf.mxu0 }
 0x80d   :  { %v3432_v30 = vadd.f32 %v3431_v32, %v7727_v47  ;;  %v3467_v25 = vmax.f32 %v3381_v55, 0.0  ;;  %v5592_v32 = vld [vmem:[#allocation31 + $0x48] sm:$0xff] }
 0x80e   :  { %4136 = vmatpush.bf16.msrb.mxu2 %v5592_v32 }
 0x80f   :  { %v3470_v19 = vmax.f32 %v3432_v30, 0.0 }
 0x811   :  { %v3529_v5 = vpack.c.bf16 %v3470_v19, %v3468_v60 }
 0x812   :  { %v3382_v20 = vpop.f32.mrf.mxu3 }
 0x813   :  { %v3383_v22 = vadd.f32 %v3382_v20, %v7730_v18  ;;  %3772 = vmatmul.bf16.gmra.mxu2 %v3529_v5  ;;  %3870 = vmatmul.bf16.gmra.mxu0 %v3529_v5 }
 0x814   :  { %v3434_v23 = vpop.f32.mrf.mxu0 }
 0x815   :  { %v3469_v49 = vmax.f32 %v3383_v22, 0.0  ;;  %v3435_v12 = vadd.f32 %v3434_v23, %v7727_v47 }
 0x817   :  { %v3528_v13 = vpack.c.bf16 %v3469_v49, %v3467_v25  ;;  %v3472_v62 = vmax.f32 %v3435_v12, 0.0 }
 0x819   :  { %3723 = vmatmul.bf16.gmra.mxu1 %v3528_v13  ;;  %3821 = vmatmul.bf16.gmra.mxu3 %v3528_v13 }
 0x81a   :  { %v3385_v27 = vpop.f32.mrf.mxu3 }
 0x81b   :  { %v3386_v36 = vadd.f32 %v3385_v27, %v7730_v18 }
 0x81c   :  { %v3436_v7 = vpop.f32.mrf.mxu0 }
 0x81d   :  { %v3437_v4 = vadd.f32 %v3436_v7, %v7727_v47  ;;  %v3471_v11 = vmax.f32 %v3386_v36, 0.0 }
 0x81f   :  { %v3474_v34 = vmax.f32 %v3437_v4, 0.0 }
 0x821   :  { %v3531_v1 = vpack.c.bf16 %v3474_v34, %v3472_v62 }
 0x822   :  { %v3387_v33 = vpop.f32.mrf.mxu3 }
 0x823   :  { %v3388_v56 = vadd.f32 %v3387_v33, %v7730_v18  ;;  %3777 = vmatmul.bf16.gmra.mxu2 %v3531_v1  ;;  %3875 = vmatmul.bf16.gmra.mxu0 %v3531_v1  ;;  %v5591_v33 = vld [vmem:[#allocation31 + $0x40] sm:$0xff] }
 0x824   :  { %v3439_v59 = vpop.f32.mrf.mxu0  ;;  %4137 = vmatpush.bf16.msrb.mxu2 %v5591_v33 }
 0x825   :  { %v3473_v6 = vmax.f32 %v3388_v56, 0.0  ;;  %v3440_v39 = vadd.f32 %v3439_v59, %v7727_v47 }
 0x827   :  { %v3530_v9 = vpack.c.bf16 %v3473_v6, %v3471_v11  ;;  %v3476_v29 = vmax.f32 %v3440_v39, 0.0  ;;  %v3523_v39 = vld [vmem:[%s7970_s25] sm:$0x3] }
 0x829   :  { %3728 = vmatmul.bf16.gmra.mxu1 %v3530_v9  ;;  %3826 = vmatmul.bf16.gmra.mxu3 %v3530_v9  ;;  %v5583_v9 = vld [vmem:[#allocation31] sm:$0xff] }
 0x82a   :  { %v3390_v45 = vpop.f32.mrf.mxu3  ;;  %4088 = vmatpush.bf16.msrb.mxu1 %v5583_v9 }
 0x82b   :  { %v3391_v14 = vadd.f32 %v3390_v45, %v7730_v18 }
 0x82c   :  { %v3441_v24 = vpop.f32.mrf.mxu0 }
 0x82d   :  { %v3442_v28 = vadd.f32 %v3441_v24, %v7727_v47  ;;  %v3475_v61 = vmax.f32 %v3391_v14, 0.0 }
 0x82f   :  { %v3478_v31 = vmax.f32 %v3442_v28, 0.0 }
 0x831   :  { %v3533_v3 = vpack.c.bf16 %v3478_v31, %v3476_v29  ;;  %v7764_v29 = vperm.slane %v3523_v39, 0 }
 0x832   :  { %v3392_v15 = vpop.f32.mrf.mxu3 }
 0x833   :  { %v3393_v54 = vadd.f32 %v3392_v15, %v7730_v18  ;;  %3782 = vmatmul.bf16.gmra.mxu2 %v3533_v3  ;;  %3880 = vmatmul.bf16.gmra.mxu0 %v3533_v3  ;;  %v7767_v3 = vperm.slane %v3523_v39, 1 }
 0x834   :  { %v3444_v52 = vpop.f32.mrf.mxu0 }
 0x835   :  { %v3477_v38 = vmax.f32 %v3393_v54, 0.0  ;;  %v3445_v57 = vadd.f32 %v3444_v52, %v7727_v47 }
 0x837   :  { %v3532_v16 = vpack.c.bf16 %v3477_v38, %v3475_v61  ;;  %v3480_v46 = vmax.f32 %v3445_v57, 0.0 }
 0x839   :  { %3733 = vmatmul.bf16.gmra.mxu1 %v3532_v16  ;;  %3831 = vmatmul.bf16.gmra.mxu3 %v3532_v16 }
 0x83a   :  { %v3395_v44 = vpop.f32.mrf.mxu3 }
 0x83b   :  { %v3396_v17 = vadd.f32 %v3395_v44, %v7730_v18 }
 0x83c   :  { %v3446_v21 = vpop.f32.mrf.mxu0 }
 0x83d   :  { %v3447_v10 = vadd.f32 %v3446_v21, %v7727_v47  ;;  %v3479_v42 = vmax.f32 %v3396_v17, 0.0 }
 0x83f   :  { %v3482_v35 = vmax.f32 %v3447_v10, 0.0 }
 0x841   :  { %v3535_v41 = vpack.c.bf16 %v3482_v35, %v3480_v46 }
 0x842   :  { %v3397_v48 = vpop.f32.mrf.mxu3 }
 0x843   :  { %v3398_v50 = vadd.f32 %v3397_v48, %v7730_v18  ;;  %3787 = vmatmul.bf16.gmra.mxu2 %v3535_v41  ;;  %3885 = vmatmul.bf16.gmra.mxu0 %v3535_v41 }
 0x844   :  { %v3449_v51 = vpop.f32.mrf.mxu0 }
 0x845   :  { %v3481_v0 = vmax.f32 %v3398_v50, 0.0  ;;  %v3450_v60 = vadd.f32 %v3449_v51, %v7727_v47 }
 0x847   :  { %v3534_v53 = vpack.c.bf16 %v3481_v0, %v3479_v42  ;;  %v3484_v5 = vmax.f32 %v3450_v60, 0.0 }
 0x849   :  { %3738 = vmatmul.bf16.gmra.mxu1 %v3534_v53  ;;  %3836 = vmatmul.bf16.gmra.mxu3 %v3534_v53 }
 0x84a   :  { %v3400_v30 = vpop.f32.mrf.mxu3 }
 0x84b   :  { %v3401_v20 = vadd.f32 %v3400_v30, %v7730_v18 }
 0x84c   :  { %v3451_v19 = vpop.f32.mrf.mxu0 }
 0x84d   :  { %v3452_v55 = vadd.f32 %v3451_v19, %v7727_v47  ;;  %v3483_v13 = vmax.f32 %v3401_v20, 0.0 }
 0x84f   :  { %v3486_v58 = vmax.f32 %v3452_v55, 0.0 }
 0x851   :  { %v3537_v22 = vpack.c.bf16 %v3486_v58, %v3484_v5 }
 0x852   :  { %v3402_v23 = vpop.f32.mrf.mxu3 }
 0x853   :  { %v3403_v25 = vadd.f32 %v3402_v23, %v7730_v18  ;;  %3792 = vmatmul.bf16.gmra.mxu2 %v3537_v22  ;;  %3890 = vmatmul.bf16.gmra.mxu0 %v3537_v22 }
 0x854   :  { %v3454_v49 = vpop.f32.mrf.mxu0 }
 0x855   :  { %v3485_v27 = vmax.f32 %v3403_v25, 0.0  ;;  %v3455_v4 = vadd.f32 %v3454_v49, %v7727_v47 }
 0x857   :  { %v3536_v12 = vpack.c.bf16 %v3485_v27, %v3483_v13  ;;  %v3488_v36 = vmax.f32 %v3455_v4, 0.0 }
 0x859   :  { %3743 = vmatmul.bf16.gmra.mxu1 %v3536_v12  ;;  %3841 = vmatmul.bf16.gmra.mxu3 %v3536_v12 }
 0x85a   :  { %v3405_v7 = vpop.f32.mrf.mxu3 }
 0x85b   :  { %v3406_v37 = vadd.f32 %v3405_v7, %v7730_v18 }
 0x85c   :  { %v3456_v62 = vpop.f32.mrf.mxu0 }
 0x85d   :  { %v3457_v34 = vadd.f32 %v3456_v62, %v7727_v47  ;;  %v3487_v11 = vmax.f32 %v3406_v37, 0.0 }
 0x85f   :  { %v3490_v1 = vmax.f32 %v3457_v34, 0.0 }
 0x861   :  { %v3539_v40 = vpack.c.bf16 %v3490_v1, %v3488_v36 }
 0x862   :  { %v3407_v56 = vpop.f32.mrf.mxu3 }
 0x863   :  { %v3408_v59 = vadd.f32 %v3407_v56, %v7730_v18  ;;  %3797 = vmatmul.bf16.gmra.mxu2 %v3539_v40  ;;  %3895 = vmatmul.bf16.gmra.mxu0 %v3539_v40 }
 0x865   :  { %v3489_v6 = vmax.f32 %v3408_v59, 0.0 }
 0x867   :  { %v3538_v45 = vpack.c.bf16 %v3489_v6, %v3487_v11 }
 0x869   :  { %3748 = vmatmul.bf16.gmra.mxu1 %v3538_v45  ;;  %3846 = vmatmul.bf16.gmra.mxu3 %v3538_v45 }
 0x870   :  { %v3861_v47 = vpop.f32.mrf.mxu0 }
 0x876   :  { %v3714_v24 = vpop.f32.mrf.mxu1  ;;  %v3763_v28 = vpop.f32.mrf.mxu2 }
 0x877   :  { %v3715_v14 = vadd.f32 %v3714_v24, %v7764_v29 }
 0x878   :  { %v3863_v31 = vpop.f32.mrf.mxu0 }
 0x879   :  { %v3764_v15 = vadd.f32 %v3763_v28, %v3715_v14 }
 0x87b   :  { %v3901_v16 = vmax.f32 %v3764_v15, 0.0 }
 0x87c   :  { %v3812_v18 = vpop.f32.mrf.mxu3 }
 0x87d   :  { %v3813_v61 = vadd.f32 %v3812_v18, %v7767_v3 }
 0x87e   :  { %v3716_v63 = vpop.f32.mrf.mxu1  ;;  %v3765_v43 = vpop.f32.mrf.mxu2 }
 0x87f   :  { %v3717_v54 = vadd.f32 %v3716_v63, %v7764_v29  ;;  %v3862_v21 = vadd.f32 %v3861_v47, %v3813_v61 }
 0x880   :  { %v3866_v52 = vpop.f32.mrf.mxu0 }
 0x881   :  { %v3766_v38 = vadd.f32 %v3765_v43, %v3717_v54  ;;  %v3902_v2 = vmax.f32 %v3862_v21, 0.0 }
 0x883   :  { %v3903_v44 = vmax.f32 %v3766_v38, 0.0 }
 0x884   :  { %v3814_v57 = vpop.f32.mrf.mxu3 }
 0x885   :  { %v3966_v10 = vpack.c.bf16 %v3903_v44, %v3901_v16  ;;  %v3815_v46 = vadd.f32 %v3814_v57, %v7767_v3 }
 0x886   :  { %v3719_v35 = vpop.f32.mrf.mxu1  ;;  %v3768_v17 = vpop.f32.mrf.mxu2 }
 0x887   :  { %v3864_v41 = vadd.f32 %v3863_v31, %v3815_v46  ;;  %4089 = vmatmul.bf16.vlgmr.msrb.gmra.mxu1 %v3966_v10  ;;  %v3720_v51 = vadd.f32 %v3719_v35, %v7764_v29 }
 0x888   :  { %v3868_v26 = vpop.f32.mrf.mxu0 }
 0x889   :  { %v3904_v48 = vmax.f32 %v3864_v41, 0.0  ;;  %v3769_v32 = vadd.f32 %v3768_v17, %v3720_v51 }
 0x88b   :  { %v3967_v50 = vpack.c.bf16 %v3904_v48, %v3902_v2  ;;  %v3905_v5 = vmax.f32 %v3769_v32, 0.0 }
 0x88c   :  { %v3817_v42 = vpop.f32.mrf.mxu3 }
 0x88d   :  { %4138 = vmatmul.bf16.vlgmr.msrb.gmra.mxu2 %v3967_v50  ;;  %v3818_v19 = vadd.f32 %v3817_v42, %v7767_v3 }
 0x88e   :  { %v3721_v0 = vpop.f32.mrf.mxu1  ;;  %v3770_v53 = vpop.f32.mrf.mxu2 }
 0x88f   :  { %v3722_v30 = vadd.f32 %v3721_v0, %v7764_v29  ;;  %v3867_v20 = vadd.f32 %v3866_v52, %v3818_v19 }
 0x890   :  { %v3871_v60 = vpop.f32.mrf.mxu0 }
 0x891   :  { %v3771_v55 = vadd.f32 %v3770_v53, %v3722_v30  ;;  %v3906_v12 = vmax.f32 %v3867_v20, 0.0 }
 0x893   :  { %v3907_v58 = vmax.f32 %v3771_v55, 0.0 }
 0x894   :  { %v3819_v8 = vpop.f32.mrf.mxu3 }
 0x895   :  { %v3820_v22 = vadd.f32 %v3819_v8, %v7767_v3  ;;  %v3968_v23 = vpack.c.bf16 %v3907_v58, %v3905_v5 }
 0x896   :  { %v3724_v25 = vpop.f32.mrf.mxu1  ;;  %v3773_v49 = vpop.f32.mrf.mxu2 }
 0x897   :  { %v3869_v13 = vadd.f32 %v3868_v26, %v3820_v22  ;;  %4094 = vmatmul.bf16.gmra.mxu1 %v3968_v23  ;;  %v3725_v4 = vadd.f32 %v3724_v25, %v7764_v29 }
 0x898   :  { %v3873_v27 = vpop.f32.mrf.mxu0 }
 0x899   :  { %v3908_v7 = vmax.f32 %v3869_v13, 0.0  ;;  %v3774_v37 = vadd.f32 %v3773_v49, %v3725_v4 }
 0x89b   :  { %v3969_v62 = vpack.c.bf16 %v3908_v7, %v3906_v12  ;;  %v3909_v11 = vmax.f32 %v3774_v37, 0.0 }
 0x89c   :  { %v3822_v34 = vpop.f32.mrf.mxu3 }
 0x89d   :  { %4143 = vmatmul.bf16.gmra.mxu2 %v3969_v62  ;;  %v3823_v56 = vadd.f32 %v3822_v34, %v7767_v3 }
 0x89e   :  { %v3726_v36 = vpop.f32.mrf.mxu1  ;;  %v3775_v1 = vpop.f32.mrf.mxu2 }
 0x89f   :  { %v3727_v40 = vadd.f32 %v3726_v36, %v7764_v29  ;;  %v3872_v45 = vadd.f32 %v3871_v60, %v3823_v56 }
 0x8a0   :  { %v3876_v33 = vpop.f32.mrf.mxu0 }
 0x8a1   :  { %v3776_v59 = vadd.f32 %v3775_v1, %v3727_v40  ;;  %v3910_v18 = vmax.f32 %v3872_v45, 0.0 }
 0x8a3   :  { %v3911_v6 = vmax.f32 %v3776_v59, 0.0 }
 0x8a4   :  { %v3824_v9 = vpop.f32.mrf.mxu3 }
 0x8a5   :  { %v3825_v47 = vadd.f32 %v3824_v9, %v7767_v3  ;;  %v3970_v39 = vpack.c.bf16 %v3911_v6, %v3909_v11 }
 0x8a6   :  { %v3729_v24 = vpop.f32.mrf.mxu1  ;;  %v3778_v28 = vpop.f32.mrf.mxu2 }
 0x8a7   :  { %v3874_v31 = vadd.f32 %v3873_v27, %v3825_v47  ;;  %4099 = vmatmul.bf16.gmra.mxu1 %v3970_v39  ;;  %v3730_v43 = vadd.f32 %v3729_v24, %v7764_v29 }
 0x8a8   :  { %v3878_v14 = vpop.f32.mrf.mxu0 }
 0x8a9   :  { %v3912_v63 = vmax.f32 %v3874_v31, 0.0  ;;  %v3779_v38 = vadd.f32 %v3778_v28, %v3730_v43 }
 0x8ab   :  { %v3971_v15 = vpack.c.bf16 %v3912_v63, %v3910_v18  ;;  %v3913_v10 = vmax.f32 %v3779_v38, 0.0 }
 0x8ac   :  { %v3827_v54 = vpop.f32.mrf.mxu3 }
 0x8ad   :  { %4148 = vmatmul.bf16.gmra.mxu2 %v3971_v15  ;;  %v3828_v57 = vadd.f32 %v3827_v54, %v7767_v3 }
 0x8ae   :  { %v3731_v52 = vpop.f32.mrf.mxu1  ;;  %v3780_v61 = vpop.f32.mrf.mxu2 }
 0x8af   :  { %v3732_v16 = vadd.f32 %v3731_v52, %v7764_v29  ;;  %v3877_v17 = vadd.f32 %v3876_v33, %v3828_v57 }
 0x8b0   :  { %v3881_v44 = vpop.f32.mrf.mxu0 }
 0x8b1   :  { %v3781_v21 = vadd.f32 %v3780_v61, %v3732_v16  ;;  %v3914_v51 = vmax.f32 %v3877_v17, 0.0 }
 0x8b3   :  { %v3915_v46 = vmax.f32 %v3781_v21, 0.0 }
 0x8b4   :  { %v3829_v35 = vpop.f32.mrf.mxu3 }
 0x8b5   :  { %v3830_v41 = vadd.f32 %v3829_v35, %v7767_v3  ;;  %v3972_v26 = vpack.c.bf16 %v3915_v46, %v3913_v10 }
 0x8b6   :  { %v3734_v2 = vpop.f32.mrf.mxu1  ;;  %v3783_v48 = vpop.f32.mrf.mxu2 }
 0x8b7   :  { %v3879_v50 = vadd.f32 %v3878_v14, %v3830_v41  ;;  %4104 = vmatmul.bf16.gmra.mxu1 %v3972_v26  ;;  %v3735_v53 = vadd.f32 %v3734_v2, %v7764_v29 }
 0x8b8   :  { %v3883_v0 = vpop.f32.mrf.mxu0 }
 0x8b9   :  { %v3916_v42 = vmax.f32 %v3879_v50, 0.0  ;;  %v3784_v55 = vadd.f32 %v3783_v48, %v3735_v53 }
 0x8bb   :  { %v3973_v32 = vpack.c.bf16 %v3916_v42, %v3914_v51  ;;  %v3917_v20 = vmax.f32 %v3784_v55, 0.0 }
 0x8bc   :  { %v3832_v30 = vpop.f32.mrf.mxu3 }
 0x8bd   :  { %4153 = vmatmul.bf16.gmra.mxu2 %v3973_v32  ;;  %v3833_v58 = vadd.f32 %v3832_v30, %v7767_v3 }
 0x8be   :  { %v3736_v60 = vpop.f32.mrf.mxu1  ;;  %v3785_v19 = vpop.f32.mrf.mxu2 }
 0x8bf   :  { %v3737_v5 = vadd.f32 %v3736_v60, %v7764_v29  ;;  %v3882_v49 = vadd.f32 %v3881_v44, %v3833_v58 }
 0x8c0   :  { %v3886_v23 = vpop.f32.mrf.mxu0 }
 0x8c1   :  { %v3786_v8 = vadd.f32 %v3785_v19, %v3737_v5  ;;  %v3918_v62 = vmax.f32 %v3882_v49, 0.0 }
 0x8c3   :  { %v3919_v22 = vmax.f32 %v3786_v8, 0.0 }
 0x8c4   :  { %v3834_v25 = vpop.f32.mrf.mxu3 }
 0x8c5   :  { %v3974_v13 = vpack.c.bf16 %v3919_v22, %v3917_v20  ;;  %v3835_v27 = vadd.f32 %v3834_v25, %v7767_v3 }
 0x8c6   :  { %v3739_v12 = vpop.f32.mrf.mxu1  ;;  %v3788_v7 = vpop.f32.mrf.mxu2 }
 0x8c7   :  { %v3884_v4 = vadd.f32 %v3883_v0, %v3835_v27  ;;  %4109 = vmatmul.bf16.gmra.mxu1 %v3974_v13  ;;  %v3740_v36 = vadd.f32 %v3739_v12, %v7764_v29 }
 0x8c8   :  { %v3888_v40 = vpop.f32.mrf.mxu0 }
 0x8c9   :  { %v3920_v34 = vmax.f32 %v3884_v4, 0.0  ;;  %v3789_v59 = vadd.f32 %v3788_v7, %v3740_v36 }
 0x8cb   :  { %v3975_v1 = vpack.c.bf16 %v3920_v34, %v3918_v62  ;;  %v3921_v45 = vmax.f32 %v3789_v59, 0.0 }
 0x8cc   :  { %v3837_v37 = vpop.f32.mrf.mxu3 }
 0x8cd   :  { %4158 = vmatmul.bf16.gmra.mxu2 %v3975_v1  ;;  %v3838_v6 = vadd.f32 %v3837_v37, %v7767_v3  ;;  %v7801_v37 = vld [vmem:[%s6693_s12] ss:$0 sm:$0xff]  ;;  %s6512_s12 = smov [#allocation32]  }
 0x8ce   :  { %v3741_v33 = vpop.f32.mrf.mxu1  ;;  %v3790_v56 = vpop.f32.mrf.mxu2  ;;  %s4503_s19 = sshll.u32 %s6512_s12, 4  ;;  %s4504_s19 = int_to_ptr.vmem [resolvable:$true] %s4503_s19 }
 0x8cf   :  { %v3742_v11 = vadd.f32 %v3741_v33, %v7764_v29  ;;  %v3887_v24 = vadd.f32 %v3886_v23, %v3838_v6 }
 0x8d0   :  { %v3891_v43 = vpop.f32.mrf.mxu0 }
 0x8d1   :  { %v3791_v9 = vadd.f32 %v3790_v56, %v3742_v11  ;;  %v3922_v15 = vmax.f32 %v3887_v24, 0.0 }
 0x8d3   :  { %v3923_v47 = vmax.f32 %v3791_v9, 0.0 }
 0x8d4   :  { %v3839_v39 = vpop.f32.mrf.mxu3 }
 0x8d5   :  { %v3976_v28 = vpack.c.bf16 %v3923_v47, %v3921_v45  ;;  %v3840_v31 = vadd.f32 %v3839_v39, %v7767_v3 }
 0x8d6   :  { %v3744_v14 = vpop.f32.mrf.mxu1  ;;  %v3793_v18 = vpop.f32.mrf.mxu2 }
 0x8d7   :  { %v3889_v63 = vadd.f32 %v3888_v40, %v3840_v31  ;;  %4114 = vmatmul.bf16.gmra.mxu1 %v3976_v28  ;;  %v3745_v52 = vadd.f32 %v3744_v14, %v7764_v29 }
 0x8d8   :  { %v3893_v35 = vpop.f32.mrf.mxu0 }
 0x8d9   :  { %v3924_v54 = vmax.f32 %v3889_v63, 0.0  ;;  %v3794_v57 = vadd.f32 %v3793_v18, %v3745_v52 }
 0x8db   :  { %v3977_v61 = vpack.c.bf16 %v3924_v54, %v3922_v15  ;;  %v3925_v17 = vmax.f32 %v3794_v57, 0.0 }
 0x8dc   :  { %v3842_v38 = vpop.f32.mrf.mxu3 }
 0x8dd   :  { %4163 = vmatmul.bf16.gmra.mxu2 %v3977_v61  ;;  %v3843_v10 = vadd.f32 %v3842_v38, %v7767_v3 }
 0x8de   :  { %v3746_v16 = vpop.f32.mrf.mxu1  ;;  %v3795_v44 = vpop.f32.mrf.mxu2 }
 0x8df   :  { %v3747_v21 = vadd.f32 %v3746_v16, %v7764_v29  ;;  %v3892_v2 = vadd.f32 %v3891_v43, %v3843_v10 }
 0x8e0   :  { %v3896_v19 = vpop.f32.mrf.mxu0 }
 0x8e1   :  { %v3796_v46 = vadd.f32 %v3795_v44, %v3747_v21  ;;  %v3926_v53 = vmax.f32 %v3892_v2, 0.0 }
 0x8e3   :  { %v3927_v41 = vmax.f32 %v3796_v46, 0.0 }
 0x8e4   :  { %v3844_v26 = vpop.f32.mrf.mxu3 }
 0x8e5   :  { %v3978_v48 = vpack.c.bf16 %v3927_v41, %v3925_v17  ;;  %v3845_v50 = vadd.f32 %v3844_v26, %v7767_v3 }
 0x8e6   :  { %v3749_v51 = vpop.f32.mrf.mxu1  ;;  %v3798_v42 = vpop.f32.mrf.mxu2 }
 0x8e7   :  { %v3894_v0 = vadd.f32 %v3893_v35, %v3845_v50  ;;  %4119 = vmatmul.bf16.gmra.mxu1 %v3978_v48  ;;  %v3750_v30 = vadd.f32 %v3749_v51, %v7764_v29 }
 0x8e8   :  { %v3898_v4 = vpop.f32.mrf.mxu0 }
 0x8e9   :  { %v3928_v32 = vmax.f32 %v3894_v0, 0.0  ;;  %v3799_v58 = vadd.f32 %v3798_v42, %v3750_v30 }
 0x8eb   :  { %v3979_v60 = vpack.c.bf16 %v3928_v32, %v3926_v53  ;;  %v3929_v25 = vmax.f32 %v3799_v58, 0.0 }
 0x8ec   :  { %v3847_v55 = vpop.f32.mrf.mxu3 }
 0x8ed   :  { %4168 = vmatmul.bf16.gmra.mxu2 %v3979_v60  ;;  %v3848_v22 = vadd.f32 %v3847_v55, %v7767_v3 }
 0x8ee   :  { %v3751_v5 = vpop.f32.mrf.mxu1  ;;  %v3800_v20 = vpop.f32.mrf.mxu2 }
 0x8ef   :  { %v3752_v8 = vadd.f32 %v3751_v5, %v7764_v29  ;;  %v3897_v27 = vadd.f32 %v3896_v19, %v3848_v22 }
 0x8f1   :  { %v3801_v23 = vadd.f32 %v3800_v20, %v3752_v8  ;;  %v3930_v34 = vmax.f32 %v3897_v27, 0.0 }
 0x8f3   :  { %v3931_v49 = vmax.f32 %v3801_v23, 0.0 }
 0x8f4   :  { %v3849_v13 = vpop.f32.mrf.mxu3 }
 0x8f5   :  { %v3980_v12 = vpack.c.bf16 %v3931_v49, %v3929_v25  ;;  %v3850_v7 = vadd.f32 %v3849_v13, %v7767_v3 }
 0x8f7   :  { %v3899_v62 = vadd.f32 %v3898_v4, %v3850_v7  ;;  %4124 = vmatmul.bf16.gmra.mxu1 %v3980_v12 }
 0x8f9   :  { %v3932_v36 = vmax.f32 %v3899_v62, 0.0 }
 0x8fb   :  { %v3981_v1 = vpack.c.bf16 %v3932_v36, %v3930_v34 }
 0x8fd   :  { %4173 = vmatmul.bf16.gmra.mxu2 %v3981_v1 }
 0x904   :  { %v4090_v29 = vpop.f32.mrf.mxu1 }
 0x905   :  { %v4091_v33 = vadd.f32 %v7801_v37, %v4090_v29 }
 0x90c   :  { %v4092_v40 = vpop.f32.mrf.mxu1 }
 0x90d   :  { %v4093_v3 = vadd.f32 %v7801_v37, %v4092_v40 }
 0x910   :  { %v4139_v56 = vpop.f32.mrf.mxu2 }
 0x911   :  { %v4140_v59 = vadd.f32 %v4139_v56, %v4091_v33 }
 0x913   :  { %v5399_v11 = vmul.f32 -1.442695, %v4140_v59 }
 0x914   :  { %v4095_v6 = vpop.f32.mrf.mxu1 }
 0x915   :  { %5832 = vpow2.f32 %v5399_v11  ;;  %v4096_v31 = vadd.f32 %v7801_v37, %v4095_v6 }
 0x918   :  { %v4141_v9 = vpop.f32.mrf.mxu2 }
 0x919   :  { %v4142_v45 = vadd.f32 %v4141_v9, %v4093_v3 }
 0x91b   :  { %v5833_v47 = vpop.eup %5832  ;;  %v5400_v39 = vmul.f32 -1.442695, %v4142_v45 }
 0x91c   :  { %v4227_v24 = vadd.f32 1.0, %v5833_v47  ;;  %v4097_v28 = vpop.f32.mrf.mxu1 }
 0x91d   :  { %5834 = vpow2.f32 %v5400_v39  ;;  %v4098_v16 = vadd.f32 %v7801_v37, %v4097_v28 }
 0x91e   :  { %5836 = vrcp.f32 %v4227_v24  ;;  %v4254_v44 = vand.u32 2147483648, %v4227_v24  ;;  %v4252_v10 = vand.u32 2147483647, %v4227_v24  ;;  %vm4248_vm6 = vweird.f32 %v4227_v24 }
 0x920   :  { %v4144_v14 = vpop.f32.mrf.mxu2  ;;  %v4255_v48 = vor.u32 1.1754944e-38, %v4254_v44 }
 0x921   :  { %v4145_v18 = vadd.f32 %v4144_v14, %v4096_v31 }
 0x923   :  { %v5835_v63 = vpop.eup %5834  ;;  %v5401_v43 = vmul.f32 -1.442695, %v4145_v18 }
 0x924   :  { %v5837_v15 = vpop.eup %5836  ;;  %v7806_v54 = vadd.f32 1.0, %v5835_v63  ;;  %v4100_v52 = vpop.f32.mrf.mxu1 }
 0x925   :  { %v4244_v61 = vmul.f32 %v5837_v15, %v4227_v24  ;;  %5838 = vpow2.f32 %v5401_v43  ;;  %vm4249_vm5 = vweird.f32 %v5837_v15 }
 0x926   :  { %5840 = vrcp.f32 %v7806_v54  ;;  %vm7811_vm9 = vmor %vm4248_vm6, %vm4249_vm5 }
 0x927   :  { %v4245_v38 = vsub.f32 1.0, %v4244_v61 }
 0x928   :  { %v4146_v57 = vpop.f32.mrf.mxu2 }
 0x929   :  { %v4246_v21 = vmul.f32 %v5837_v15, %v4245_v38  ;;  %v4147_v46 = vadd.f32 %v4146_v57, %v4098_v16 }
 0x92b   :  { %v5839_v35 = vpop.eup %5838  ;;  %v4247_v17 = vadd.f32 %v5837_v15, %v4246_v21  ;;  %v5402_v41 = vmul.f32 -1.442695, %v4147_v46 }
 0x92c   :  { %v5841_v26 = vpop.eup %5840  ;;  %v7815_v50 = vadd.f32 1.0, %v5839_v35  ;;  %v4102_v51 = vpop.f32.mrf.mxu1 }
 0x92d   :  { %6377 = shalt.err (!%p6374_p1)
}
 0x92e   :  { %4511 = dma.vmem_to_hbm [thread:$0]  %s4504_s19, 2048, %s4506_s13, [#allocation4], %s6492_s26, %s6492_s26, %s6493_s11   ;;  %v4251_v42 = vsel %vm7811_vm9, %v5837_v15, %v4247_v17  ;;  %vm4253_vm10 = vcmp.eq.f32.partialorder %v4252_v10, 8.507059e+37  ;;  %v4259_v0 = vmul.f32 %v5841_v26, %v7806_v54  ;;  %5842 = vpow2.f32 %v5402_v41 }
 0x92f   :  { %v4256_v53 = vsel %vm4253_vm10, %v4255_v48, %v4251_v42  ;;  %5844 = vrcp.f32 %v7815_v50  ;;  %v4101_v30 = vadd.f32 %v7801_v37, %v4100_v52  ;;  %v4269_v60 = vand.u32 2147483648, %v7806_v54  ;;  %s6513_s4 = smov [#allocation33]   ;;  %s4518_s20 = sshll.u32 %s6703_s9, 4  ;;  %s4519_s20 = int_to_ptr.hbm [resolvable:$true] %s4518_s20 }
 0x930   :  { %4483 = vst [vmem:[#allocation33] sm:$0xff] %v4256_v53  ;;  %v4260_v32 = vsub.f32 1.0, %v4259_v0  ;;  %v4149_v19 = vpop.f32.mrf.mxu2  ;;  %vm4264_vm12 = vweird.f32 %v5841_v26  ;;  %v4267_v5 = vand.u32 2147483647, %v7806_v54  ;;  %vm4263_vm13 = vweird.f32 %v7806_v54  ;;  %s7845_s17 = sshll.u32 %s6513_s4, 4  ;;  %s6514_s3 = smov [#allocation35]   ;;  %s4517_s17 = int_to_ptr.vmem [resolvable:$true] %s7845_s17 }
 0x931   :  { %v4150_v58 = vadd.f32 %v4149_v19, %v4101_v30  ;;  %vm4265_vm14 = vmor %vm4263_vm13, %vm4264_vm12  ;;  %v4270_v25 = vor.u32 1.1754944e-38, %v4269_v60  ;;  %v4103_v62 = vadd.f32 %v7801_v37, %v4102_v51  ;;  %v4284_v34 = vand.u32 2147483648, %v7815_v50  ;;  %s7848_s5 = sshll.u32 %s6514_s3, 4  ;;  %s4531_s0 = sshll.u32 %s6708_s8, 4  ;;  %s4530_s5 = int_to_ptr.vmem [resolvable:$true] %s7848_s5  ;;  %s4532_s0 = int_to_ptr.hbm [resolvable:$true] %s4531_s0 }
 0x932   :  { %v4261_v55 = vmul.f32 %v5841_v26, %v4260_v32  ;;  %vm4268_vm1 = vcmp.eq.f32.partialorder %v4267_v5, 8.507059e+37  ;;  %v4282_v29 = vand.u32 2147483647, %v7815_v50  ;;  %vm4278_vm0 = vweird.f32 %v7815_v50  ;;  %s6390_s22 = sshra.s32 %s4519_s20, 4  ;;  %s6394_s21 = scalar_lea.hbm %s6703_s9, 128  ;;  %s6391_s22 = int_to_ptr.hbm [resolvable:$true] %s6390_s22 }
 0x933   :  { %v5403_v22 = vmul.f32 -1.442695, %v4150_v58  ;;  %v4285_v6 = vor.u32 1.1754944e-38, %v4284_v34  ;;  %s6392_s23 = scalar_lea.hbm %s6391_s22, 128  ;;  %p6395_p3 = scmp.lt.s32.totalorder %s6391_s22, %s6703_s9 }
 0x934   :  { %v5843_v8 = vpop.eup %5842  ;;  %v4262_v20 = vadd.f32 %v5841_v26, %v4261_v55  ;;  %v4105_v13 = vpop.f32.mrf.mxu1  ;;  %vm4283_vm3 = vcmp.eq.f32.partialorder %v4282_v29, 8.507059e+37  ;;  %p6393_p2 = scmp.ne.s32.totalorder %s6391_s22, %s6392_s23  ;;  %p6396_p4 = scmp.lt.s32.totalorder %s6394_s21, %s6392_s23 }
 0x935   :  { %v5845_v23 = vpop.eup %5844  ;;  %v4230_v49 = vadd.f32 1.0, %v5843_v8  ;;  %5846 = vpow2.f32 %v5403_v22  ;;  %v4106_v28 = vadd.f32 %v7801_v37, %v4105_v13 }
 0x936   :  { %v4266_v27 = vsel %vm4265_vm14, %v5841_v26, %v4262_v20  ;;  %v4274_v12 = vmul.f32 %v5845_v23, %v7815_v50  ;;  %vm4279_vm15 = vweird.f32 %v5845_v23  ;;  %p6397_p5 = por %p6396_p4, %p6395_p3 }
 0x937   :  { %v4271_v7 = vsel %vm4268_vm1, %v4270_v25, %v4266_v27  ;;  %5848 = vrcp.f32 %v4230_v49  ;;  %vm4280_vm2 = vmor %vm4278_vm0, %vm4279_vm15  ;;  %v4299_v31 = vand.u32 2147483648, %v4230_v49  ;;  %v4297_v63 = vand.u32 2147483647, %v4230_v49 }
 0x938   :  { %4484 = vst [vmem:[#allocation33 + $0x8] sm:$0xff] %v4271_v7  ;;  %v4275_v4 = vsub.f32 1.0, %v4274_v12  ;;  %v4151_v36 = vpop.f32.mrf.mxu2  ;;  %vm4293_vm8 = vweird.f32 %v4230_v49  ;;  %p6398_p6 = pnand %p6397_p5, %p6393_p2 }
 0x939   :  { %v4152_v40 = vadd.f32 %v4151_v36, %v4103_v62  ;;  %v4300_v38 = vor.u32 1.1754944e-38, %v4299_v31  ;;  %vm4298_vm7 = vcmp.eq.f32.partialorder %v4297_v63, 8.507059e+37 }
 0x93a   :  { %v4276_v1 = vmul.f32 %v5845_v23, %v4275_v4 }
 0x93b   :  { %v5847_v33 = vpop.eup %5846  ;;  %v5404_v59 = vmul.f32 -1.442695, %v4152_v40 }
 0x93c   :  { %v4277_v56 = vadd.f32 %v5845_v23, %v4276_v1  ;;  %v4231_v3 = vadd.f32 1.0, %v5847_v33  ;;  %v4107_v9 = vpop.f32.mrf.mxu1 }
 0x93d   :  { %v5849_v11 = vpop.eup %5848  ;;  %5850 = vpow2.f32 %v5404_v59  ;;  %v4108_v35 = vadd.f32 %v7801_v37, %v4107_v9 }
 0x93e   :  { %v4281_v45 = vsel %vm4280_vm2, %v5845_v23, %v4277_v56  ;;  %v4289_v47 = vmul.f32 %v5849_v11, %v4230_v49  ;;  %5852 = vrcp.f32 %v4231_v3  ;;  %vm4294_vm4 = vweird.f32 %v5849_v11 }
 0x93f   :  { %v4286_v39 = vsel %vm4283_vm3, %v4285_v6, %v4281_v45  ;;  %vm4295_vm11 = vmor %vm4293_vm8, %vm4294_vm4  ;;  %v4314_v17 = vand.u32 2147483648, %v4231_v3  ;;  %v4312_v2 = vand.u32 2147483647, %v4231_v3  ;;  %vm4308_vm6 = vweird.f32 %v4231_v3 }
 0x940   :  { %4485 = vst [vmem:[#allocation33 + $0x10] sm:$0xff] %v4286_v39  ;;  %v4290_v24 = vsub.f32 1.0, %v4289_v47  ;;  %v4154_v14 = vpop.f32.mrf.mxu2 }
 0x941   :  { %v4155_v43 = vadd.f32 %v4154_v14, %v4106_v28  ;;  %v4315_v53 = vor.u32 1.1754944e-38, %v4314_v17  ;;  %vm4313_vm10 = vcmp.eq.f32.partialorder %v4312_v2, 8.507059e+37 }
 0x942   :  { %v4291_v18 = vmul.f32 %v5849_v11, %v4290_v24 }
 0x943   :  { %v5851_v15 = vpop.eup %5850  ;;  %v5405_v52 = vmul.f32 -1.442695, %v4155_v43 }
 0x944   :  { %v4292_v54 = vadd.f32 %v5849_v11, %v4291_v18  ;;  %v5853_v61 = vpop.eup %5852  ;;  %v4232_v16 = vadd.f32 1.0, %v5851_v15  ;;  %v4110_v44 = vpop.f32.mrf.mxu1 }
 0x945   :  { %v4304_v21 = vmul.f32 %v5853_v61, %v4231_v3  ;;  %5854 = vpow2.f32 %v5405_v52  ;;  %vm4309_vm5 = vweird.f32 %v5853_v61  ;;  %v4111_v58 = vadd.f32 %v7801_v37, %v4110_v44 }
 0x946   :  { %v4296_v57 = vsel %vm4295_vm11, %v5849_v11, %v4292_v54  ;;  %5856 = vrcp.f32 %v4232_v16  ;;  %vm4310_vm9 = vmor %vm4308_vm6, %vm4309_vm5  ;;  %v4329_v8 = vand.u32 2147483648, %v4232_v16  ;;  %v4327_v23 = vand.u32 2147483647, %v4232_v16 }
 0x947   :  { %v4301_v10 = vsel %vm4298_vm7, %v4300_v38, %v4296_v57  ;;  %v4305_v46 = vsub.f32 1.0, %v4304_v21  ;;  %vm4323_vm13 = vweird.f32 %v4232_v16 }
 0x948   :  { %4486 = vst [vmem:[#allocation33 + $0x18] sm:$0xff] %v4301_v10  ;;  %v4156_v41 = vpop.f32.mrf.mxu2  ;;  %v4330_v7 = vor.u32 1.1754944e-38, %v4329_v8  ;;  %vm4328_vm1 = vcmp.eq.f32.partialorder %v4327_v23, 8.507059e+37 }
 0x949   :  { %v4306_v26 = vmul.f32 %v5853_v61, %v4305_v46  ;;  %v4157_v48 = vadd.f32 %v4156_v41, %v4108_v35 }
 0x94b   :  { %v5855_v50 = vpop.eup %5854  ;;  %v4307_v51 = vadd.f32 %v5853_v61, %v4306_v26  ;;  %v5406_v42 = vmul.f32 -1.442695, %v4157_v48 }
 0x94c   :  { %v5857_v0 = vpop.eup %5856  ;;  %v4233_v32 = vadd.f32 1.0, %v5855_v50  ;;  %v4112_v30 = vpop.f32.mrf.mxu1 }
 0x94d   :  { %v4311_v60 = vsel %vm4310_vm9, %v5853_v61, %v4307_v51  ;;  %v4319_v19 = vmul.f32 %v5857_v0, %v4232_v16  ;;  %5858 = vpow2.f32 %v5406_v42  ;;  %vm4324_vm12 = vweird.f32 %v5857_v0 }
 0x94e   :  { %v4316_v55 = vsel %vm4313_vm10, %v4315_v53, %v4311_v60  ;;  %5860 = vrcp.f32 %v4233_v32  ;;  %vm4325_vm14 = vmor %vm4323_vm13, %vm4324_vm12  ;;  %v4113_v40 = vadd.f32 %v7801_v37, %v4112_v30  ;;  %v4344_v33 = vand.u32 2147483648, %v4233_v32 }
 0x94f   :  { %4487 = vst [vmem:[#allocation33 + $0x20] sm:$0xff] %v4316_v55  ;;  %v4320_v5 = vsub.f32 1.0, %v4319_v19  ;;  %v4342_v11 = vand.u32 2147483647, %v4233_v32  ;;  %vm4338_vm0 = vweird.f32 %v4233_v32 }
 0x950   :  { %v4159_v20 = vpop.f32.mrf.mxu2  ;;  %v4345_v39 = vor.u32 1.1754944e-38, %v4344_v33 }
 0x951   :  { %v4321_v22 = vmul.f32 %v5857_v0, %v4320_v5  ;;  %v4160_v25 = vadd.f32 %v4159_v20, %v4111_v58  ;;  %vm4343_vm3 = vcmp.eq.f32.partialorder %v4342_v11, 8.507059e+37 }
 0x953   :  { %v5859_v49 = vpop.eup %5858  ;;  %v4322_v13 = vadd.f32 %v5857_v0, %v4321_v22  ;;  %v5407_v27 = vmul.f32 -1.442695, %v4160_v25 }
 0x954   :  { %v5861_v12 = vpop.eup %5860  ;;  %v4234_v4 = vadd.f32 1.0, %v5859_v49  ;;  %v4115_v62 = vpop.f32.mrf.mxu1 }
 0x955   :  { %v4326_v34 = vsel %vm4325_vm14, %v5857_v0, %v4322_v13  ;;  %v4334_v36 = vmul.f32 %v5861_v12, %v4233_v32  ;;  %5862 = vpow2.f32 %v5407_v27  ;;  %vm4339_vm15 = vweird.f32 %v5861_v12 }
 0x956   :  { %v4331_v1 = vsel %vm4328_vm1, %v4330_v7, %v4326_v34  ;;  %5864 = vrcp.f32 %v4234_v4  ;;  %vm4340_vm2 = vmor %vm4338_vm0, %vm4339_vm15  ;;  %v4116_v43 = vadd.f32 %v7801_v37, %v4115_v62  ;;  %v4359_v15 = vand.u32 2147483648, %v4234_v4 }
 0x957   :  { %4488 = vst [vmem:[#allocation33 + $0x28] sm:$0xff] %v4331_v1  ;;  %v4335_v29 = vsub.f32 1.0, %v4334_v36  ;;  %v4357_v61 = vand.u32 2147483647, %v4234_v4  ;;  %vm4353_vm8 = vweird.f32 %v4234_v4 }
 0x958   :  { %v4161_v56 = vpop.f32.mrf.mxu2  ;;  %v4360_v10 = vor.u32 1.1754944e-38, %v4359_v15 }
 0x959   :  { %v4336_v59 = vmul.f32 %v5861_v12, %v4335_v29  ;;  %v4162_v6 = vadd.f32 %v4161_v56, %v4113_v40  ;;  %vm4358_vm7 = vcmp.eq.f32.partialorder %v4357_v61, 8.507059e+37 }
 0x95b   :  { %v5863_v3 = vpop.eup %5862  ;;  %v4337_v9 = vadd.f32 %v5861_v12, %v4336_v59  ;;  %v5408_v45 = vmul.f32 -1.442695, %v4162_v6 }
 0x95c   :  { %v5865_v47 = vpop.eup %5864  ;;  %v4235_v24 = vadd.f32 1.0, %v5863_v3  ;;  %v4117_v28 = vpop.f32.mrf.mxu1 }
 0x95d   :  { %v4341_v31 = vsel %vm4340_vm2, %v5861_v12, %v4337_v9  ;;  %v4349_v14 = vmul.f32 %v5865_v47, %v4234_v4  ;;  %5866 = vpow2.f32 %v5408_v45  ;;  %vm4354_vm4 = vweird.f32 %v5865_v47 }
 0x95e   :  { %v4346_v18 = vsel %vm4343_vm3, %v4345_v39, %v4341_v31  ;;  %5868 = vrcp.f32 %v4235_v24  ;;  %vm4355_vm11 = vmor %vm4353_vm8, %vm4354_vm4  ;;  %v4118_v48 = vadd.f32 %v7801_v37, %v4117_v28  ;;  %v4374_v50 = vand.u32 2147483648, %v4235_v24 }
 0x95f   :  { %4489 = vst [vmem:[#allocation33 + $0x30] sm:$0xff] %v4346_v18  ;;  %v4350_v63 = vsub.f32 1.0, %v4349_v14  ;;  %v4372_v0 = vand.u32 2147483647, %v4235_v24  ;;  %vm4368_vm6 = vweird.f32 %v4235_v24 }
 0x960   :  { %v4164_v54 = vpop.f32.mrf.mxu2  ;;  %v4375_v55 = vor.u32 1.1754944e-38, %v4374_v50 }
 0x961   :  { %v4351_v52 = vmul.f32 %v5865_v47, %v4350_v63  ;;  %v4165_v38 = vadd.f32 %v4164_v54, %v4116_v43  ;;  %vm4373_vm10 = vcmp.eq.f32.partialorder %v4372_v0, 8.507059e+37 }
 0x963   :  { %v5867_v16 = vpop.eup %5866  ;;  %v4352_v44 = vadd.f32 %v5865_v47, %v4351_v52  ;;  %v5409_v57 = vmul.f32 -1.442695, %v4165_v38 }
 0x964   :  { %v5869_v21 = vpop.eup %5868  ;;  %v4236_v46 = vadd.f32 1.0, %v5867_v16  ;;  %v4120_v26 = vpop.f32.mrf.mxu1 }
 0x965   :  { %v4356_v35 = vsel %vm4355_vm11, %v5865_v47, %v4352_v44  ;;  %v4364_v17 = vmul.f32 %v5869_v21, %v4235_v24  ;;  %5870 = vpow2.f32 %v5409_v57  ;;  %vm4369_vm5 = vweird.f32 %v5869_v21 }
 0x966   :  { %v4361_v41 = vsel %vm4358_vm7, %v4360_v10, %v4356_v35  ;;  %5872 = vrcp.f32 %v4236_v46  ;;  %vm4370_vm9 = vmor %vm4368_vm6, %vm4369_vm5  ;;  %v4121_v23 = vadd.f32 %v7801_v37, %v4120_v26  ;;  %v4389_v25 = vand.u32 2147483648, %v4236_v46 }
 0x967   :  { %4490 = vst [vmem:[#allocation33 + $0x38] sm:$0xff] %v4361_v41  ;;  %v4365_v2 = vsub.f32 1.0, %v4364_v17  ;;  %v4387_v12 = vand.u32 2147483647, %v4236_v46  ;;  %vm4383_vm13 = vweird.f32 %v4236_v46 }
 0x968   :  { %v4166_v51 = vpop.f32.mrf.mxu2  ;;  %v4390_v1 = vor.u32 1.1754944e-38, %v4389_v25 }
 0x969   :  { %v4366_v42 = vmul.f32 %v5869_v21, %v4365_v2  ;;  %v4167_v53 = vadd.f32 %v4166_v51, %v4118_v48  ;;  %vm4388_vm1 = vcmp.eq.f32.partialorder %v4387_v12, 8.507059e+37 }
 0x96b   :  { %v5871_v32 = vpop.eup %5870  ;;  %v4367_v30 = vadd.f32 %v5869_v21, %v4366_v42  ;;  %v5410_v60 = vmul.f32 -1.442695, %v4167_v53 }
 0x96c   :  { %v5873_v19 = vpop.eup %5872  ;;  %v4237_v5 = vadd.f32 1.0, %v5871_v32  ;;  %v4122_v49 = vpop.f32.mrf.mxu1 }
 0x96d   :  { %v4371_v58 = vsel %vm4370_vm9, %v5869_v21, %v4367_v30  ;;  %v4379_v8 = vmul.f32 %v5873_v19, %v4236_v46  ;;  %5874 = vpow2.f32 %v5410_v60  ;;  %vm4384_vm12 = vweird.f32 %v5873_v19 }
 0x96e   :  { %v4376_v20 = vsel %vm4373_vm10, %v4375_v55, %v4371_v58  ;;  %5876 = vrcp.f32 %v4237_v5  ;;  %vm4385_vm14 = vmor %vm4383_vm13, %vm4384_vm12  ;;  %v4123_v11 = vadd.f32 %v7801_v37, %v4122_v49  ;;  %v4404_v6 = vand.u32 2147483648, %v4237_v5 }
 0x96f   :  { %4491 = vst [vmem:[#allocation33 + $0x40] sm:$0xff] %v4376_v20  ;;  %v4380_v22 = vsub.f32 1.0, %v4379_v8  ;;  %v4402_v45 = vand.u32 2147483647, %v4237_v5  ;;  %vm4398_vm0 = vweird.f32 %v4237_v5 }
 0x970   :  { %v4169_v13 = vpop.f32.mrf.mxu2  ;;  %v4405_v18 = vor.u32 1.1754944e-38, %v4404_v6 }
 0x971   :  { %v4381_v27 = vmul.f32 %v5873_v19, %v4380_v22  ;;  %v4170_v7 = vadd.f32 %v4169_v13, %v4121_v23  ;;  %vm4403_vm3 = vcmp.eq.f32.partialorder %v4402_v45, 8.507059e+37 }
 0x973   :  { %v5875_v4 = vpop.eup %5874  ;;  %v4382_v62 = vadd.f32 %v5873_v19, %v4381_v27  ;;  %v5411_v34 = vmul.f32 -1.442695, %v4170_v7 }
 0x974   :  { %v5877_v36 = vpop.eup %5876  ;;  %v4238_v29 = vadd.f32 1.0, %v5875_v4  ;;  %v4125_v39 = vpop.f32.mrf.mxu1 }
 0x975   :  { %v4386_v40 = vsel %vm4385_vm14, %v5873_v19, %v4382_v62  ;;  %v4394_v33 = vmul.f32 %v5877_v36, %v4237_v5  ;;  %5878 = vpow2.f32 %v5411_v34  ;;  %vm4399_vm15 = vweird.f32 %v5877_v36 }
 0x976   :  { %v4391_v56 = vsel %vm4388_vm1, %v4390_v1, %v4386_v40  ;;  %5880 = vrcp.f32 %v4238_v29  ;;  %vm4400_vm2 = vmor %vm4398_vm0, %vm4399_vm15  ;;  %v4126_v61 = vadd.f32 %v7801_v37, %v4125_v39  ;;  %v4419_v38 = vand.u32 2147483648, %v4238_v29 }
 0x977   :  { %4492 = vst [vmem:[#allocation33 + $0x48] sm:$0xff] %v4391_v56  ;;  %v4395_v59 = vsub.f32 1.0, %v4394_v33  ;;  %v4417_v57 = vand.u32 2147483647, %v4238_v29  ;;  %vm4413_vm8 = vweird.f32 %v4238_v29 }
 0x978   :  { %v4171_v3 = vpop.f32.mrf.mxu2  ;;  %v4420_v41 = vor.u32 1.1754944e-38, %v4419_v38 }
 0x979   :  { %v4396_v9 = vmul.f32 %v5877_v36, %v4395_v59  ;;  %v4172_v47 = vadd.f32 %v4171_v3, %v4123_v11  ;;  %vm4418_vm7 = vcmp.eq.f32.partialorder %v4417_v57, 8.507059e+37 }
 0x97b   :  { %v5879_v24 = vpop.eup %5878  ;;  %v4397_v28 = vadd.f32 %v5877_v36, %v4396_v9  ;;  %v5412_v31 = vmul.f32 -1.442695, %v4172_v47 }
 0x97c   :  { %v5881_v14 = vpop.eup %5880  ;;  %v4239_v63 = vadd.f32 1.0, %v5879_v24  ;;  %v4127_v2 = vpop.f32.mrf.mxu1 }
 0x97d   :  { %v4401_v43 = vsel %vm4400_vm2, %v5877_v36, %v4397_v28  ;;  %v4409_v15 = vmul.f32 %v5881_v14, %v4238_v29  ;;  %5882 = vpow2.f32 %v5412_v31  ;;  %vm4414_vm4 = vweird.f32 %v5881_v14 }
 0x97e   :  { %v4406_v54 = vsel %vm4403_vm3, %v4405_v18, %v4401_v43  ;;  %5884 = vrcp.f32 %v4239_v63  ;;  %vm4415_vm11 = vmor %vm4413_vm8, %vm4414_vm4  ;;  %v4128_v0 = vadd.f32 %v7801_v37, %v4127_v2  ;;  %v4434_v53 = vand.u32 2147483648, %v4239_v63 }
 0x97f   :  { %4493 = vst [vmem:[#allocation33 + $0x50] sm:$0xff] %v4406_v54  ;;  %v4410_v52 = vsub.f32 1.0, %v4409_v15  ;;  %v4432_v60 = vand.u32 2147483647, %v4239_v63  ;;  %vm4428_vm6 = vweird.f32 %v4239_v63 }
 0x980   :  { %v4174_v16 = vpop.f32.mrf.mxu2  ;;  %v4435_v20 = vor.u32 1.1754944e-38, %v4434_v53 }
 0x981   :  { %v4411_v44 = vmul.f32 %v5881_v14, %v4410_v52  ;;  %v4175_v21 = vadd.f32 %v4174_v16, %v4126_v61  ;;  %vm4433_vm10 = vcmp.eq.f32.partialorder %v4432_v60, 8.507059e+37 }
 0x983   :  { %v5883_v10 = vpop.eup %5882  ;;  %v4412_v46 = vadd.f32 %v5881_v14, %v4411_v44  ;;  %v5413_v35 = vmul.f32 -1.442695, %v4175_v21 }
 0x984   :  { %v5885_v17 = vpop.eup %5884  ;;  %v4240_v26 = vadd.f32 1.0, %v5883_v10 }
 0x985   :  { %v4416_v48 = vsel %vm4415_vm11, %v5881_v14, %v4412_v46  ;;  %v4424_v50 = vmul.f32 %v5885_v17, %v4239_v63  ;;  %5886 = vpow2.f32 %v5413_v35  ;;  %vm4429_vm5 = vweird.f32 %v5885_v17 }
 0x986   :  { %v4421_v51 = vsel %vm4418_vm7, %v4420_v41, %v4416_v48  ;;  %5888 = vrcp.f32 %v4240_v26  ;;  %vm4430_vm9 = vmor %vm4428_vm6, %vm4429_vm5  ;;  %v4449_v13 = vand.u32 2147483648, %v4240_v26  ;;  %v4447_v12 = vand.u32 2147483647, %v4240_v26 }
 0x987   :  { %4494 = vst [vmem:[#allocation33 + $0x58] sm:$0xff] %v4421_v51  ;;  %v4425_v42 = vsub.f32 1.0, %v4424_v50  ;;  %vm4443_vm13 = vweird.f32 %v4240_v26 }
 0x988   :  { %v4176_v32 = vpop.f32.mrf.mxu2  ;;  %v4450_v34 = vor.u32 1.1754944e-38, %v4449_v13  ;;  %vm4448_vm1 = vcmp.eq.f32.partialorder %v4447_v12, 8.507059e+37 }
 0x989   :  { %v4426_v30 = vmul.f32 %v5885_v17, %v4425_v42  ;;  %v4177_v19 = vadd.f32 %v4176_v32, %v4128_v0 }
 0x98b   :  { %v5887_v55 = vpop.eup %5886  ;;  %v4427_v5 = vadd.f32 %v5885_v17, %v4426_v30  ;;  %v5414_v58 = vmul.f32 -1.442695, %v4177_v19 }
 0x98c   :  { %v5889_v8 = vpop.eup %5888  ;;  %v4241_v22 = vadd.f32 1.0, %v5887_v55 }
 0x98d   :  { %v4431_v23 = vsel %vm4430_vm9, %v5885_v17, %v4427_v5  ;;  %v4439_v25 = vmul.f32 %v5889_v8, %v4240_v26  ;;  %5890 = vpow2.f32 %v5414_v58  ;;  %vm4444_vm12 = vweird.f32 %v5889_v8 }
 0x98e   :  { %v4436_v49 = vsel %vm4433_vm10, %v4435_v20, %v4431_v23  ;;  %5892 = vrcp.f32 %v4241_v22  ;;  %vm4445_vm14 = vmor %vm4443_vm13, %vm4444_vm12  ;;  %v4464_v56 = vand.u32 2147483648, %v4241_v22  ;;  %v4462_v11 = vand.u32 2147483647, %v4241_v22 }
 0x98f   :  { %4495 = vst [vmem:[#allocation33 + $0x60] sm:$0xff] %v4436_v49  ;;  %v4440_v37 = vsub.f32 1.0, %v4439_v25  ;;  %vm4458_vm0 = vweird.f32 %v4241_v22 }
 0x990   :  { %v4465_v9 = vor.u32 1.1754944e-38, %v4464_v56  ;;  %vm4463_vm3 = vcmp.eq.f32.partialorder %v4462_v11, 8.507059e+37 }
 0x991   :  { %v4441_v27 = vmul.f32 %v5889_v8, %v4440_v37 }
 0x993   :  { %v5891_v7 = vpop.eup %5890  ;;  %v4442_v4 = vadd.f32 %v5889_v8, %v4441_v27 }
 0x994   :  { %v5893_v62 = vpop.eup %5892  ;;  %v4242_v36 = vadd.f32 1.0, %v5891_v7 }
 0x995   :  { %v4446_v1 = vsel %vm4445_vm14, %v5889_v8, %v4442_v4  ;;  %v4454_v29 = vmul.f32 %v5893_v62, %v4241_v22  ;;  %vm4459_vm15 = vweird.f32 %v5893_v62 }
 0x996   :  { %v4451_v40 = vsel %vm4448_vm1, %v4450_v34, %v4446_v1  ;;  %5894 = vrcp.f32 %v4242_v36  ;;  %vm4460_vm2 = vmor %vm4458_vm0, %vm4459_vm15  ;;  %v4479_v28 = vand.u32 2147483648, %v4242_v36  ;;  %v4477_v14 = vand.u32 2147483647, %v4242_v36 }
 0x997   :  { %4496 = vst [vmem:[#allocation33 + $0x68] sm:$0xff] %v4451_v40  ;;  %v4455_v33 = vsub.f32 1.0, %v4454_v29  ;;  %vm4473_vm8 = vweird.f32 %v4242_v36 }
 0x998   :  { %v4480_v63 = vor.u32 1.1754944e-38, %v4479_v28  ;;  %vm4478_vm7 = vcmp.eq.f32.partialorder %v4477_v14, 8.507059e+37 }
 0x999   :  { %v4456_v59 = vmul.f32 %v5893_v62, %v4455_v33 }
 0x99b   :  { %v4457_v6 = vadd.f32 %v5893_v62, %v4456_v59 }
 0x99c   :  { %v5895_v3 = vpop.eup %5894 }
 0x99d   :  { %v4461_v45 = vsel %vm4460_vm2, %v5893_v62, %v4457_v6  ;;  %v4469_v47 = vmul.f32 %v5895_v3, %v4242_v36  ;;  %vm4474_vm4 = vweird.f32 %v5895_v3 }
 0x99e   :  { %v4466_v39 = vsel %vm4463_vm3, %v4465_v9, %v4461_v45  ;;  %vm4475_vm11 = vmor %vm4473_vm8, %vm4474_vm4 }
 0x99f   :  { %4497 = vst [vmem:[#allocation33 + $0x70] sm:$0xff] %v4466_v39  ;;  %v4470_v24 = vsub.f32 1.0, %v4469_v47 }
 0x9a1   :  { %v4471_v31 = vmul.f32 %v5895_v3, %v4470_v24 }
 0x9a3   :  { %v4472_v18 = vadd.f32 %v5895_v3, %v4471_v31 }
 0x9a5   :  { %v4476_v43 = vsel %vm4475_vm11, %v5895_v3, %v4472_v18 }
 0x9a6   :  { %v4481_v15 = vsel %vm4478_vm7, %v4480_v63, %v4476_v43 }
 0x9a7   :  { %4498 = vst [vmem:[#allocation33 + $0x78] sm:$0xff] %v4481_v15 }
 0x9a8   :  { %6401 = shalt.err (!%p6398_p6)
}
 0x9a9   :  { %4524 = dma.vmem_to_hbm [thread:$0]  %s4517_s17, 2048, %s4519_s20, [#allocation34], %s6492_s26, %s6492_s26, %s6493_s11  }
 0x9aa   :  { %s6414_s7 = sshra.s32 %s4532_s0, 4  ;;  %s6418_s10 = scalar_lea.hbm %s6708_s8, 128  ;;  %s6415_s7 = int_to_ptr.hbm [resolvable:$true] %s6414_s7 }
 0x9ab   :  { %s6416_s2 = scalar_lea.hbm %s6415_s7, 128  ;;  %p6419_p8 = scmp.lt.s32.totalorder %s6415_s7, %s6708_s8 }
 0x9ac   :  { %p6417_p7 = scmp.ne.s32.totalorder %s6415_s7, %s6416_s2  ;;  %p6420_p9 = scmp.lt.s32.totalorder %s6418_s10, %s6416_s2 }
 0x9ae   :  { %p6421_p10 = por %p6420_p9, %p6419_p8 }
 0x9b0   :  { %p6422_p11 = pnand %p6421_p10, %p6417_p7 }
 0x9b2   :  { %6425 = shalt.err (!%p6422_p11)
}
 0x9b3   :  { %4537 = dma.vmem_to_hbm [thread:$0]  %s4530_s5, 2048, %s4532_s0, [#allocation34], %s6492_s26, %s6492_s26, %s6493_s11  }
 0x9b4   :  { %6446 = dma.done.wait [#allocation4], 2048  }
 0x9b5   :  { %6447 = vsyncadd [#allocation4], 4294965248 }
 0x9b6   :  { %6448 = dma.done.wait [#allocation34], 4096  }
 0x9b7   :  { %6449 = vsyncadd [#allocation34], 4294963200 }
 0x9b8   :  { %4550 = vsyncpa [#allocation3], 1 }
 0x9b9   :  { %4551 = vsyncpa [#allocation6], 1 }
 0x9ba   :  { %4552 = vsyncpa [#allocation9], 1 }
 0x9bb   :  { %4553 = vsyncpa [#allocation12], 1 }
 0x9bc   :  { %4554 = vsyncpa [#allocation15], 1 }
 0x9bd   :  { %4555 = vsyncpa [#allocation18], 1 }
 0x9be   :  { %4556 = vsyncpa [#allocation21], 1 }
 0x9bf   :  { %4557 = vsyncpa [#allocation24], 1 }
 0x9c0   :  { %4558 = vsyncpa [#allocation27], 1 }
 0x9c1   :  { %4559 = vsyncpa [#allocation30], 1 }
 0x9c2   :  { %4560 = vsyncpa [#allocation4], 1 }
 0x9c3   :  { %4561 = vsyncpa [#allocation34], 1 }

</bundles_post_ra>
